<compile_context>
chip_gen: v5e
topology: v5e:2x2
jax: 0.10.0
libtpu: 0.0.40
codegen_flags: <defaults>
</compile_context>

<pallas_src>
import math

import jax
import jax.numpy as jnp
from jax import lax
from jax.experimental import pallas as pl
from jax.experimental.pallas import tpu as pltpu

# ----------------------------- configuration ---------------------------------
HIDDEN = 64          # hidden_size
HEAD_DIM = 16        # head_k_dim
NUM_HEADS = 2        # num_heads == num_v_heads
EXPAND_V = 2
HEAD_V_DIM = int(HEAD_DIM * EXPAND_V)        # 32
NUM_HH = 2           # num_householder
CONV_SIZE = 4
KEY_DIM = NUM_HEADS * HEAD_DIM               # 32
VALUE_DIM = NUM_HEADS * HEAD_V_DIM           # 64
NORM_EPS = 1e-5

# concatenated conv-input channel layout: [q | k | v]; k/v/beta use the
# reference's '(n h d)' ordering (householder slot major, then head, then dim).
Q_OFF = 0
K_OFF = KEY_DIM                              # 32
V_OFF = KEY_DIM + KEY_DIM * NUM_HH           # 96
CONV_DIM = KEY_DIM + KEY_DIM * NUM_HH + VALUE_DIM * NUM_HH   # 224

# fused projection weight column layout: [qkv | g | b | a]
G_OFF = CONV_DIM                             # 224
B_OFF = G_OFF + VALUE_DIM                    # 288
A_OFF = B_OFF + NUM_HEADS * NUM_HH           # 292
PROJ_DIM = A_OFF + NUM_HEADS                 # 294

_LOG2_HEAD_DIM = int(math.log2(HEAD_DIM))    # 4
_LOG2_HEAD_V_DIM = int(math.log2(HEAD_V_DIM))  # 5

B = 2
L = 8                # q_len <= 64  -> fused_recurrent mode (power of two)


# ----------------------------- helpers ----------------------------------------
def _expand_chain_lanes(small, width):
    """(rows, C) -> (rows, C*width): broadcast each per-chain scalar across its
    `width` lanes.  Pure iota compares + selects (VPU), hoisted out of the
    serial recurrence."""
    rows, nchain = small.shape
    lane = lax.broadcasted_iota(jnp.int32, (rows, nchain * width), 1)
    out = jnp.zeros((rows, nchain * width), jnp.float32)
    for c in range(nchain):
        sel = (lane >= c * width) & (lane < (c + 1) * width)
        out = jnp.where(sel, small[:, c:c + 1], out)
    return out


# ----------------------------- fused Pallas kernel ----------------------------
def _make_kernel(G):
    """Build the fused kernel for a group of G batch elements per grid step."""
    R = G * L                    # token rows processed per grid step (b-major)
    C = G * NUM_HEADS            # recurrence chains packed block-diagonally
    SK = C * HEAD_DIM            # packed state rows
    SV = C * HEAD_V_DIM          # packed state cols

    def kernel(x_ref, wall_ref, convw_ref, negA_ref, dtb_ref, onw_ref, wo_ref,
               o_ref):
        # ---- flatten the G batch elements into (b, l) token rows -------------
        if G == 1:
            xf = x_ref[0]                                          # (L, HIDDEN)
        else:
            xf = jnp.concatenate([x_ref[b] for b in range(G)], axis=0)  # (R, HIDDEN)

        # ---- single fused projection: q|k|v|g|b|a in one MXU pass -------------
        proj = jnp.dot(xf, wall_ref[...], preferred_element_type=jnp.float32)
        qkv_lin = proj[:, :CONV_DIM]                               # (R, 224)
        g_lin = proj[:, G_OFF:G_OFF + VALUE_DIM]                   # (R, 64)
        b_lin = proj[:, B_OFF:B_OFF + NUM_HEADS * NUM_HH]          # (R, 4)
        a_lin = proj[:, A_OFF:A_OFF + NUM_HEADS]                   # (R, 2)

        # ---- depthwise causal conv (K=4) + SiLU, fully in registers -----------
        # y[t] = sum_s w[K-1-s] * x[t-s]; pltpu.roll keeps data in vregs (XLU)
        # and the iota mask enforces zero left-padding per batch element.
        convw = convw_ref[...]                                     # (4, 224)
        row_l = lax.broadcasted_iota(jnp.int32, (R, CONV_DIM), 0) & (L - 1)
        acc = qkv_lin * convw[CONV_SIZE - 1:CONV_SIZE, :]
        for s in range(1, CONV_SIZE):
            shifted = pltpu.roll(qkv_lin, shift=s, axis=0)
            shifted = jnp.where(row_l >= s, shifted, 0.0)
            acc = acc + shifted * convw[CONV_SIZE - 1 - s:CONV_SIZE - s, :]
        conv_out = acc * jax.nn.sigmoid(acc)                       # SiLU

        q_raw = conv_out[:, Q_OFF:Q_OFF + KEY_DIM]                 # (R, 32)
        k_raw = conv_out[:, K_OFF:K_OFF + KEY_DIM * NUM_HH]        # (R, 64)
        v_raw = conv_out[:, V_OFF:V_OFF + VALUE_DIM * NUM_HH]      # (R, 128)

        # ---- hoisted (state-independent) per-token quantities ------------------
        # beta = 2 * sigmoid(b_proj(x))   (allow_neg_eigval=True)
        beta = 2.0 * jax.nn.sigmoid(b_lin)                         # (R, 4)
        # forget gate: g = -exp(A_log) * softplus(a + dt_bias)   (stable form)
        ax = a_lin + dtb_ref[...]
        softplus = jnp.maximum(ax, 0.0) + jnp.log(1.0 + jnp.exp(-jnp.abs(ax)))
        eg = jnp.exp(negA_ref[...] * softplus)                     # (R, 2) = exp(g)

        # in-kernel L2 norm (fla: x / (sqrt(sum x^2) + 1e-6)); q also * scale.
        def _l2norm(x, nblocks, extra=1.0):
            parts = []
            for i in range(nblocks):
                blk = x[:, i * HEAD_DIM:(i + 1) * HEAD_DIM]
                nrm = jnp.sqrt(jnp.sum(blk * blk, axis=1, keepdims=True)) + 1e-6
                parts.append(blk * (pl.reciprocal(nrm, approx=True) * extra))
            return jnp.concatenate(parts, axis=1)

        qn = _l2norm(q_raw, NUM_HEADS, extra=HEAD_DIM ** -0.5)     # (R, 32)
        kn = _l2norm(k_raw, NUM_HH * NUM_HEADS)                    # (R, 64)

        # ---- pack the C = G*NUM_HEADS chains along lanes (chain c = b*NH + h) --
        def pack_tok(arr, lo, width):
            # rows (b, l) -> rows l with the G batch blocks concatenated on lanes
            parts = [arr[b * L:(b + 1) * L, lo:lo + width] for b in range(G)]
            return parts[0] if G == 1 else jnp.concatenate(parts, axis=1)

        qp = pack_tok(qn, 0, KEY_DIM)                              # (L, SK)
        dp = _expand_chain_lanes(pack_tok(eg, 0, NUM_HEADS), HEAD_V_DIM)  # (L, SV)
        kp = [pack_tok(kn, j * KEY_DIM, KEY_DIM) for j in range(NUM_HH)]          # (L, SK)
        vp = [pack_tok(v_raw, j * VALUE_DIM, VALUE_DIM) for j in range(NUM_HH)]    # (L, SV)
        bp = [_expand_chain_lanes(pack_tok(beta, j * NUM_HEADS, NUM_HEADS),
                                  HEAD_V_DIM) for j in range(NUM_HH)]              # (L, SV)

        # block-diagonal mask keeps the packed chains independent
        row_c = lax.broadcasted_iota(jnp.int32, (SK, SV), 0) >> _LOG2_HEAD_DIM
        col_c = lax.broadcasted_iota(jnp.int32, (SK, SV), 1) >> _LOG2_HEAD_V_DIM
        blk_mask = row_c == col_c

        # ---- gated delta-product recurrence (fused_recurrent path) -------------
        # Per token (equivalent to the reference's zero-padded q/g sequence of
        # length L*num_householder): decay once (g lives on householder slot 0),
        # NUM_HH delta updates, one output read with q (q lives on the last slot).
        S = jnp.zeros((SK, SV), jnp.float32)
        outs = []
        for l in range(L):                                         # static unroll
            S = S * dp[l:l + 1, :]                                 # gated decay
            for j in range(NUM_HH):                                # static unroll
                k_t = kp[j][l:l + 1, :]                            # (1, SK)
                kv = jnp.dot(k_t, S, preferred_element_type=jnp.float32)   # (1, SV)
                u = (vp[j][l:l + 1, :] - kv) * bp[j][l:l + 1, :]
                outer = lax.dot_general(k_t, u, (((0,), (0,)), ((), ())),
                                        preferred_element_type=jnp.float32)
                S = S + jnp.where(blk_mask, outer, 0.0)
            outs.append(jnp.dot(qp[l:l + 1, :], S,
                                preferred_element_type=jnp.float32))        # (1, SV)
        o_packed = jnp.concatenate(outs, axis=0)                   # (L, SV)

        # ---- unpack chains back to (b, l) token rows ----------------------------
        if G == 1:
            o_core = o_packed                                      # (L, VALUE_DIM)
        else:
            o_core = jnp.concatenate(
                [o_packed[:, b * VALUE_DIM:(b + 1) * VALUE_DIM] for b in range(G)],
                axis=0)                                            # (R, VALUE_DIM)

        # ---- FusedRMSNormGated (per head over Dv) + output projection ----------
        w_norm = onw_ref[...]                                      # (1, Dv)
        parts = []
        for h in range(NUM_HEADS):
            oh = o_core[:, h * HEAD_V_DIM:(h + 1) * HEAD_V_DIM]
            gh = g_lin[:, h * HEAD_V_DIM:(h + 1) * HEAD_V_DIM]
            var = jnp.mean(oh * oh, axis=1, keepdims=True)
            xhat = oh * lax.rsqrt(var + NORM_EPS)
            parts.append(xhat * w_norm * (gh * jax.nn.sigmoid(gh)))
        o_gated = jnp.concatenate(parts, axis=1)                   # (R, VALUE_DIM)

        o_final = jnp.dot(o_gated, wo_ref[...],
                          preferred_element_type=jnp.float32)      # (R, HIDDEN)
        for b in range(G):
            o_ref[b] = o_final[b * L:(b + 1) * L, :].astype(o_ref.dtype)

    return kernel


# ----------------------------- wrapper ----------------------------------------
def _pick_group_size(batch):
    """v7x has 2 TensorCores per chip -> keep grid=(B,) with "parallel" so the
    batch splits across cores; single-TC v5e/v6e -> collapse the grid and pack
    the whole batch into one invocation (one packed recurrence state)."""
    try:
        kind = jax.devices()[0].device_kind.lower()
    except Exception:
        kind = ""
    if "v7" in kind or "tpu7" in kind:
        return 1
    return batch


def gated_delta_product_forward(x, params):
    """x: [B, L, HIDDEN] -> [B, L, HIDDEN]; one fused pallas_call."""
    Bb, Ll, _ = x.shape
    assert Ll == L and Bb % _pick_group_size(Bb) == 0
    G = _pick_group_size(Bb)

    def full_spec(shape):
        nd = len(shape)
        return pl.BlockSpec(shape, lambda i: (0,) * nd)

    return pl.pallas_call(
        _make_kernel(G),
        out_shape=jax.ShapeDtypeStruct((Bb, Ll, HIDDEN), jnp.float32),
        grid=(Bb // G,),
        in_specs=[
            pl.BlockSpec((G, Ll, HIDDEN), lambda i: (i, 0, 0)),      # x
            full_spec((HIDDEN, PROJ_DIM)),                           # fused proj weight
            full_spec((CONV_SIZE, CONV_DIM)),                        # conv taps
            full_spec((1, NUM_HEADS)),                               # -exp(A_log)
            full_spec((1, NUM_HEADS)),                               # dt_bias
            full_spec((1, HEAD_V_DIM)),                              # o_norm weight
            full_spec((VALUE_DIM, HIDDEN)),                          # w_o
        ],
        out_specs=pl.BlockSpec((G, Ll, HIDDEN), lambda i: (i, 0, 0)),
        compiler_params=pltpu.CompilerParams(dimension_semantics=("parallel",)),
    )(x, params['w_all'], params['conv_qkv'], params['neg_A'], params['dt_bias'],
      params['o_norm_w'], params['w_o'])


# ----------------------------- parameters ------------------------------------
def init_params(key):
    ks = jax.random.split(key, 12)
    gain = 2.0 ** (-2.5)

    def xavier(k, fan_in, fan_out):
        limit = gain * math.sqrt(6.0 / (fan_in + fan_out))
        # stored as [in, out] so that y = x @ W (equivalent to torch's x @ W.T)
        return jax.random.uniform(k, (fan_in, fan_out), jnp.float32, -limit, limit)

    def conv_w(k, channels):
        bound = 1.0 / math.sqrt(CONV_SIZE)
        return jax.random.uniform(k, (CONV_SIZE, channels), jnp.float32, -bound, bound)

    w_q = xavier(ks[0], HIDDEN, KEY_DIM)
    w_k = xavier(ks[1], HIDDEN, KEY_DIM * NUM_HH)
    w_v = xavier(ks[2], HIDDEN, VALUE_DIM * NUM_HH)
    w_g = xavier(ks[5], HIDDEN, VALUE_DIM)
    w_b = xavier(ks[3], HIDDEN, NUM_HEADS * NUM_HH)
    w_a = xavier(ks[4], HIDDEN, NUM_HEADS)

    A = jax.random.uniform(ks[9], (NUM_HEADS,), jnp.float32, 1e-3, 16.0)
    dt = jnp.exp(jax.random.uniform(ks[10], (NUM_HEADS,), jnp.float32)
                 * (math.log(0.1) - math.log(0.001)) + math.log(0.001))
    dt = jnp.maximum(dt, 1e-4)
    dt_bias = dt + jnp.log(-jnp.expm1(-dt))

    return dict(
        # one fused projection weight, column layout [q|k|v|g|b|a]
        w_all=jnp.concatenate([w_q, w_k, w_v, w_g, w_b, w_a], axis=1),  # [HIDDEN, 294]
        w_o=xavier(ks[6], VALUE_DIM, HIDDEN),
        conv_qkv=jnp.concatenate([conv_w(ks[7], KEY_DIM),
                                  conv_w(ks[8], KEY_DIM * NUM_HH),
                                  conv_w(ks[11], VALUE_DIM * NUM_HH)], axis=1),
        neg_A=(-A).reshape(1, NUM_HEADS),        # -exp(A_log) precomputed on host
        dt_bias=dt_bias.reshape(1, NUM_HEADS),
        o_norm_w=jnp.ones((1, HEAD_V_DIM), jnp.float32),
    )


# ----------------------------- main -------------------------------------------
if __name__ == "__main__":
    key = jax.random.PRNGKey(0)
    kx, kp = jax.random.split(key)
    params = init_params(kp)
    hidden_states = jax.random.normal(kx, (B, L, HIDDEN), jnp.float32)

    out = gated_delta_product_forward(hidden_states, params)
    out = jax.block_until_ready(out)
    assert out.shape == (B, L, HIDDEN), out.shape
    assert bool(jnp.all(jnp.isfinite(out)))
    print("KERNEL_OK")
</pallas_src>

<mosaic_0001>
module attributes {stable_mosaic.version = 11 : i64} {
  func.func @kernel(%arg0: i32, %arg1: memref<2x8x64xf32, #tpu.memory_space<vmem>>, %arg2: memref<64x294xf32, #tpu.memory_space<vmem>>, %arg3: memref<4x224xf32, #tpu.memory_space<vmem>>, %arg4: memref<1x2xf32, #tpu.memory_space<vmem>>, %arg5: memref<1x2xf32, #tpu.memory_space<vmem>>, %arg6: memref<1x32xf32, #tpu.memory_space<vmem>>, %arg7: memref<64x64xf32, #tpu.memory_space<vmem>>, %arg8: memref<2x8x64xf32, #tpu.memory_space<vmem>>) attributes {dimension_semantics = [#tpu.dimension_semantics<parallel>], iteration_bounds = array<i64: 1>, scalar_prefetch = 0 : i64, scratch_operands = 0 : i64, tpu.core_type = #tpu.core_type<tc>, window_params = [{transform_indices = @transform_0, window_bounds = array<i64: 2, 8, 64>}, {pipeline_mode = #tpu.pipeline_mode<synchronous>, transform_indices = @transform_1, window_bounds = array<i64: 64, 294>}, {pipeline_mode = #tpu.pipeline_mode<synchronous>, transform_indices = @transform_2, window_bounds = array<i64: 4, 224>}, {pipeline_mode = #tpu.pipeline_mode<synchronous>, transform_indices = @transform_3, window_bounds = array<i64: 1, 2>}, {pipeline_mode = #tpu.pipeline_mode<synchronous>, transform_indices = @transform_4, window_bounds = array<i64: 1, 2>}, {pipeline_mode = #tpu.pipeline_mode<synchronous>, transform_indices = @transform_5, window_bounds = array<i64: 1, 32>}, {pipeline_mode = #tpu.pipeline_mode<synchronous>, transform_indices = @transform_6, window_bounds = array<i64: 64, 64>}, {transform_indices = @transform_7, window_bounds = array<i64: 2, 8, 64>}]} {
    %c0 = arith.constant 0 : index
    %c0_0 = arith.constant 0 : index
    %c0_1 = arith.constant 0 : index
    %0 = vector.load %arg1[%c0, %c0_0, %c0_1] : memref<2x8x64xf32, #tpu.memory_space<vmem>>, vector<1x8x64xf32>
    %1 = vector.shape_cast %0 : vector<1x8x64xf32> to vector<8x64xf32>
    %c1 = arith.constant 1 : index
    %c0_2 = arith.constant 0 : index
    %c0_3 = arith.constant 0 : index
    %2 = vector.load %arg1[%c1, %c0_2, %c0_3] : memref<2x8x64xf32, #tpu.memory_space<vmem>>, vector<1x8x64xf32>
    %3 = vector.shape_cast %2 : vector<1x8x64xf32> to vector<8x64xf32>
    %4 = tpu.concatenate %1, %3 in 0 : vector<8x64xf32>, vector<8x64xf32> -> vector<16x64xf32>
    %c0_4 = arith.constant 0 : index
    %c0_5 = arith.constant 0 : index
    %5 = vector.load %arg2[%c0_4, %c0_5] : memref<64x294xf32, #tpu.memory_space<vmem>>, vector<64x294xf32>
    %cst = arith.constant dense<0.000000e+00> : vector<16x294xf32>
    %6 = tpu.matmul %4, %5, %cst {dimension_numbers = #tpu.dot_dimension_numbers<[1], [0], [0], [1], [0, 0, 1, 1], [], []>} : vector<16x64xf32>, vector<64x294xf32>, vector<16x294xf32> -> vector<16x294xf32>
    %7 = vector.extract_strided_slice %6 {offsets = [0, 0], sizes = [16, 224], strides = [1, 1]} : vector<16x294xf32> to vector<16x224xf32>
    %8 = vector.extract_strided_slice %6 {offsets = [0, 224], sizes = [16, 64], strides = [1, 1]} : vector<16x294xf32> to vector<16x64xf32>
    %9 = vector.extract_strided_slice %6 {offsets = [0, 288], sizes = [16, 4], strides = [1, 1]} : vector<16x294xf32> to vector<16x4xf32>
    %10 = vector.extract_strided_slice %6 {offsets = [0, 292], sizes = [16, 2], strides = [1, 1]} : vector<16x294xf32> to vector<16x2xf32>
    %c0_6 = arith.constant 0 : index
    %c0_7 = arith.constant 0 : index
    %11 = vector.load %arg3[%c0_6, %c0_7] : memref<4x224xf32, #tpu.memory_space<vmem>>, vector<4x224xf32>
    %12 = tpu.iota {dimensions = array<i32: 0>} : vector<16x224xi32>
    %c7_i32 = arith.constant 7 : i32
    %13 = vector.broadcast %c7_i32 : i32 to vector<16x224xi32>
    %14 = arith.andi %12, %13 : vector<16x224xi32>
    %15 = vector.extract_strided_slice %11 {offsets = [3, 0], sizes = [1, 224], strides = [1, 1]} : vector<4x224xf32> to vector<1x224xf32>
    %16 = vector.broadcast %15 : vector<1x224xf32> to vector<16x224xf32>
    %17 = arith.mulf %7, %16 : vector<16x224xf32>
    %c1_i32 = arith.constant 1 : i32
    %18 = tpu.dynamic_rotate %7 by %c1_i32 dim 0 : vector<16x224xf32>, i32 -> vector<16x224xf32>
    %c1_i32_8 = arith.constant 1 : i32
    %19 = vector.broadcast %c1_i32_8 : i32 to vector<16x224xi32>
    %20 = arith.cmpi sge, %14, %19 : vector<16x224xi32>
    %cst_9 = arith.constant 0.000000e+00 : f32
    %21 = vector.broadcast %cst_9 : f32 to vector<16x224xf32>
    %22 = arith.select %20, %18, %21 : vector<16x224xi1>, vector<16x224xf32>
    %23 = vector.extract_strided_slice %11 {offsets = [2, 0], sizes = [1, 224], strides = [1, 1]} : vector<4x224xf32> to vector<1x224xf32>
    %24 = vector.broadcast %23 : vector<1x224xf32> to vector<16x224xf32>
    %25 = arith.mulf %22, %24 : vector<16x224xf32>
    %26 = arith.addf %17, %25 : vector<16x224xf32>
    %c2_i32 = arith.constant 2 : i32
    %27 = tpu.dynamic_rotate %7 by %c2_i32 dim 0 : vector<16x224xf32>, i32 -> vector<16x224xf32>
    %c2_i32_10 = arith.constant 2 : i32
    %28 = vector.broadcast %c2_i32_10 : i32 to vector<16x224xi32>
    %29 = arith.cmpi sge, %14, %28 : vector<16x224xi32>
    %cst_11 = arith.constant 0.000000e+00 : f32
    %30 = vector.broadcast %cst_11 : f32 to vector<16x224xf32>
    %31 = arith.select %29, %27, %30 : vector<16x224xi1>, vector<16x224xf32>
    %32 = vector.extract_strided_slice %11 {offsets = [1, 0], sizes = [1, 224], strides = [1, 1]} : vector<4x224xf32> to vector<1x224xf32>
    %33 = vector.broadcast %32 : vector<1x224xf32> to vector<16x224xf32>
    %34 = arith.mulf %31, %33 : vector<16x224xf32>
    %35 = arith.addf %26, %34 : vector<16x224xf32>
    %c3_i32 = arith.constant 3 : i32
    %36 = tpu.dynamic_rotate %7 by %c3_i32 dim 0 : vector<16x224xf32>, i32 -> vector<16x224xf32>
    %c3_i32_12 = arith.constant 3 : i32
    %37 = vector.broadcast %c3_i32_12 : i32 to vector<16x224xi32>
    %38 = arith.cmpi sge, %14, %37 : vector<16x224xi32>
    %cst_13 = arith.constant 0.000000e+00 : f32
    %39 = vector.broadcast %cst_13 : f32 to vector<16x224xf32>
    %40 = arith.select %38, %36, %39 : vector<16x224xi1>, vector<16x224xf32>
    %41 = vector.extract_strided_slice %11 {offsets = [0, 0], sizes = [1, 224], strides = [1, 1]} : vector<4x224xf32> to vector<1x224xf32>
    %42 = vector.broadcast %41 : vector<1x224xf32> to vector<16x224xf32>
    %43 = arith.mulf %40, %42 : vector<16x224xf32>
    %44 = arith.addf %35, %43 : vector<16x224xf32>
    %45 = arith.negf %44 : vector<16x224xf32>
    %46 = math.exp %45 : vector<16x224xf32>
    %cst_14 = arith.constant 1.000000e+00 : f32
    %47 = vector.broadcast %cst_14 : f32 to vector<16x224xf32>
    %48 = arith.addf %47, %46 : vector<16x224xf32>
    %49 = arith.divf %47, %48 : vector<16x224xf32>
    %50 = arith.mulf %44, %49 : vector<16x224xf32>
    %51 = vector.extract_strided_slice %50 {offsets = [0, 0], sizes = [16, 32], strides = [1, 1]} : vector<16x224xf32> to vector<16x32xf32>
    %52 = vector.extract_strided_slice %50 {offsets = [0, 32], sizes = [16, 64], strides = [1, 1]} : vector<16x224xf32> to vector<16x64xf32>
    %53 = vector.extract_strided_slice %50 {offsets = [0, 96], sizes = [16, 128], strides = [1, 1]} : vector<16x224xf32> to vector<16x128xf32>
    %54 = arith.negf %9 : vector<16x4xf32>
    %55 = math.exp %54 : vector<16x4xf32>
    %cst_15 = arith.constant 1.000000e+00 : f32
    %56 = vector.broadcast %cst_15 : f32 to vector<16x4xf32>
    %57 = arith.addf %56, %55 : vector<16x4xf32>
    %58 = arith.divf %56, %57 : vector<16x4xf32>
    %cst_16 = arith.constant 2.000000e+00 : f32
    %59 = vector.broadcast %cst_16 : f32 to vector<16x4xf32>
    %60 = arith.mulf %59, %58 : vector<16x4xf32>
    %c0_17 = arith.constant 0 : index
    %c0_18 = arith.constant 0 : index
    %61 = vector.load %arg5[%c0_17, %c0_18] : memref<1x2xf32, #tpu.memory_space<vmem>>, vector<1x2xf32>
    %62 = vector.broadcast %61 : vector<1x2xf32> to vector<16x2xf32>
    %63 = arith.addf %10, %62 : vector<16x2xf32>
    %cst_19 = arith.constant 0.000000e+00 : f32
    %64 = vector.broadcast %cst_19 : f32 to vector<16x2xf32>
    %65 = arith.maximumf %63, %64 : vector<16x2xf32>
    %66 = math.absf %63 : vector<16x2xf32>
    %cst_20 = arith.constant 0.000000e+00 : f32
    %67 = vector.broadcast %cst_20 : f32 to vector<16x2xf32>
    %68 = arith.subf %67, %66 : vector<16x2xf32>
    %69 = math.exp %68 : vector<16x2xf32>
    %cst_21 = arith.constant 1.000000e+00 : f32
    %70 = vector.broadcast %cst_21 : f32 to vector<16x2xf32>
    %71 = arith.addf %70, %69 : vector<16x2xf32>
    %72 = math.log %71 : vector<16x2xf32>
    %73 = arith.addf %65, %72 : vector<16x2xf32>
    %c0_22 = arith.constant 0 : index
    %c0_23 = arith.constant 0 : index
    %74 = vector.load %arg4[%c0_22, %c0_23] : memref<1x2xf32, #tpu.memory_space<vmem>>, vector<1x2xf32>
    %75 = vector.broadcast %74 : vector<1x2xf32> to vector<16x2xf32>
    %76 = arith.mulf %75, %73 : vector<16x2xf32>
    %77 = math.exp %76 : vector<16x2xf32>
    %78 = vector.extract_strided_slice %51 {offsets = [0, 0], sizes = [16, 16], strides = [1, 1]} : vector<16x32xf32> to vector<16x16xf32>
    %79 = arith.mulf %78, %78 : vector<16x16xf32>
    %cst_24 = arith.constant dense<0.000000e+00> : vector<16xf32>
    %80 = vector.multi_reduction <add>, %79, %cst_24 [1] : vector<16x16xf32> to vector<16xf32>
    %81 = vector.shape_cast %80 : vector<16xf32> to vector<16x1xf32>
    %82 = math.sqrt %81 : vector<16x1xf32>
    %cst_25 = arith.constant 9.99999997E-7 : f32
    %83 = vector.broadcast %cst_25 : f32 to vector<16x1xf32>
    %84 = arith.addf %82, %83 : vector<16x1xf32>
    %85 = tpu.reciprocal %84 {approx = true} : vector<16x1xf32> -> vector<16x1xf32>
    %cst_26 = arith.constant 2.500000e-01 : f32
    %86 = vector.broadcast %cst_26 : f32 to vector<16x1xf32>
    %87 = arith.mulf %85, %86 : vector<16x1xf32>
    %88 = vector.broadcast %87 : vector<16x1xf32> to vector<16x16xf32>
    %89 = arith.mulf %78, %88 : vector<16x16xf32>
    %90 = vector.extract_strided_slice %51 {offsets = [0, 16], sizes = [16, 16], strides = [1, 1]} : vector<16x32xf32> to vector<16x16xf32>
    %91 = arith.mulf %90, %90 : vector<16x16xf32>
    %cst_27 = arith.constant dense<0.000000e+00> : vector<16xf32>
    %92 = vector.multi_reduction <add>, %91, %cst_27 [1] : vector<16x16xf32> to vector<16xf32>
    %93 = vector.shape_cast %92 : vector<16xf32> to vector<16x1xf32>
    %94 = math.sqrt %93 : vector<16x1xf32>
    %cst_28 = arith.constant 9.99999997E-7 : f32
    %95 = vector.broadcast %cst_28 : f32 to vector<16x1xf32>
    %96 = arith.addf %94, %95 : vector<16x1xf32>
    %97 = tpu.reciprocal %96 {approx = true} : vector<16x1xf32> -> vector<16x1xf32>
    %cst_29 = arith.constant 2.500000e-01 : f32
    %98 = vector.broadcast %cst_29 : f32 to vector<16x1xf32>
    %99 = arith.mulf %97, %98 : vector<16x1xf32>
    %100 = vector.broadcast %99 : vector<16x1xf32> to vector<16x16xf32>
    %101 = arith.mulf %90, %100 : vector<16x16xf32>
    %102 = tpu.concatenate %89, %101 in 1 : vector<16x16xf32>, vector<16x16xf32> -> vector<16x32xf32>
    %103 = vector.extract_strided_slice %52 {offsets = [0, 0], sizes = [16, 16], strides = [1, 1]} : vector<16x64xf32> to vector<16x16xf32>
    %104 = arith.mulf %103, %103 : vector<16x16xf32>
    %cst_30 = arith.constant dense<0.000000e+00> : vector<16xf32>
    %105 = vector.multi_reduction <add>, %104, %cst_30 [1] : vector<16x16xf32> to vector<16xf32>
    %106 = vector.shape_cast %105 : vector<16xf32> to vector<16x1xf32>
    %107 = math.sqrt %106 : vector<16x1xf32>
    %cst_31 = arith.constant 9.99999997E-7 : f32
    %108 = vector.broadcast %cst_31 : f32 to vector<16x1xf32>
    %109 = arith.addf %107, %108 : vector<16x1xf32>
    %110 = tpu.reciprocal %109 {approx = true} : vector<16x1xf32> -> vector<16x1xf32>
    %cst_32 = arith.constant 1.000000e+00 : f32
    %111 = vector.broadcast %cst_32 : f32 to vector<16x1xf32>
    %112 = arith.mulf %110, %111 : vector<16x1xf32>
    %113 = vector.broadcast %112 : vector<16x1xf32> to vector<16x16xf32>
    %114 = arith.mulf %103, %113 : vector<16x16xf32>
    %115 = vector.extract_strided_slice %52 {offsets = [0, 16], sizes = [16, 16], strides = [1, 1]} : vector<16x64xf32> to vector<16x16xf32>
    %116 = arith.mulf %115, %115 : vector<16x16xf32>
    %cst_33 = arith.constant dense<0.000000e+00> : vector<16xf32>
    %117 = vector.multi_reduction <add>, %116, %cst_33 [1] : vector<16x16xf32> to vector<16xf32>
    %118 = vector.shape_cast %117 : vector<16xf32> to vector<16x1xf32>
    %119 = math.sqrt %118 : vector<16x1xf32>
    %cst_34 = arith.constant 9.99999997E-7 : f32
    %120 = vector.broadcast %cst_34 : f32 to vector<16x1xf32>
    %121 = arith.addf %119, %120 : vector<16x1xf32>
    %122 = tpu.reciprocal %121 {approx = true} : vector<16x1xf32> -> vector<16x1xf32>
    %cst_35 = arith.constant 1.000000e+00 : f32
    %123 = vector.broadcast %cst_35 : f32 to vector<16x1xf32>
    %124 = arith.mulf %122, %123 : vector<16x1xf32>
    %125 = vector.broadcast %124 : vector<16x1xf32> to vector<16x16xf32>
    %126 = arith.mulf %115, %125 : vector<16x16xf32>
    %127 = vector.extract_strided_slice %52 {offsets = [0, 32], sizes = [16, 16], strides = [1, 1]} : vector<16x64xf32> to vector<16x16xf32>
    %128 = arith.mulf %127, %127 : vector<16x16xf32>
    %cst_36 = arith.constant dense<0.000000e+00> : vector<16xf32>
    %129 = vector.multi_reduction <add>, %128, %cst_36 [1] : vector<16x16xf32> to vector<16xf32>
    %130 = vector.shape_cast %129 : vector<16xf32> to vector<16x1xf32>
    %131 = math.sqrt %130 : vector<16x1xf32>
    %cst_37 = arith.constant 9.99999997E-7 : f32
    %132 = vector.broadcast %cst_37 : f32 to vector<16x1xf32>
    %133 = arith.addf %131, %132 : vector<16x1xf32>
    %134 = tpu.reciprocal %133 {approx = true} : vector<16x1xf32> -> vector<16x1xf32>
    %cst_38 = arith.constant 1.000000e+00 : f32
    %135 = vector.broadcast %cst_38 : f32 to vector<16x1xf32>
    %136 = arith.mulf %134, %135 : vector<16x1xf32>
    %137 = vector.broadcast %136 : vector<16x1xf32> to vector<16x16xf32>
    %138 = arith.mulf %127, %137 : vector<16x16xf32>
    %139 = vector.extract_strided_slice %52 {offsets = [0, 48], sizes = [16, 16], strides = [1, 1]} : vector<16x64xf32> to vector<16x16xf32>
    %140 = arith.mulf %139, %139 : vector<16x16xf32>
    %cst_39 = arith.constant dense<0.000000e+00> : vector<16xf32>
    %141 = vector.multi_reduction <add>, %140, %cst_39 [1] : vector<16x16xf32> to vector<16xf32>
    %142 = vector.shape_cast %141 : vector<16xf32> to vector<16x1xf32>
    %143 = math.sqrt %142 : vector<16x1xf32>
    %cst_40 = arith.constant 9.99999997E-7 : f32
    %144 = vector.broadcast %cst_40 : f32 to vector<16x1xf32>
    %145 = arith.addf %143, %144 : vector<16x1xf32>
    %146 = tpu.reciprocal %145 {approx = true} : vector<16x1xf32> -> vector<16x1xf32>
    %cst_41 = arith.constant 1.000000e+00 : f32
    %147 = vector.broadcast %cst_41 : f32 to vector<16x1xf32>
    %148 = arith.mulf %146, %147 : vector<16x1xf32>
    %149 = vector.broadcast %148 : vector<16x1xf32> to vector<16x16xf32>
    %150 = arith.mulf %139, %149 : vector<16x16xf32>
    %151 = tpu.concatenate %114, %126, %138, %150 in 1 : vector<16x16xf32>, vector<16x16xf32>, vector<16x16xf32>, vector<16x16xf32> -> vector<16x64xf32>
    %152 = vector.extract_strided_slice %102 {offsets = [0, 0], sizes = [8, 32], strides = [1, 1]} : vector<16x32xf32> to vector<8x32xf32>
    %153 = vector.extract_strided_slice %102 {offsets = [8, 0], sizes = [8, 32], strides = [1, 1]} : vector<16x32xf32> to vector<8x32xf32>
    %154 = tpu.concatenate %152, %153 in 1 : vector<8x32xf32>, vector<8x32xf32> -> vector<8x64xf32>
    %155 = vector.extract_strided_slice %77 {offsets = [0, 0], sizes = [8, 2], strides = [1, 1]} : vector<16x2xf32> to vector<8x2xf32>
    %156 = vector.extract_strided_slice %77 {offsets = [8, 0], sizes = [8, 2], strides = [1, 1]} : vector<16x2xf32> to vector<8x2xf32>
    %157 = tpu.concatenate %155, %156 in 1 : vector<8x2xf32>, vector<8x2xf32> -> vector<8x4xf32>
    %158 = tpu.iota {dimensions = array<i32: 1>} : vector<8x128xi32>
    %cst_42 = arith.constant 0.000000e+00 : f32
    %159 = vector.broadcast %cst_42 : f32 to vector<8x128xf32>
    %c0_i32 = arith.constant 0 : i32
    %160 = vector.broadcast %c0_i32 : i32 to vector<8x128xi32>
    %161 = arith.cmpi sge, %158, %160 : vector<8x128xi32>
    %c32_i32 = arith.constant 32 : i32
    %162 = vector.broadcast %c32_i32 : i32 to vector<8x128xi32>
    %163 = arith.cmpi slt, %158, %162 : vector<8x128xi32>
    %164 = arith.andi %161, %163 : vector<8x128xi1>
    %165 = vector.extract_strided_slice %157 {offsets = [0, 0], sizes = [8, 1], strides = [1, 1]} : vector<8x4xf32> to vector<8x1xf32>
    %166 = vector.shape_cast %165 : vector<8x1xf32> to vector<8x1xf32>
    %167 = vector.broadcast %166 : vector<8x1xf32> to vector<8x128xf32>
    %168 = arith.select %164, %167, %159 : vector<8x128xi1>, vector<8x128xf32>
    %c32_i32_43 = arith.constant 32 : i32
    %169 = vector.broadcast %c32_i32_43 : i32 to vector<8x128xi32>
    %170 = arith.cmpi sge, %158, %169 : vector<8x128xi32>
    %c64_i32 = arith.constant 64 : i32
    %171 = vector.broadcast %c64_i32 : i32 to vector<8x128xi32>
    %172 = arith.cmpi slt, %158, %171 : vector<8x128xi32>
    %173 = arith.andi %170, %172 : vector<8x128xi1>
    %174 = vector.extract_strided_slice %157 {offsets = [0, 1], sizes = [8, 1], strides = [1, 1]} : vector<8x4xf32> to vector<8x1xf32>
    %175 = vector.shape_cast %174 : vector<8x1xf32> to vector<8x1xf32>
    %176 = vector.broadcast %175 : vector<8x1xf32> to vector<8x128xf32>
    %177 = arith.select %173, %176, %168 : vector<8x128xi1>, vector<8x128xf32>
    %c64_i32_44 = arith.constant 64 : i32
    %178 = vector.broadcast %c64_i32_44 : i32 to vector<8x128xi32>
    %179 = arith.cmpi sge, %158, %178 : vector<8x128xi32>
    %c96_i32 = arith.constant 96 : i32
    %180 = vector.broadcast %c96_i32 : i32 to vector<8x128xi32>
    %181 = arith.cmpi slt, %158, %180 : vector<8x128xi32>
    %182 = arith.andi %179, %181 : vector<8x128xi1>
    %183 = vector.extract_strided_slice %157 {offsets = [0, 2], sizes = [8, 1], strides = [1, 1]} : vector<8x4xf32> to vector<8x1xf32>
    %184 = vector.shape_cast %183 : vector<8x1xf32> to vector<8x1xf32>
    %185 = vector.broadcast %184 : vector<8x1xf32> to vector<8x128xf32>
    %186 = arith.select %182, %185, %177 : vector<8x128xi1>, vector<8x128xf32>
    %c96_i32_45 = arith.constant 96 : i32
    %187 = vector.broadcast %c96_i32_45 : i32 to vector<8x128xi32>
    %188 = arith.cmpi sge, %158, %187 : vector<8x128xi32>
    %c128_i32 = arith.constant 128 : i32
    %189 = vector.broadcast %c128_i32 : i32 to vector<8x128xi32>
    %190 = arith.cmpi slt, %158, %189 : vector<8x128xi32>
    %191 = arith.andi %188, %190 : vector<8x128xi1>
    %192 = vector.extract_strided_slice %157 {offsets = [0, 3], sizes = [8, 1], strides = [1, 1]} : vector<8x4xf32> to vector<8x1xf32>
    %193 = vector.shape_cast %192 : vector<8x1xf32> to vector<8x1xf32>
    %194 = vector.broadcast %193 : vector<8x1xf32> to vector<8x128xf32>
    %195 = arith.select %191, %194, %186 : vector<8x128xi1>, vector<8x128xf32>
    %196 = vector.extract_strided_slice %151 {offsets = [0, 0], sizes = [8, 32], strides = [1, 1]} : vector<16x64xf32> to vector<8x32xf32>
    %197 = vector.extract_strided_slice %151 {offsets = [8, 0], sizes = [8, 32], strides = [1, 1]} : vector<16x64xf32> to vector<8x32xf32>
    %198 = tpu.concatenate %196, %197 in 1 : vector<8x32xf32>, vector<8x32xf32> -> vector<8x64xf32>
    %199 = vector.extract_strided_slice %151 {offsets = [0, 32], sizes = [8, 32], strides = [1, 1]} : vector<16x64xf32> to vector<8x32xf32>
    %200 = vector.extract_strided_slice %151 {offsets = [8, 32], sizes = [8, 32], strides = [1, 1]} : vector<16x64xf32> to vector<8x32xf32>
    %201 = tpu.concatenate %199, %200 in 1 : vector<8x32xf32>, vector<8x32xf32> -> vector<8x64xf32>
    %202 = vector.extract_strided_slice %53 {offsets = [0, 0], sizes = [8, 64], strides = [1, 1]} : vector<16x128xf32> to vector<8x64xf32>
    %203 = vector.extract_strided_slice %53 {offsets = [8, 0], sizes = [8, 64], strides = [1, 1]} : vector<16x128xf32> to vector<8x64xf32>
    %204 = tpu.concatenate %202, %203 in 1 : vector<8x64xf32>, vector<8x64xf32> -> vector<8x128xf32>
    %205 = vector.extract_strided_slice %53 {offsets = [0, 64], sizes = [8, 64], strides = [1, 1]} : vector<16x128xf32> to vector<8x64xf32>
    %206 = vector.extract_strided_slice %53 {offsets = [8, 64], sizes = [8, 64], strides = [1, 1]} : vector<16x128xf32> to vector<8x64xf32>
    %207 = tpu.concatenate %205, %206 in 1 : vector<8x64xf32>, vector<8x64xf32> -> vector<8x128xf32>
    %208 = vector.extract_strided_slice %60 {offsets = [0, 0], sizes = [8, 2], strides = [1, 1]} : vector<16x4xf32> to vector<8x2xf32>
    %209 = vector.extract_strided_slice %60 {offsets = [8, 0], sizes = [8, 2], strides = [1, 1]} : vector<16x4xf32> to vector<8x2xf32>
    %210 = tpu.concatenate %208, %209 in 1 : vector<8x2xf32>, vector<8x2xf32> -> vector<8x4xf32>
    %211 = tpu.iota {dimensions = array<i32: 1>} : vector<8x128xi32>
    %cst_46 = arith.constant 0.000000e+00 : f32
    %212 = vector.broadcast %cst_46 : f32 to vector<8x128xf32>
    %c0_i32_47 = arith.constant 0 : i32
    %213 = vector.broadcast %c0_i32_47 : i32 to vector<8x128xi32>
    %214 = arith.cmpi sge, %211, %213 : vector<8x128xi32>
    %c32_i32_48 = arith.constant 32 : i32
    %215 = vector.broadcast %c32_i32_48 : i32 to vector<8x128xi32>
    %216 = arith.cmpi slt, %211, %215 : vector<8x128xi32>
    %217 = arith.andi %214, %216 : vector<8x128xi1>
    %218 = vector.extract_strided_slice %210 {offsets = [0, 0], sizes = [8, 1], strides = [1, 1]} : vector<8x4xf32> to vector<8x1xf32>
    %219 = vector.shape_cast %218 : vector<8x1xf32> to vector<8x1xf32>
    %220 = vector.broadcast %219 : vector<8x1xf32> to vector<8x128xf32>
    %221 = arith.select %217, %220, %212 : vector<8x128xi1>, vector<8x128xf32>
    %c32_i32_49 = arith.constant 32 : i32
    %222 = vector.broadcast %c32_i32_49 : i32 to vector<8x128xi32>
    %223 = arith.cmpi sge, %211, %222 : vector<8x128xi32>
    %c64_i32_50 = arith.constant 64 : i32
    %224 = vector.broadcast %c64_i32_50 : i32 to vector<8x128xi32>
    %225 = arith.cmpi slt, %211, %224 : vector<8x128xi32>
    %226 = arith.andi %223, %225 : vector<8x128xi1>
    %227 = vector.extract_strided_slice %210 {offsets = [0, 1], sizes = [8, 1], strides = [1, 1]} : vector<8x4xf32> to vector<8x1xf32>
    %228 = vector.shape_cast %227 : vector<8x1xf32> to vector<8x1xf32>
    %229 = vector.broadcast %228 : vector<8x1xf32> to vector<8x128xf32>
    %230 = arith.select %226, %229, %221 : vector<8x128xi1>, vector<8x128xf32>
    %c64_i32_51 = arith.constant 64 : i32
    %231 = vector.broadcast %c64_i32_51 : i32 to vector<8x128xi32>
    %232 = arith.cmpi sge, %211, %231 : vector<8x128xi32>
    %c96_i32_52 = arith.constant 96 : i32
    %233 = vector.broadcast %c96_i32_52 : i32 to vector<8x128xi32>
    %234 = arith.cmpi slt, %211, %233 : vector<8x128xi32>
    %235 = arith.andi %232, %234 : vector<8x128xi1>
    %236 = vector.extract_strided_slice %210 {offsets = [0, 2], sizes = [8, 1], strides = [1, 1]} : vector<8x4xf32> to vector<8x1xf32>
    %237 = vector.shape_cast %236 : vector<8x1xf32> to vector<8x1xf32>
    %238 = vector.broadcast %237 : vector<8x1xf32> to vector<8x128xf32>
    %239 = arith.select %235, %238, %230 : vector<8x128xi1>, vector<8x128xf32>
    %c96_i32_53 = arith.constant 96 : i32
    %240 = vector.broadcast %c96_i32_53 : i32 to vector<8x128xi32>
    %241 = arith.cmpi sge, %211, %240 : vector<8x128xi32>
    %c128_i32_54 = arith.constant 128 : i32
    %242 = vector.broadcast %c128_i32_54 : i32 to vector<8x128xi32>
    %243 = arith.cmpi slt, %211, %242 : vector<8x128xi32>
    %244 = arith.andi %241, %243 : vector<8x128xi1>
    %245 = vector.extract_strided_slice %210 {offsets = [0, 3], sizes = [8, 1], strides = [1, 1]} : vector<8x4xf32> to vector<8x1xf32>
    %246 = vector.shape_cast %245 : vector<8x1xf32> to vector<8x1xf32>
    %247 = vector.broadcast %246 : vector<8x1xf32> to vector<8x128xf32>
    %248 = arith.select %244, %247, %239 : vector<8x128xi1>, vector<8x128xf32>
    %249 = vector.extract_strided_slice %60 {offsets = [0, 2], sizes = [8, 2], strides = [1, 1]} : vector<16x4xf32> to vector<8x2xf32>
    %250 = vector.extract_strided_slice %60 {offsets = [8, 2], sizes = [8, 2], strides = [1, 1]} : vector<16x4xf32> to vector<8x2xf32>
    %251 = tpu.concatenate %249, %250 in 1 : vector<8x2xf32>, vector<8x2xf32> -> vector<8x4xf32>
    %252 = tpu.iota {dimensions = array<i32: 1>} : vector<8x128xi32>
    %cst_55 = arith.constant 0.000000e+00 : f32
    %253 = vector.broadcast %cst_55 : f32 to vector<8x128xf32>
    %c0_i32_56 = arith.constant 0 : i32
    %254 = vector.broadcast %c0_i32_56 : i32 to vector<8x128xi32>
    %255 = arith.cmpi sge, %252, %254 : vector<8x128xi32>
    %c32_i32_57 = arith.constant 32 : i32
    %256 = vector.broadcast %c32_i32_57 : i32 to vector<8x128xi32>
    %257 = arith.cmpi slt, %252, %256 : vector<8x128xi32>
    %258 = arith.andi %255, %257 : vector<8x128xi1>
    %259 = vector.extract_strided_slice %251 {offsets = [0, 0], sizes = [8, 1], strides = [1, 1]} : vector<8x4xf32> to vector<8x1xf32>
    %260 = vector.shape_cast %259 : vector<8x1xf32> to vector<8x1xf32>
    %261 = vector.broadcast %260 : vector<8x1xf32> to vector<8x128xf32>
    %262 = arith.select %258, %261, %253 : vector<8x128xi1>, vector<8x128xf32>
    %c32_i32_58 = arith.constant 32 : i32
    %263 = vector.broadcast %c32_i32_58 : i32 to vector<8x128xi32>
    %264 = arith.cmpi sge, %252, %263 : vector<8x128xi32>
    %c64_i32_59 = arith.constant 64 : i32
    %265 = vector.broadcast %c64_i32_59 : i32 to vector<8x128xi32>
    %266 = arith.cmpi slt, %252, %265 : vector<8x128xi32>
    %267 = arith.andi %264, %266 : vector<8x128xi1>
    %268 = vector.extract_strided_slice %251 {offsets = [0, 1], sizes = [8, 1], strides = [1, 1]} : vector<8x4xf32> to vector<8x1xf32>
    %269 = vector.shape_cast %268 : vector<8x1xf32> to vector<8x1xf32>
    %270 = vector.broadcast %269 : vector<8x1xf32> to vector<8x128xf32>
    %271 = arith.select %267, %270, %262 : vector<8x128xi1>, vector<8x128xf32>
    %c64_i32_60 = arith.constant 64 : i32
    %272 = vector.broadcast %c64_i32_60 : i32 to vector<8x128xi32>
    %273 = arith.cmpi sge, %252, %272 : vector<8x128xi32>
    %c96_i32_61 = arith.constant 96 : i32
    %274 = vector.broadcast %c96_i32_61 : i32 to vector<8x128xi32>
    %275 = arith.cmpi slt, %252, %274 : vector<8x128xi32>
    %276 = arith.andi %273, %275 : vector<8x128xi1>
    %277 = vector.extract_strided_slice %251 {offsets = [0, 2], sizes = [8, 1], strides = [1, 1]} : vector<8x4xf32> to vector<8x1xf32>
    %278 = vector.shape_cast %277 : vector<8x1xf32> to vector<8x1xf32>
    %279 = vector.broadcast %278 : vector<8x1xf32> to vector<8x128xf32>
    %280 = arith.select %276, %279, %271 : vector<8x128xi1>, vector<8x128xf32>
    %c96_i32_62 = arith.constant 96 : i32
    %281 = vector.broadcast %c96_i32_62 : i32 to vector<8x128xi32>
    %282 = arith.cmpi sge, %252, %281 : vector<8x128xi32>
    %c128_i32_63 = arith.constant 128 : i32
    %283 = vector.broadcast %c128_i32_63 : i32 to vector<8x128xi32>
    %284 = arith.cmpi slt, %252, %283 : vector<8x128xi32>
    %285 = arith.andi %282, %284 : vector<8x128xi1>
    %286 = vector.extract_strided_slice %251 {offsets = [0, 3], sizes = [8, 1], strides = [1, 1]} : vector<8x4xf32> to vector<8x1xf32>
    %287 = vector.shape_cast %286 : vector<8x1xf32> to vector<8x1xf32>
    %288 = vector.broadcast %287 : vector<8x1xf32> to vector<8x128xf32>
    %289 = arith.select %285, %288, %280 : vector<8x128xi1>, vector<8x128xf32>
    %290 = tpu.iota {dimensions = array<i32: 0>} : vector<64x128xi32>
    %c4_i32 = arith.constant 4 : i32
    %291 = vector.broadcast %c4_i32 : i32 to vector<64x128xi32>
    %292 = arith.shrsi %290, %291 : vector<64x128xi32>
    %293 = tpu.iota {dimensions = array<i32: 1>} : vector<64x128xi32>
    %c5_i32 = arith.constant 5 : i32
    %294 = vector.broadcast %c5_i32 : i32 to vector<64x128xi32>
    %295 = arith.shrsi %293, %294 : vector<64x128xi32>
    %296 = arith.cmpi eq, %292, %295 : vector<64x128xi32>
    %cst_64 = arith.constant 0.000000e+00 : f32
    %297 = vector.broadcast %cst_64 : f32 to vector<64x128xf32>
    %298 = vector.extract_strided_slice %195 {offsets = [0, 0], sizes = [1, 128], strides = [1, 1]} : vector<8x128xf32> to vector<1x128xf32>
    %299 = vector.broadcast %298 : vector<1x128xf32> to vector<64x128xf32>
    %300 = arith.mulf %297, %299 : vector<64x128xf32>
    %301 = vector.extract_strided_slice %198 {offsets = [0, 0], sizes = [1, 64], strides = [1, 1]} : vector<8x64xf32> to vector<1x64xf32>
    %cst_65 = arith.constant dense<0.000000e+00> : vector<1x128xf32>
    %302 = tpu.matmul %301, %300, %cst_65 {dimension_numbers = #tpu.dot_dimension_numbers<[1], [0], [0], [1], [0, 0, 1, 1], [], []>} : vector<1x64xf32>, vector<64x128xf32>, vector<1x128xf32> -> vector<1x128xf32>
    %303 = vector.extract_strided_slice %204 {offsets = [0, 0], sizes = [1, 128], strides = [1, 1]} : vector<8x128xf32> to vector<1x128xf32>
    %304 = arith.subf %303, %302 : vector<1x128xf32>
    %305 = vector.extract_strided_slice %248 {offsets = [0, 0], sizes = [1, 128], strides = [1, 1]} : vector<8x128xf32> to vector<1x128xf32>
    %306 = arith.mulf %304, %305 : vector<1x128xf32>
    %cst_66 = arith.constant dense<0.000000e+00> : vector<64x128xf32>
    %307 = tpu.matmul %301, %306, %cst_66 {dimension_numbers = #tpu.dot_dimension_numbers<[0], [0], [1], [1], [0, 1, 1, 1], [], []>} : vector<1x64xf32>, vector<1x128xf32>, vector<64x128xf32> -> vector<64x128xf32>
    %cst_67 = arith.constant 0.000000e+00 : f32
    %308 = vector.broadcast %cst_67 : f32 to vector<64x128xf32>
    %309 = arith.select %296, %307, %308 : vector<64x128xi1>, vector<64x128xf32>
    %310 = arith.addf %300, %309 : vector<64x128xf32>
    %311 = vector.extract_strided_slice %201 {offsets = [0, 0], sizes = [1, 64], strides = [1, 1]} : vector<8x64xf32> to vector<1x64xf32>
    %cst_68 = arith.constant dense<0.000000e+00> : vector<1x128xf32>
    %312 = tpu.matmul %311, %310, %cst_68 {dimension_numbers = #tpu.dot_dimension_numbers<[1], [0], [0], [1], [0, 0, 1, 1], [], []>} : vector<1x64xf32>, vector<64x128xf32>, vector<1x128xf32> -> vector<1x128xf32>
    %313 = vector.extract_strided_slice %207 {offsets = [0, 0], sizes = [1, 128], strides = [1, 1]} : vector<8x128xf32> to vector<1x128xf32>
    %314 = arith.subf %313, %312 : vector<1x128xf32>
    %315 = vector.extract_strided_slice %289 {offsets = [0, 0], sizes = [1, 128], strides = [1, 1]} : vector<8x128xf32> to vector<1x128xf32>
    %316 = arith.mulf %314, %315 : vector<1x128xf32>
    %cst_69 = arith.constant dense<0.000000e+00> : vector<64x128xf32>
    %317 = tpu.matmul %311, %316, %cst_69 {dimension_numbers = #tpu.dot_dimension_numbers<[0], [0], [1], [1], [0, 1, 1, 1], [], []>} : vector<1x64xf32>, vector<1x128xf32>, vector<64x128xf32> -> vector<64x128xf32>
    %cst_70 = arith.constant 0.000000e+00 : f32
    %318 = vector.broadcast %cst_70 : f32 to vector<64x128xf32>
    %319 = arith.select %296, %317, %318 : vector<64x128xi1>, vector<64x128xf32>
    %320 = arith.addf %310, %319 : vector<64x128xf32>
    %321 = vector.extract_strided_slice %154 {offsets = [0, 0], sizes = [1, 64], strides = [1, 1]} : vector<8x64xf32> to vector<1x64xf32>
    %cst_71 = arith.constant dense<0.000000e+00> : vector<1x128xf32>
    %322 = tpu.matmul %321, %320, %cst_71 {dimension_numbers = #tpu.dot_dimension_numbers<[1], [0], [0], [1], [0, 0, 1, 1], [], []>} : vector<1x64xf32>, vector<64x128xf32>, vector<1x128xf32> -> vector<1x128xf32>
    %323 = vector.extract_strided_slice %195 {offsets = [1, 0], sizes = [1, 128], strides = [1, 1]} : vector<8x128xf32> to vector<1x128xf32>
    %324 = vector.broadcast %323 : vector<1x128xf32> to vector<64x128xf32>
    %325 = arith.mulf %320, %324 : vector<64x128xf32>
    %326 = vector.extract_strided_slice %198 {offsets = [1, 0], sizes = [1, 64], strides = [1, 1]} : vector<8x64xf32> to vector<1x64xf32>
    %cst_72 = arith.constant dense<0.000000e+00> : vector<1x128xf32>
    %327 = tpu.matmul %326, %325, %cst_72 {dimension_numbers = #tpu.dot_dimension_numbers<[1], [0], [0], [1], [0, 0, 1, 1], [], []>} : vector<1x64xf32>, vector<64x128xf32>, vector<1x128xf32> -> vector<1x128xf32>
    %328 = vector.extract_strided_slice %204 {offsets = [1, 0], sizes = [1, 128], strides = [1, 1]} : vector<8x128xf32> to vector<1x128xf32>
    %329 = arith.subf %328, %327 : vector<1x128xf32>
    %330 = vector.extract_strided_slice %248 {offsets = [1, 0], sizes = [1, 128], strides = [1, 1]} : vector<8x128xf32> to vector<1x128xf32>
    %331 = arith.mulf %329, %330 : vector<1x128xf32>
    %cst_73 = arith.constant dense<0.000000e+00> : vector<64x128xf32>
    %332 = tpu.matmul %326, %331, %cst_73 {dimension_numbers = #tpu.dot_dimension_numbers<[0], [0], [1], [1], [0, 1, 1, 1], [], []>} : vector<1x64xf32>, vector<1x128xf32>, vector<64x128xf32> -> vector<64x128xf32>
    %cst_74 = arith.constant 0.000000e+00 : f32
    %333 = vector.broadcast %cst_74 : f32 to vector<64x128xf32>
    %334 = arith.select %296, %332, %333 : vector<64x128xi1>, vector<64x128xf32>
    %335 = arith.addf %325, %334 : vector<64x128xf32>
    %336 = vector.extract_strided_slice %201 {offsets = [1, 0], sizes = [1, 64], strides = [1, 1]} : vector<8x64xf32> to vector<1x64xf32>
    %cst_75 = arith.constant dense<0.000000e+00> : vector<1x128xf32>
    %337 = tpu.matmul %336, %335, %cst_75 {dimension_numbers = #tpu.dot_dimension_numbers<[1], [0], [0], [1], [0, 0, 1, 1], [], []>} : vector<1x64xf32>, vector<64x128xf32>, vector<1x128xf32> -> vector<1x128xf32>
    %338 = vector.extract_strided_slice %207 {offsets = [1, 0], sizes = [1, 128], strides = [1, 1]} : vector<8x128xf32> to vector<1x128xf32>
    %339 = arith.subf %338, %337 : vector<1x128xf32>
    %340 = vector.extract_strided_slice %289 {offsets = [1, 0], sizes = [1, 128], strides = [1, 1]} : vector<8x128xf32> to vector<1x128xf32>
    %341 = arith.mulf %339, %340 : vector<1x128xf32>
    %cst_76 = arith.constant dense<0.000000e+00> : vector<64x128xf32>
    %342 = tpu.matmul %336, %341, %cst_76 {dimension_numbers = #tpu.dot_dimension_numbers<[0], [0], [1], [1], [0, 1, 1, 1], [], []>} : vector<1x64xf32>, vector<1x128xf32>, vector<64x128xf32> -> vector<64x128xf32>
    %cst_77 = arith.constant 0.000000e+00 : f32
    %343 = vector.broadcast %cst_77 : f32 to vector<64x128xf32>
    %344 = arith.select %296, %342, %343 : vector<64x128xi1>, vector<64x128xf32>
    %345 = arith.addf %335, %344 : vector<64x128xf32>
    %346 = vector.extract_strided_slice %154 {offsets = [1, 0], sizes = [1, 64], strides = [1, 1]} : vector<8x64xf32> to vector<1x64xf32>
    %cst_78 = arith.constant dense<0.000000e+00> : vector<1x128xf32>
    %347 = tpu.matmul %346, %345, %cst_78 {dimension_numbers = #tpu.dot_dimension_numbers<[1], [0], [0], [1], [0, 0, 1, 1], [], []>} : vector<1x64xf32>, vector<64x128xf32>, vector<1x128xf32> -> vector<1x128xf32>
    %348 = vector.extract_strided_slice %195 {offsets = [2, 0], sizes = [1, 128], strides = [1, 1]} : vector<8x128xf32> to vector<1x128xf32>
    %349 = vector.broadcast %348 : vector<1x128xf32> to vector<64x128xf32>
    %350 = arith.mulf %345, %349 : vector<64x128xf32>
    %351 = vector.extract_strided_slice %198 {offsets = [2, 0], sizes = [1, 64], strides = [1, 1]} : vector<8x64xf32> to vector<1x64xf32>
    %cst_79 = arith.constant dense<0.000000e+00> : vector<1x128xf32>
    %352 = tpu.matmul %351, %350, %cst_79 {dimension_numbers = #tpu.dot_dimension_numbers<[1], [0], [0], [1], [0, 0, 1, 1], [], []>} : vector<1x64xf32>, vector<64x128xf32>, vector<1x128xf32> -> vector<1x128xf32>
    %353 = vector.extract_strided_slice %204 {offsets = [2, 0], sizes = [1, 128], strides = [1, 1]} : vector<8x128xf32> to vector<1x128xf32>
    %354 = arith.subf %353, %352 : vector<1x128xf32>
    %355 = vector.extract_strided_slice %248 {offsets = [2, 0], sizes = [1, 128], strides = [1, 1]} : vector<8x128xf32> to vector<1x128xf32>
    %356 = arith.mulf %354, %355 : vector<1x128xf32>
    %cst_80 = arith.constant dense<0.000000e+00> : vector<64x128xf32>
    %357 = tpu.matmul %351, %356, %cst_80 {dimension_numbers = #tpu.dot_dimension_numbers<[0], [0], [1], [1], [0, 1, 1, 1], [], []>} : vector<1x64xf32>, vector<1x128xf32>, vector<64x128xf32> -> vector<64x128xf32>
    %cst_81 = arith.constant 0.000000e+00 : f32
    %358 = vector.broadcast %cst_81 : f32 to vector<64x128xf32>
    %359 = arith.select %296, %357, %358 : vector<64x128xi1>, vector<64x128xf32>
    %360 = arith.addf %350, %359 : vector<64x128xf32>
    %361 = vector.extract_strided_slice %201 {offsets = [2, 0], sizes = [1, 64], strides = [1, 1]} : vector<8x64xf32> to vector<1x64xf32>
    %cst_82 = arith.constant dense<0.000000e+00> : vector<1x128xf32>
    %362 = tpu.matmul %361, %360, %cst_82 {dimension_numbers = #tpu.dot_dimension_numbers<[1], [0], [0], [1], [0, 0, 1, 1], [], []>} : vector<1x64xf32>, vector<64x128xf32>, vector<1x128xf32> -> vector<1x128xf32>
    %363 = vector.extract_strided_slice %207 {offsets = [2, 0], sizes = [1, 128], strides = [1, 1]} : vector<8x128xf32> to vector<1x128xf32>
    %364 = arith.subf %363, %362 : vector<1x128xf32>
    %365 = vector.extract_strided_slice %289 {offsets = [2, 0], sizes = [1, 128], strides = [1, 1]} : vector<8x128xf32> to vector<1x128xf32>
    %366 = arith.mulf %364, %365 : vector<1x128xf32>
    %cst_83 = arith.constant dense<0.000000e+00> : vector<64x128xf32>
    %367 = tpu.matmul %361, %366, %cst_83 {dimension_numbers = #tpu.dot_dimension_numbers<[0], [0], [1], [1], [0, 1, 1, 1], [], []>} : vector<1x64xf32>, vector<1x128xf32>, vector<64x128xf32> -> vector<64x128xf32>
    %cst_84 = arith.constant 0.000000e+00 : f32
    %368 = vector.broadcast %cst_84 : f32 to vector<64x128xf32>
    %369 = arith.select %296, %367, %368 : vector<64x128xi1>, vector<64x128xf32>
    %370 = arith.addf %360, %369 : vector<64x128xf32>
    %371 = vector.extract_strided_slice %154 {offsets = [2, 0], sizes = [1, 64], strides = [1, 1]} : vector<8x64xf32> to vector<1x64xf32>
    %cst_85 = arith.constant dense<0.000000e+00> : vector<1x128xf32>
    %372 = tpu.matmul %371, %370, %cst_85 {dimension_numbers = #tpu.dot_dimension_numbers<[1], [0], [0], [1], [0, 0, 1, 1], [], []>} : vector<1x64xf32>, vector<64x128xf32>, vector<1x128xf32> -> vector<1x128xf32>
    %373 = vector.extract_strided_slice %195 {offsets = [3, 0], sizes = [1, 128], strides = [1, 1]} : vector<8x128xf32> to vector<1x128xf32>
    %374 = vector.broadcast %373 : vector<1x128xf32> to vector<64x128xf32>
    %375 = arith.mulf %370, %374 : vector<64x128xf32>
    %376 = vector.extract_strided_slice %198 {offsets = [3, 0], sizes = [1, 64], strides = [1, 1]} : vector<8x64xf32> to vector<1x64xf32>
    %cst_86 = arith.constant dense<0.000000e+00> : vector<1x128xf32>
    %377 = tpu.matmul %376, %375, %cst_86 {dimension_numbers = #tpu.dot_dimension_numbers<[1], [0], [0], [1], [0, 0, 1, 1], [], []>} : vector<1x64xf32>, vector<64x128xf32>, vector<1x128xf32> -> vector<1x128xf32>
    %378 = vector.extract_strided_slice %204 {offsets = [3, 0], sizes = [1, 128], strides = [1, 1]} : vector<8x128xf32> to vector<1x128xf32>
    %379 = arith.subf %378, %377 : vector<1x128xf32>
    %380 = vector.extract_strided_slice %248 {offsets = [3, 0], sizes = [1, 128], strides = [1, 1]} : vector<8x128xf32> to vector<1x128xf32>
    %381 = arith.mulf %379, %380 : vector<1x128xf32>
    %cst_87 = arith.constant dense<0.000000e+00> : vector<64x128xf32>
    %382 = tpu.matmul %376, %381, %cst_87 {dimension_numbers = #tpu.dot_dimension_numbers<[0], [0], [1], [1], [0, 1, 1, 1], [], []>} : vector<1x64xf32>, vector<1x128xf32>, vector<64x128xf32> -> vector<64x128xf32>
    %cst_88 = arith.constant 0.000000e+00 : f32
    %383 = vector.broadcast %cst_88 : f32 to vector<64x128xf32>
    %384 = arith.select %296, %382, %383 : vector<64x128xi1>, vector<64x128xf32>
    %385 = arith.addf %375, %384 : vector<64x128xf32>
    %386 = vector.extract_strided_slice %201 {offsets = [3, 0], sizes = [1, 64], strides = [1, 1]} : vector<8x64xf32> to vector<1x64xf32>
    %cst_89 = arith.constant dense<0.000000e+00> : vector<1x128xf32>
    %387 = tpu.matmul %386, %385, %cst_89 {dimension_numbers = #tpu.dot_dimension_numbers<[1], [0], [0], [1], [0, 0, 1, 1], [], []>} : vector<1x64xf32>, vector<64x128xf32>, vector<1x128xf32> -> vector<1x128xf32>
    %388 = vector.extract_strided_slice %207 {offsets = [3, 0], sizes = [1, 128], strides = [1, 1]} : vector<8x128xf32> to vector<1x128xf32>
    %389 = arith.subf %388, %387 : vector<1x128xf32>
    %390 = vector.extract_strided_slice %289 {offsets = [3, 0], sizes = [1, 128], strides = [1, 1]} : vector<8x128xf32> to vector<1x128xf32>
    %391 = arith.mulf %389, %390 : vector<1x128xf32>
    %cst_90 = arith.constant dense<0.000000e+00> : vector<64x128xf32>
    %392 = tpu.matmul %386, %391, %cst_90 {dimension_numbers = #tpu.dot_dimension_numbers<[0], [0], [1], [1], [0, 1, 1, 1], [], []>} : vector<1x64xf32>, vector<1x128xf32>, vector<64x128xf32> -> vector<64x128xf32>
    %cst_91 = arith.constant 0.000000e+00 : f32
    %393 = vector.broadcast %cst_91 : f32 to vector<64x128xf32>
    %394 = arith.select %296, %392, %393 : vector<64x128xi1>, vector<64x128xf32>
    %395 = arith.addf %385, %394 : vector<64x128xf32>
    %396 = vector.extract_strided_slice %154 {offsets = [3, 0], sizes = [1, 64], strides = [1, 1]} : vector<8x64xf32> to vector<1x64xf32>
    %cst_92 = arith.constant dense<0.000000e+00> : vector<1x128xf32>
    %397 = tpu.matmul %396, %395, %cst_92 {dimension_numbers = #tpu.dot_dimension_numbers<[1], [0], [0], [1], [0, 0, 1, 1], [], []>} : vector<1x64xf32>, vector<64x128xf32>, vector<1x128xf32> -> vector<1x128xf32>
    %398 = vector.extract_strided_slice %195 {offsets = [4, 0], sizes = [1, 128], strides = [1, 1]} : vector<8x128xf32> to vector<1x128xf32>
    %399 = vector.broadcast %398 : vector<1x128xf32> to vector<64x128xf32>
    %400 = arith.mulf %395, %399 : vector<64x128xf32>
    %401 = vector.extract_strided_slice %198 {offsets = [4, 0], sizes = [1, 64], strides = [1, 1]} : vector<8x64xf32> to vector<1x64xf32>
    %cst_93 = arith.constant dense<0.000000e+00> : vector<1x128xf32>
    %402 = tpu.matmul %401, %400, %cst_93 {dimension_numbers = #tpu.dot_dimension_numbers<[1], [0], [0], [1], [0, 0, 1, 1], [], []>} : vector<1x64xf32>, vector<64x128xf32>, vector<1x128xf32> -> vector<1x128xf32>
    %403 = vector.extract_strided_slice %204 {offsets = [4, 0], sizes = [1, 128], strides = [1, 1]} : vector<8x128xf32> to vector<1x128xf32>
    %404 = arith.subf %403, %402 : vector<1x128xf32>
    %405 = vector.extract_strided_slice %248 {offsets = [4, 0], sizes = [1, 128], strides = [1, 1]} : vector<8x128xf32> to vector<1x128xf32>
    %406 = arith.mulf %404, %405 : vector<1x128xf32>
    %cst_94 = arith.constant dense<0.000000e+00> : vector<64x128xf32>
    %407 = tpu.matmul %401, %406, %cst_94 {dimension_numbers = #tpu.dot_dimension_numbers<[0], [0], [1], [1], [0, 1, 1, 1], [], []>} : vector<1x64xf32>, vector<1x128xf32>, vector<64x128xf32> -> vector<64x128xf32>
    %cst_95 = arith.constant 0.000000e+00 : f32
    %408 = vector.broadcast %cst_95 : f32 to vector<64x128xf32>
    %409 = arith.select %296, %407, %408 : vector<64x128xi1>, vector<64x128xf32>
    %410 = arith.addf %400, %409 : vector<64x128xf32>
    %411 = vector.extract_strided_slice %201 {offsets = [4, 0], sizes = [1, 64], strides = [1, 1]} : vector<8x64xf32> to vector<1x64xf32>
    %cst_96 = arith.constant dense<0.000000e+00> : vector<1x128xf32>
    %412 = tpu.matmul %411, %410, %cst_96 {dimension_numbers = #tpu.dot_dimension_numbers<[1], [0], [0], [1], [0, 0, 1, 1], [], []>} : vector<1x64xf32>, vector<64x128xf32>, vector<1x128xf32> -> vector<1x128xf32>
    %413 = vector.extract_strided_slice %207 {offsets = [4, 0], sizes = [1, 128], strides = [1, 1]} : vector<8x128xf32> to vector<1x128xf32>
    %414 = arith.subf %413, %412 : vector<1x128xf32>
    %415 = vector.extract_strided_slice %289 {offsets = [4, 0], sizes = [1, 128], strides = [1, 1]} : vector<8x128xf32> to vector<1x128xf32>
    %416 = arith.mulf %414, %415 : vector<1x128xf32>
    %cst_97 = arith.constant dense<0.000000e+00> : vector<64x128xf32>
    %417 = tpu.matmul %411, %416, %cst_97 {dimension_numbers = #tpu.dot_dimension_numbers<[0], [0], [1], [1], [0, 1, 1, 1], [], []>} : vector<1x64xf32>, vector<1x128xf32>, vector<64x128xf32> -> vector<64x128xf32>
    %cst_98 = arith.constant 0.000000e+00 : f32
    %418 = vector.broadcast %cst_98 : f32 to vector<64x128xf32>
    %419 = arith.select %296, %417, %418 : vector<64x128xi1>, vector<64x128xf32>
    %420 = arith.addf %410, %419 : vector<64x128xf32>
    %421 = vector.extract_strided_slice %154 {offsets = [4, 0], sizes = [1, 64], strides = [1, 1]} : vector<8x64xf32> to vector<1x64xf32>
    %cst_99 = arith.constant dense<0.000000e+00> : vector<1x128xf32>
    %422 = tpu.matmul %421, %420, %cst_99 {dimension_numbers = #tpu.dot_dimension_numbers<[1], [0], [0], [1], [0, 0, 1, 1], [], []>} : vector<1x64xf32>, vector<64x128xf32>, vector<1x128xf32> -> vector<1x128xf32>
    %423 = vector.extract_strided_slice %195 {offsets = [5, 0], sizes = [1, 128], strides = [1, 1]} : vector<8x128xf32> to vector<1x128xf32>
    %424 = vector.broadcast %423 : vector<1x128xf32> to vector<64x128xf32>
    %425 = arith.mulf %420, %424 : vector<64x128xf32>
    %426 = vector.extract_strided_slice %198 {offsets = [5, 0], sizes = [1, 64], strides = [1, 1]} : vector<8x64xf32> to vector<1x64xf32>
    %cst_100 = arith.constant dense<0.000000e+00> : vector<1x128xf32>
    %427 = tpu.matmul %426, %425, %cst_100 {dimension_numbers = #tpu.dot_dimension_numbers<[1], [0], [0], [1], [0, 0, 1, 1], [], []>} : vector<1x64xf32>, vector<64x128xf32>, vector<1x128xf32> -> vector<1x128xf32>
    %428 = vector.extract_strided_slice %204 {offsets = [5, 0], sizes = [1, 128], strides = [1, 1]} : vector<8x128xf32> to vector<1x128xf32>
    %429 = arith.subf %428, %427 : vector<1x128xf32>
    %430 = vector.extract_strided_slice %248 {offsets = [5, 0], sizes = [1, 128], strides = [1, 1]} : vector<8x128xf32> to vector<1x128xf32>
    %431 = arith.mulf %429, %430 : vector<1x128xf32>
    %cst_101 = arith.constant dense<0.000000e+00> : vector<64x128xf32>
    %432 = tpu.matmul %426, %431, %cst_101 {dimension_numbers = #tpu.dot_dimension_numbers<[0], [0], [1], [1], [0, 1, 1, 1], [], []>} : vector<1x64xf32>, vector<1x128xf32>, vector<64x128xf32> -> vector<64x128xf32>
    %cst_102 = arith.constant 0.000000e+00 : f32
    %433 = vector.broadcast %cst_102 : f32 to vector<64x128xf32>
    %434 = arith.select %296, %432, %433 : vector<64x128xi1>, vector<64x128xf32>
    %435 = arith.addf %425, %434 : vector<64x128xf32>
    %436 = vector.extract_strided_slice %201 {offsets = [5, 0], sizes = [1, 64], strides = [1, 1]} : vector<8x64xf32> to vector<1x64xf32>
    %cst_103 = arith.constant dense<0.000000e+00> : vector<1x128xf32>
    %437 = tpu.matmul %436, %435, %cst_103 {dimension_numbers = #tpu.dot_dimension_numbers<[1], [0], [0], [1], [0, 0, 1, 1], [], []>} : vector<1x64xf32>, vector<64x128xf32>, vector<1x128xf32> -> vector<1x128xf32>
    %438 = vector.extract_strided_slice %207 {offsets = [5, 0], sizes = [1, 128], strides = [1, 1]} : vector<8x128xf32> to vector<1x128xf32>
    %439 = arith.subf %438, %437 : vector<1x128xf32>
    %440 = vector.extract_strided_slice %289 {offsets = [5, 0], sizes = [1, 128], strides = [1, 1]} : vector<8x128xf32> to vector<1x128xf32>
    %441 = arith.mulf %439, %440 : vector<1x128xf32>
    %cst_104 = arith.constant dense<0.000000e+00> : vector<64x128xf32>
    %442 = tpu.matmul %436, %441, %cst_104 {dimension_numbers = #tpu.dot_dimension_numbers<[0], [0], [1], [1], [0, 1, 1, 1], [], []>} : vector<1x64xf32>, vector<1x128xf32>, vector<64x128xf32> -> vector<64x128xf32>
    %cst_105 = arith.constant 0.000000e+00 : f32
    %443 = vector.broadcast %cst_105 : f32 to vector<64x128xf32>
    %444 = arith.select %296, %442, %443 : vector<64x128xi1>, vector<64x128xf32>
    %445 = arith.addf %435, %444 : vector<64x128xf32>
    %446 = vector.extract_strided_slice %154 {offsets = [5, 0], sizes = [1, 64], strides = [1, 1]} : vector<8x64xf32> to vector<1x64xf32>
    %cst_106 = arith.constant dense<0.000000e+00> : vector<1x128xf32>
    %447 = tpu.matmul %446, %445, %cst_106 {dimension_numbers = #tpu.dot_dimension_numbers<[1], [0], [0], [1], [0, 0, 1, 1], [], []>} : vector<1x64xf32>, vector<64x128xf32>, vector<1x128xf32> -> vector<1x128xf32>
    %448 = vector.extract_strided_slice %195 {offsets = [6, 0], sizes = [1, 128], strides = [1, 1]} : vector<8x128xf32> to vector<1x128xf32>
    %449 = vector.broadcast %448 : vector<1x128xf32> to vector<64x128xf32>
    %450 = arith.mulf %445, %449 : vector<64x128xf32>
    %451 = vector.extract_strided_slice %198 {offsets = [6, 0], sizes = [1, 64], strides = [1, 1]} : vector<8x64xf32> to vector<1x64xf32>
    %cst_107 = arith.constant dense<0.000000e+00> : vector<1x128xf32>
    %452 = tpu.matmul %451, %450, %cst_107 {dimension_numbers = #tpu.dot_dimension_numbers<[1], [0], [0], [1], [0, 0, 1, 1], [], []>} : vector<1x64xf32>, vector<64x128xf32>, vector<1x128xf32> -> vector<1x128xf32>
    %453 = vector.extract_strided_slice %204 {offsets = [6, 0], sizes = [1, 128], strides = [1, 1]} : vector<8x128xf32> to vector<1x128xf32>
    %454 = arith.subf %453, %452 : vector<1x128xf32>
    %455 = vector.extract_strided_slice %248 {offsets = [6, 0], sizes = [1, 128], strides = [1, 1]} : vector<8x128xf32> to vector<1x128xf32>
    %456 = arith.mulf %454, %455 : vector<1x128xf32>
    %cst_108 = arith.constant dense<0.000000e+00> : vector<64x128xf32>
    %457 = tpu.matmul %451, %456, %cst_108 {dimension_numbers = #tpu.dot_dimension_numbers<[0], [0], [1], [1], [0, 1, 1, 1], [], []>} : vector<1x64xf32>, vector<1x128xf32>, vector<64x128xf32> -> vector<64x128xf32>
    %cst_109 = arith.constant 0.000000e+00 : f32
    %458 = vector.broadcast %cst_109 : f32 to vector<64x128xf32>
    %459 = arith.select %296, %457, %458 : vector<64x128xi1>, vector<64x128xf32>
    %460 = arith.addf %450, %459 : vector<64x128xf32>
    %461 = vector.extract_strided_slice %201 {offsets = [6, 0], sizes = [1, 64], strides = [1, 1]} : vector<8x64xf32> to vector<1x64xf32>
    %cst_110 = arith.constant dense<0.000000e+00> : vector<1x128xf32>
    %462 = tpu.matmul %461, %460, %cst_110 {dimension_numbers = #tpu.dot_dimension_numbers<[1], [0], [0], [1], [0, 0, 1, 1], [], []>} : vector<1x64xf32>, vector<64x128xf32>, vector<1x128xf32> -> vector<1x128xf32>
    %463 = vector.extract_strided_slice %207 {offsets = [6, 0], sizes = [1, 128], strides = [1, 1]} : vector<8x128xf32> to vector<1x128xf32>
    %464 = arith.subf %463, %462 : vector<1x128xf32>
    %465 = vector.extract_strided_slice %289 {offsets = [6, 0], sizes = [1, 128], strides = [1, 1]} : vector<8x128xf32> to vector<1x128xf32>
    %466 = arith.mulf %464, %465 : vector<1x128xf32>
    %cst_111 = arith.constant dense<0.000000e+00> : vector<64x128xf32>
    %467 = tpu.matmul %461, %466, %cst_111 {dimension_numbers = #tpu.dot_dimension_numbers<[0], [0], [1], [1], [0, 1, 1, 1], [], []>} : vector<1x64xf32>, vector<1x128xf32>, vector<64x128xf32> -> vector<64x128xf32>
    %cst_112 = arith.constant 0.000000e+00 : f32
    %468 = vector.broadcast %cst_112 : f32 to vector<64x128xf32>
    %469 = arith.select %296, %467, %468 : vector<64x128xi1>, vector<64x128xf32>
    %470 = arith.addf %460, %469 : vector<64x128xf32>
    %471 = vector.extract_strided_slice %154 {offsets = [6, 0], sizes = [1, 64], strides = [1, 1]} : vector<8x64xf32> to vector<1x64xf32>
    %cst_113 = arith.constant dense<0.000000e+00> : vector<1x128xf32>
    %472 = tpu.matmul %471, %470, %cst_113 {dimension_numbers = #tpu.dot_dimension_numbers<[1], [0], [0], [1], [0, 0, 1, 1], [], []>} : vector<1x64xf32>, vector<64x128xf32>, vector<1x128xf32> -> vector<1x128xf32>
    %473 = vector.extract_strided_slice %195 {offsets = [7, 0], sizes = [1, 128], strides = [1, 1]} : vector<8x128xf32> to vector<1x128xf32>
    %474 = vector.broadcast %473 : vector<1x128xf32> to vector<64x128xf32>
    %475 = arith.mulf %470, %474 : vector<64x128xf32>
    %476 = vector.extract_strided_slice %198 {offsets = [7, 0], sizes = [1, 64], strides = [1, 1]} : vector<8x64xf32> to vector<1x64xf32>
    %cst_114 = arith.constant dense<0.000000e+00> : vector<1x128xf32>
    %477 = tpu.matmul %476, %475, %cst_114 {dimension_numbers = #tpu.dot_dimension_numbers<[1], [0], [0], [1], [0, 0, 1, 1], [], []>} : vector<1x64xf32>, vector<64x128xf32>, vector<1x128xf32> -> vector<1x128xf32>
    %478 = vector.extract_strided_slice %204 {offsets = [7, 0], sizes = [1, 128], strides = [1, 1]} : vector<8x128xf32> to vector<1x128xf32>
    %479 = arith.subf %478, %477 : vector<1x128xf32>
    %480 = vector.extract_strided_slice %248 {offsets = [7, 0], sizes = [1, 128], strides = [1, 1]} : vector<8x128xf32> to vector<1x128xf32>
    %481 = arith.mulf %479, %480 : vector<1x128xf32>
    %cst_115 = arith.constant dense<0.000000e+00> : vector<64x128xf32>
    %482 = tpu.matmul %476, %481, %cst_115 {dimension_numbers = #tpu.dot_dimension_numbers<[0], [0], [1], [1], [0, 1, 1, 1], [], []>} : vector<1x64xf32>, vector<1x128xf32>, vector<64x128xf32> -> vector<64x128xf32>
    %cst_116 = arith.constant 0.000000e+00 : f32
    %483 = vector.broadcast %cst_116 : f32 to vector<64x128xf32>
    %484 = arith.select %296, %482, %483 : vector<64x128xi1>, vector<64x128xf32>
    %485 = arith.addf %475, %484 : vector<64x128xf32>
    %486 = vector.extract_strided_slice %201 {offsets = [7, 0], sizes = [1, 64], strides = [1, 1]} : vector<8x64xf32> to vector<1x64xf32>
    %cst_117 = arith.constant dense<0.000000e+00> : vector<1x128xf32>
    %487 = tpu.matmul %486, %485, %cst_117 {dimension_numbers = #tpu.dot_dimension_numbers<[1], [0], [0], [1], [0, 0, 1, 1], [], []>} : vector<1x64xf32>, vector<64x128xf32>, vector<1x128xf32> -> vector<1x128xf32>
    %488 = vector.extract_strided_slice %207 {offsets = [7, 0], sizes = [1, 128], strides = [1, 1]} : vector<8x128xf32> to vector<1x128xf32>
    %489 = arith.subf %488, %487 : vector<1x128xf32>
    %490 = vector.extract_strided_slice %289 {offsets = [7, 0], sizes = [1, 128], strides = [1, 1]} : vector<8x128xf32> to vector<1x128xf32>
    %491 = arith.mulf %489, %490 : vector<1x128xf32>
    %cst_118 = arith.constant dense<0.000000e+00> : vector<64x128xf32>
    %492 = tpu.matmul %486, %491, %cst_118 {dimension_numbers = #tpu.dot_dimension_numbers<[0], [0], [1], [1], [0, 1, 1, 1], [], []>} : vector<1x64xf32>, vector<1x128xf32>, vector<64x128xf32> -> vector<64x128xf32>
    %cst_119 = arith.constant 0.000000e+00 : f32
    %493 = vector.broadcast %cst_119 : f32 to vector<64x128xf32>
    %494 = arith.select %296, %492, %493 : vector<64x128xi1>, vector<64x128xf32>
    %495 = arith.addf %485, %494 : vector<64x128xf32>
    %496 = vector.extract_strided_slice %154 {offsets = [7, 0], sizes = [1, 64], strides = [1, 1]} : vector<8x64xf32> to vector<1x64xf32>
    %cst_120 = arith.constant dense<0.000000e+00> : vector<1x128xf32>
    %497 = tpu.matmul %496, %495, %cst_120 {dimension_numbers = #tpu.dot_dimension_numbers<[1], [0], [0], [1], [0, 0, 1, 1], [], []>} : vector<1x64xf32>, vector<64x128xf32>, vector<1x128xf32> -> vector<1x128xf32>
    %498 = tpu.concatenate %322, %347, %372, %397, %422, %447, %472, %497 in 0 : vector<1x128xf32>, vector<1x128xf32>, vector<1x128xf32>, vector<1x128xf32>, vector<1x128xf32>, vector<1x128xf32>, vector<1x128xf32>, vector<1x128xf32> -> vector<8x128xf32>
    %499 = vector.extract_strided_slice %498 {offsets = [0, 0], sizes = [8, 64], strides = [1, 1]} : vector<8x128xf32> to vector<8x64xf32>
    %500 = vector.extract_strided_slice %498 {offsets = [0, 64], sizes = [8, 64], strides = [1, 1]} : vector<8x128xf32> to vector<8x64xf32>
    %501 = tpu.concatenate %499, %500 in 0 : vector<8x64xf32>, vector<8x64xf32> -> vector<16x64xf32>
    %c0_121 = arith.constant 0 : index
    %c0_122 = arith.constant 0 : index
    %502 = vector.load %arg6[%c0_121, %c0_122] : memref<1x32xf32, #tpu.memory_space<vmem>>, vector<1x32xf32>
    %503 = vector.extract_strided_slice %501 {offsets = [0, 0], sizes = [16, 32], strides = [1, 1]} : vector<16x64xf32> to vector<16x32xf32>
    %504 = vector.extract_strided_slice %8 {offsets = [0, 0], sizes = [16, 32], strides = [1, 1]} : vector<16x64xf32> to vector<16x32xf32>
    %505 = arith.mulf %503, %503 : vector<16x32xf32>
    %cst_123 = arith.constant dense<0.000000e+00> : vector<16xf32>
    %506 = vector.multi_reduction <add>, %505, %cst_123 [1] : vector<16x32xf32> to vector<16xf32>
    %507 = vector.shape_cast %506 : vector<16xf32> to vector<16x1xf32>
    %cst_124 = arith.constant 3.200000e+01 : f32
    %508 = vector.broadcast %cst_124 : f32 to vector<16x1xf32>
    %509 = arith.divf %507, %508 : vector<16x1xf32>
    %cst_125 = arith.constant 9.99999974E-6 : f32
    %510 = vector.broadcast %cst_125 : f32 to vector<16x1xf32>
    %511 = arith.addf %509, %510 : vector<16x1xf32>
    %512 = math.rsqrt %511 : vector<16x1xf32>
    %513 = vector.broadcast %512 : vector<16x1xf32> to vector<16x32xf32>
    %514 = arith.mulf %503, %513 : vector<16x32xf32>
    %515 = vector.broadcast %502 : vector<1x32xf32> to vector<16x32xf32>
    %516 = arith.mulf %514, %515 : vector<16x32xf32>
    %517 = arith.negf %504 : vector<16x32xf32>
    %518 = math.exp %517 : vector<16x32xf32>
    %cst_126 = arith.constant 1.000000e+00 : f32
    %519 = vector.broadcast %cst_126 : f32 to vector<16x32xf32>
    %520 = arith.addf %519, %518 : vector<16x32xf32>
    %521 = arith.divf %519, %520 : vector<16x32xf32>
    %522 = arith.mulf %504, %521 : vector<16x32xf32>
    %523 = arith.mulf %516, %522 : vector<16x32xf32>
    %524 = vector.extract_strided_slice %501 {offsets = [0, 32], sizes = [16, 32], strides = [1, 1]} : vector<16x64xf32> to vector<16x32xf32>
    %525 = vector.extract_strided_slice %8 {offsets = [0, 32], sizes = [16, 32], strides = [1, 1]} : vector<16x64xf32> to vector<16x32xf32>
    %526 = arith.mulf %524, %524 : vector<16x32xf32>
    %cst_127 = arith.constant dense<0.000000e+00> : vector<16xf32>
    %527 = vector.multi_reduction <add>, %526, %cst_127 [1] : vector<16x32xf32> to vector<16xf32>
    %528 = vector.shape_cast %527 : vector<16xf32> to vector<16x1xf32>
    %cst_128 = arith.constant 3.200000e+01 : f32
    %529 = vector.broadcast %cst_128 : f32 to vector<16x1xf32>
    %530 = arith.divf %528, %529 : vector<16x1xf32>
    %cst_129 = arith.constant 9.99999974E-6 : f32
    %531 = vector.broadcast %cst_129 : f32 to vector<16x1xf32>
    %532 = arith.addf %530, %531 : vector<16x1xf32>
    %533 = math.rsqrt %532 : vector<16x1xf32>
    %534 = vector.broadcast %533 : vector<16x1xf32> to vector<16x32xf32>
    %535 = arith.mulf %524, %534 : vector<16x32xf32>
    %536 = vector.broadcast %502 : vector<1x32xf32> to vector<16x32xf32>
    %537 = arith.mulf %535, %536 : vector<16x32xf32>
    %538 = arith.negf %525 : vector<16x32xf32>
    %539 = math.exp %538 : vector<16x32xf32>
    %cst_130 = arith.constant 1.000000e+00 : f32
    %540 = vector.broadcast %cst_130 : f32 to vector<16x32xf32>
    %541 = arith.addf %540, %539 : vector<16x32xf32>
    %542 = arith.divf %540, %541 : vector<16x32xf32>
    %543 = arith.mulf %525, %542 : vector<16x32xf32>
    %544 = arith.mulf %537, %543 : vector<16x32xf32>
    %545 = tpu.concatenate %523, %544 in 1 : vector<16x32xf32>, vector<16x32xf32> -> vector<16x64xf32>
    %c0_131 = arith.constant 0 : index
    %c0_132 = arith.constant 0 : index
    %546 = vector.load %arg7[%c0_131, %c0_132] : memref<64x64xf32, #tpu.memory_space<vmem>>, vector<64x64xf32>
    %cst_133 = arith.constant dense<0.000000e+00> : vector<16x64xf32>
    %547 = tpu.matmul %545, %546, %cst_133 {dimension_numbers = #tpu.dot_dimension_numbers<[1], [0], [0], [1], [0, 0, 1, 1], [], []>} : vector<16x64xf32>, vector<64x64xf32>, vector<16x64xf32> -> vector<16x64xf32>
    %548 = vector.extract_strided_slice %547 {offsets = [0, 0], sizes = [8, 64], strides = [1, 1]} : vector<16x64xf32> to vector<8x64xf32>
    %c0_134 = arith.constant 0 : index
    %c0_135 = arith.constant 0 : index
    %c0_136 = arith.constant 0 : index
    %549 = vector.load %arg8[%c0_134, %c0_135, %c0_136] : memref<2x8x64xf32, #tpu.memory_space<vmem>>, vector<1x8x64xf32>
    %550 = vector.shape_cast %549 : vector<1x8x64xf32> to vector<8x64xf32>
    %551 = vector.shape_cast %548 : vector<8x64xf32> to vector<1x8x64xf32>
    tpu.vector_store %arg8[%c0_134, %c0_135, %c0_136], %551 {strides = array<i32>} : memref<2x8x64xf32, #tpu.memory_space<vmem>>, vector<1x8x64xf32>,
    %552 = vector.extract_strided_slice %547 {offsets = [8, 0], sizes = [8, 64], strides = [1, 1]} : vector<16x64xf32> to vector<8x64xf32>
    %c1_137 = arith.constant 1 : index
    %c0_138 = arith.constant 0 : index
    %c0_139 = arith.constant 0 : index
    %553 = vector.load %arg8[%c1_137, %c0_138, %c0_139] : memref<2x8x64xf32, #tpu.memory_space<vmem>>, vector<1x8x64xf32>
    %554 = vector.shape_cast %553 : vector<1x8x64xf32> to vector<8x64xf32>
    %555 = vector.shape_cast %552 : vector<8x64xf32> to vector<1x8x64xf32>
    tpu.vector_store %arg8[%c1_137, %c0_138, %c0_139], %555 {strides = array<i32>} : memref<2x8x64xf32, #tpu.memory_space<vmem>>, vector<1x8x64xf32>,
    return
  }
  func.func @transform_0(%arg0: i32) -> (i32, i32, i32) {
    %c0_i32 = arith.constant 0 : i32
    %c0_i32_0 = arith.constant 0 : i32
    %c0_i32_1 = arith.constant 0 : i32
    return %arg0, %c0_i32, %c0_i32_0 : i32, i32, i32
  }
  func.func @transform_1(%arg0: i32) -> (i32, i32) {
    %c0_i32 = arith.constant 0 : i32
    %c0_i32_0 = arith.constant 0 : i32
    %c0_i32_1 = arith.constant 0 : i32
    return %c0_i32, %c0_i32_0 : i32, i32
  }
  func.func @transform_2(%arg0: i32) -> (i32, i32) {
    %c0_i32 = arith.constant 0 : i32
    %c0_i32_0 = arith.constant 0 : i32
    %c0_i32_1 = arith.constant 0 : i32
    return %c0_i32, %c0_i32_0 : i32, i32
  }
  func.func @transform_3(%arg0: i32) -> (i32, i32) {
    %c0_i32 = arith.constant 0 : i32
    %c0_i32_0 = arith.constant 0 : i32
    %c0_i32_1 = arith.constant 0 : i32
    return %c0_i32, %c0_i32_0 : i32, i32
  }
  func.func @transform_4(%arg0: i32) -> (i32, i32) {
    %c0_i32 = arith.constant 0 : i32
    %c0_i32_0 = arith.constant 0 : i32
    %c0_i32_1 = arith.constant 0 : i32
    return %c0_i32, %c0_i32_0 : i32, i32
  }
  func.func @transform_5(%arg0: i32) -> (i32, i32) {
    %c0_i32 = arith.constant 0 : i32
    %c0_i32_0 = arith.constant 0 : i32
    %c0_i32_1 = arith.constant 0 : i32
    return %c0_i32, %c0_i32_0 : i32, i32
  }
  func.func @transform_6(%arg0: i32) -> (i32, i32) {
    %c0_i32 = arith.constant 0 : i32
    %c0_i32_0 = arith.constant 0 : i32
    %c0_i32_1 = arith.constant 0 : i32
    return %c0_i32, %c0_i32_0 : i32, i32
  }
  func.func @transform_7(%arg0: i32) -> (i32, i32, i32) {
    %c0_i32 = arith.constant 0 : i32
    %c0_i32_0 = arith.constant 0 : i32
    %c0_i32_1 = arith.constant 0 : i32
    return %arg0, %c0_i32, %c0_i32_0 : i32, i32, i32
  }
}

</mosaic_0001>

<bundles_post_ra>
// kernel: tpu_custom_call.1
= control target key start
LH: loop header
LB: loop body
LE: loop exit
PB: predicated region body
PF: predicated region fallthrough
CT: control target
= control target key end

     0   :  { %12 = vsyncpa [#allocation3], 0  ;;  %s5610_s0 = inlined_call_operand.hbm [shape: f32[2,8,64], index: 0, kind: input, shape index: {}]   ;;  %s5611_s1 = inlined_call_operand.hbm [shape: f32[64,294], index: 1, kind: input, shape index: {}]   ;;  %s5612_s2 = inlined_call_operand.hbm [shape: f32[4,224], index: 2, kind: input, shape index: {}]   ;;  %s5613_s3 = inlined_call_operand.vmem [shape: f32[1,2], index: 3, kind: input, shape index: {}]   ;;  %s5614_s4 = inlined_call_operand.vmem [shape: f32[1,2], index: 4, kind: input, shape index: {}]   ;;  %s5615_s5 = inlined_call_operand.vmem [shape: f32[1,32], index: 5, kind: input, shape index: {}]   ;;  %s5616_s6 = inlined_call_operand.hbm [shape: f32[64,64], index: 6, kind: input, shape index: {}]   ;;  %s5617_s7 = inlined_call_operand.hbm [shape: f32[2,8,64], index: 7, kind: output, shape index: {}]  }
   0x1   :  { %13 = vsyncpa [#allocation6], 0 }
   0x2   :  { %14 = vsyncpa [#allocation9], 0  ;;  %s33_s26 = sshll.u32 %s5611_s1, 4  ;;  %s34_s26 = int_to_ptr.hbm [resolvable:$true] %s33_s26 }
   0x3   :  { %15 = vsyncpa [#allocation4], 0  ;;  %s4207_s27 = smov [#allocation5]   ;;  %s20_s8 = sshll.u32 %s5610_s0, 4  ;;  %s21_s8 = int_to_ptr.hbm [resolvable:$true] %s20_s8 }
   0x4   :  { %s35_s28 = sshll.u32 %s4207_s27, 4  ;;  %s4208_s9 = smov 384   ;;  %s36_s28 = int_to_ptr.vmem [resolvable:$true] %s35_s28 }
   0x5   :  { %s4209_s10 = smov 24   ;;  %s4210_s11 = smov [#allocation2]  }
   0x6   :  { %41 = dma.hbm_to_vmem [thread:$0]  %s34_s26, 3072, %s36_s28, [#allocation6], %s4208_s9, %s4208_s9, %s4209_s10  }
   0x7   :  { %s22_s12 = sshll.u32 %s4210_s11, 4  ;;  %s4211_s13 = smov 128   ;;  %s23_s12 = int_to_ptr.vmem [resolvable:$true] %s22_s12 }
   0x8   :  { %s4212_s14 = smov 8   ;;  %s47_s16 = sshll.u32 %s5612_s2, 4  ;;  %s48_s16 = int_to_ptr.hbm [resolvable:$true] %s47_s16 }
   0x9   :  { %28 = dma.hbm_to_vmem [thread:$0]  %s21_s8, 256, %s23_s12, [#allocation3], %s4211_s13, %s4211_s13, %s4212_s14  }
   0xa   :  { %s4213_s17 = smov [#allocation7]   ;;  %s63_s20 = sshll.u32 %s5616_s6, 4  ;;  %s64_s20 = int_to_ptr.hbm [resolvable:$true] %s63_s20 }
   0xb   :  { %s49_s0 = sshll.u32 %s4213_s17, 4  ;;  %s4214_s21 = smov [#allocation8]   ;;  %s50_s0 = int_to_ptr.vmem [resolvable:$true] %s49_s0 }
   0xc   :  { %52 = dma.hbm_to_vmem [thread:$0]  %s48_s16, 128, %s50_s0, [#allocation6]  }
   0xd   :  { %s65_s22 = sshll.u32 %s4214_s21, 4  ;;  %s66_s22 = int_to_ptr.vmem [resolvable:$true] %s65_s22 }
   0xe   :  { %71 = dma.hbm_to_vmem [thread:$0]  %s64_s20, 1024, %s66_s22, [#allocation9], %s4211_s13, %s4211_s13, %s4212_s14  }
   0xf   :  { %4199 = dma.done.wait [#allocation3], 256  }
  0x10   :  { %4200 = vsyncadd [#allocation3], 4294967040 }
  0x11   :  { %4201 = dma.done.wait [#allocation6], 3200  }
  0x12   :  { %4202 = vsyncadd [#allocation6], 4294964096 }
  0x13   :  { %4203 = dma.done.wait [#allocation9], 1024  }
  0x14   :  { %4204 = vsyncadd [#allocation9], 4294966272  ;;  %v112_v0 = vld [vmem:[#allocation5 + $0xa8] sm:$0xff]  ;;  %v109_v1 = vld [vmem:[#allocation5 + $0x90] sm:$0xff]  ;;  %vm5633_vm0 = vcmask 523264   ;;  %v192_v19 = vlaneseq  ;;  %s4215_s23 = smov 36  }
  0x15   :  { %130 = vmatpush.msra.mxu0 %v112_v0  ;;  %v106_v2 = vld [vmem:[#allocation5 + $0x78] sm:$0xff]  ;;  %v111_v4 = vld [vmem:[#allocation5 + $0xa0] sm:$0xff]  ;;  %v100_v6 = vld [vmem:[#allocation5 + $0x48] sm:$0xff]  ;;  %s4217_s24 = smov 80   ;;  %s4218_s25 = smov 96  }
  0x16   :  { %v114_v3 = vld [vmem:[#allocation5 + $0xb8] sm:$0xff]  ;;  %v103_v5 = vld [vmem:[#allocation5 + $0x60] sm:$0xff]  ;;  %v108_v7 = vld [vmem:[#allocation5 + $0x88] sm:$0xff]  ;;  %v4306_v20 = vshrl.u32 %v192_v19, 7  ;;  %s4219_s26 = smov 64   ;;  %s4220_s27 = smov 92  }
  0x17   :  { %131 = vmatpush.msra.mxu0 %v109_v1  ;;  %176 = vmatpush.msra.mxu2 %v114_v3  ;;  %v105_v8 = vld [vmem:[#allocation5 + $0x70] sm:$0xff]  ;;  %v102_v10 = vld [vmem:[#allocation5 + $0x58] sm:$0xff]  ;;  %v99_v12 = vld [vmem:[#allocation5 + $0x40] sm:$0xff]  ;;  %s4226_s30 = smov 32   ;;  %s4227_s8 = smov 98  }
  0x18   :  { %v97_v9 = vld [vmem:[#allocation5 + $0x30] sm:$0xff]  ;;  %v94_v11 = vld [vmem:[#allocation5 + $0x18] sm:$0xff]  ;;  %v91_v13 = vld [vmem:[#allocation5] sm:$0xff]  ;;  %v4311_v22 = vadd.s32 8, %v4306_v20  ;;  %v4315_v25 = vand.u32 7, %v4306_v20  ;;  %vm212_vm1 = vcmp.lt.s32.totalorder %v4306_v20, 1 }
  0x19   :  { %132 = vmatpush.msra.mxu0 %v106_v2  ;;  %177 = vmatpush.msra.mxu2 %v111_v4  ;;  %v4290_v14 = vld [vmem:[#allocation2] sm:$0xff]  ;;  %v96_v15 = vld [vmem:[#allocation5 + $0x28] sm:$0xff]  ;;  %v4296_v17 = vld [vmem:[#allocation2 + $0x8] sm:$0xff]  ;;  %vm241_vm2 = vcmp.lt.s32.totalorder %v4306_v20, 2  ;;  %vm270_vm5 = vcmp.lt.s32.totalorder %v4306_v20, 3  ;;  %s4228_s9 = smov 94  }
  0x1a   :  { %v93_v16 = vld [vmem:[#allocation5 + $0x10] sm:$0xff]  ;;  %v4308_v21 = vld [vmem:[#allocation7] sm:$0xff]  ;;  %v4318_v26 = vand.u32 7, %v4311_v22  ;;  %vm217_vm3 = vcmp.ge.s32.totalorder %v4315_v25, 1  ;;  %vm246_vm6 = vcmp.ge.s32.totalorder %v4315_v25, 2  ;;  %vm275_vm8 = vcmp.ge.s32.totalorder %v4315_v25, 3 }
  0x1b   :  { %133 = vmatpush.msra.mxu0 %v103_v5  ;;  %178 = vmatpush.msra.mxu2 %v108_v7  ;;  %v3974_v18 = vld [vmem:[%s5614_s4] ss:$0 sm:$0xff]  ;;  %v198_v24 = vperm.slane %v4308_v21, 3  ;;  %v223_v27 = vperm.slane %v4308_v21, 2  ;;  %v252_v28 = vperm.slane %v4308_v21, 1  ;;  %v281_v30 = vperm.slane %v4308_v21, 0 }
  0x1c   :  { %418 = vrot.lane.b32.xlu0 %v3974_v18, %s4215_s23  ;;  %vm218_vm4 = vcmp.ge.s32.totalorder %v4318_v26, 1  ;;  %vm5619_vm7 = vcmp.ge.s32.totalorder %v4318_v26, 2  ;;  %vm5618_vm9 = vcmp.ge.s32.totalorder %v4318_v26, 3  ;;  %s4216_s4 = smov 48   ;;  %s4229_s10 = smov 112  }
  0x1d   :  { %134 = vmatpush.msra.mxu0 %v100_v6  ;;  %179 = vmatpush.msra.mxu2 %v105_v8  ;;  %v202_v29 = vperm.slane %v198_v24, 3  ;;  %v227_v31 = vperm.slane %v223_v27, 2  ;;  %v256_v33 = vperm.slane %v252_v28, 1  ;;  %v285_v40 = vperm.slane %v281_v30, 0  ;;  %s3735_s17 = sshll.u32 %s5617_s7, 4  ;;  %s3736_s17 = int_to_ptr.hbm [resolvable:$true] %s3735_s17 }
  0x1f   :  { %135 = vmatpush.msra.mxu0 %v97_v9  ;;  %180 = vmatpush.msra.mxu2 %v102_v10 }
  0x21   :  { %136 = vmatpush.msra.mxu0 %v94_v11  ;;  %181 = vmatpush.msra.mxu2 %v99_v12 }
  0x23   :  { %137 = vmatpush.msra.mxu0 %v91_v13  ;;  %182 = vmatpush.msra.mxu2 %v96_v15 }
  0x24   :  { %3750 = vmatmul.msk.f32.vlgmr.msra.gmra.mxu0 %vm5633_vm0, %v4290_v14 }
  0x25   :  { %183 = vmatpush.msra.mxu2 %v93_v16 }
  0x26   :  { %3754 = vmatmul.msk.f32.vlgmr.msra.gmra.mxu2 %vm5633_vm0, %v4290_v14 }
  0x2c   :  { %3751 = vmatmul.msk.f32.gmra.mxu0 %vm5633_vm0, %v4296_v17 }
  0x2e   :  { %3755 = vmatmul.msk.f32.gmra.mxu2 %vm5633_vm0, %v4296_v17 }
  0xa1   :  { %v139_v23 = vpop.f32.mrf.mxu0 }
  0xa2   :  { %v208_v34 = vrot.slane %v139_v23, 7  ;;  %v237_v35 = vrot.slane %v139_v23, 6  ;;  %v266_v38 = vrot.slane %v139_v23, 5  ;;  %v204_v49 = vmul.f32 %v202_v29, %v139_v23 }
  0xa9   :  { %v142_v32 = vpop.f32.mrf.mxu0 }
  0xaa   :  { %v210_v36 = vrot.slane %v142_v32, 7  ;;  %v239_v37 = vrot.slane %v142_v32, 6  ;;  %v268_v39 = vrot.slane %v142_v32, 5  ;;  %v206_v50 = vmul.f32 %v202_v29, %v142_v32 }
  0xac   :  { %v213_v41 = vsel %vm212_vm1, %v208_v34, %v210_v36  ;;  %v215_v42 = vsel %vm212_vm1, %v210_v36, %v208_v34  ;;  %v242_v43 = vsel %vm241_vm2, %v237_v35, %v239_v37  ;;  %v244_v44 = vsel %vm241_vm2, %v239_v37, %v237_v35 }
  0xad   :  { %v219_v45 = vsel %vm217_vm3, %v215_v42, 0.0  ;;  %v221_v46 = vsel %vm218_vm4, %v213_v41, 0.0  ;;  %v248_v47 = vsel %vm246_vm6, %v244_v44, 0.0  ;;  %v250_v48 = vsel %vm5619_vm7, %v242_v43, 0.0  ;;  %v4380_v41 = vpop.f32.mrf.mxu2  ;;  %v419_v43 = vpop.permute.xlu0 %418 }
  0xae   :  { %v229_v51 = vmul.f32 %v227_v31, %v219_v45  ;;  %v231_v52 = vmul.f32 %v227_v31, %v221_v46  ;;  %v258_v53 = vmul.f32 %v256_v33, %v248_v47  ;;  %v260_v54 = vmul.f32 %v256_v33, %v250_v48 }
  0xaf   :  { %v271_v55 = vsel %vm270_vm5, %v266_v38, %v268_v39  ;;  %v273_v56 = vsel %vm270_vm5, %v268_v39, %v266_v38  ;;  %v421_v47 = vadd.f32 %v419_v43, %v4380_v41 }
  0xb0   :  { %v233_v57 = vadd.f32 %v229_v51, %v204_v49  ;;  %v235_v58 = vadd.f32 %v231_v52, %v206_v50  ;;  %v277_v59 = vsel %vm275_vm8, %v273_v56, 0.0  ;;  %v279_v60 = vsel %vm5618_vm9, %v271_v55, 0.0 }
  0xb1   :  { %v287_v63 = vmul.f32 %v285_v40, %v277_v59  ;;  %v289_v0 = vmul.f32 %v285_v40, %v279_v60  ;;  %v425_v49 = vand.u32 2147483647, %v421_v47 }
  0xb2   :  { %v262_v61 = vadd.f32 %v258_v53, %v233_v57  ;;  %v264_v62 = vadd.f32 %v260_v54, %v235_v58 }
  0xb3   :  { %v427_v53 = vsub.f32 0.0, %v425_v49 }
  0xb4   :  { %v291_v1 = vadd.f32 %v287_v63, %v262_v61  ;;  %v293_v2 = vadd.f32 %v289_v0, %v264_v62 }
  0xb5   :  { %v4382_v42 = vpop.f32.mrf.mxu2  ;;  %v429_v56 = vmul.f32 1.442695, %v427_v53 }
  0xb6   :  { %v3756_v3 = vmul.f32 -1.442695, %v291_v1  ;;  %v3758_v4 = vmul.f32 -1.442695, %v293_v2  ;;  %v422_v44 = vadd.f32 %v419_v43, %v4382_v42 }
  0xb8   :  { %3977 = vpow2.f32 %v3756_v3  ;;  %v426_v45 = vand.u32 2147483647, %v422_v44 }
  0xb9   :  { %3979 = vpow2.f32 %v3758_v4 }
  0xba   :  { %v428_v46 = vsub.f32 0.0, %v426_v45 }
  0xbc   :  { %v431_v48 = vmul.f32 1.442695, %v428_v46 }
  0xbe   :  { %v3978_v5 = vpop.eup %3977 }
  0xbf   :  { %v3980_v6 = vpop.eup %3979  ;;  %v307_v7 = vadd.f32 1.0, %v3978_v5  ;;  %v423_v5 = vmax.f32 %v421_v47, 0.0 }
  0xc0   :  { %v309_v8 = vadd.f32 1.0, %v3980_v6 }
  0xc1   :  { %3981 = vrcp.f32 %v307_v7  ;;  %v322_v29 = vand.u32 2147483648, %v307_v7  ;;  %vm316_vm14 = vweird.f32 %v307_v7  ;;  %v320_v31 = vand.u32 2147483647, %v307_v7 }
  0xc2   :  { %3983 = vrcp.f32 %v309_v8  ;;  %v352_v18 = vand.u32 2147483648, %v309_v8  ;;  %v350_v24 = vand.u32 2147483647, %v309_v8  ;;  %vm346_vm12 = vweird.f32 %v309_v8 }
  0xc3   :  { %v323_v36 = vor.u32 1.1754944e-38, %v322_v29  ;;  %vm321_vm7 = vcmp.eq.f32.partialorder %v320_v31, 8.507059e+37  ;;  %3985 = vpow2.f32 %v431_v48 }
  0xc4   :  { %v353_v30 = vor.u32 1.1754944e-38, %v352_v18  ;;  %vm351_vm15 = vcmp.eq.f32.partialorder %v350_v24, 8.507059e+37  ;;  %3987 = vpow2.f32 %v429_v56  ;;  %v92_v18 = vld [vmem:[#allocation5 + $0x8] sm:$0xff] }
  0xc7   :  { %v3982_v9 = vpop.eup %3981 }
  0xc8   :  { %v3984_v10 = vpop.eup %3983  ;;  %v312_v11 = vmul.f32 %v3982_v9, %v307_v7  ;;  %vm317_vm11 = vweird.f32 %v3982_v9 }
  0xc9   :  { %v342_v12 = vmul.f32 %v3984_v10, %v309_v8  ;;  %vm347_vm10 = vweird.f32 %v3984_v10  ;;  %vm318_vm9 = vmor %vm316_vm14, %vm317_vm11  ;;  %v3986_v55 = vpop.eup %3985  ;;  %v113_v8 = vld [vmem:[#allocation5 + $0xb0] sm:$0xff] }
  0xca   :  { %v313_v13 = vsub.f32 1.0, %v312_v11  ;;  %vm348_vm13 = vmor %vm346_vm12, %vm347_vm10  ;;  %v434_v59 = vadd.f32 1.0, %v3986_v55  ;;  %v3988_v61 = vpop.eup %3987  ;;  %153 = vmatpush.msra.mxu1 %v113_v8  ;;  %v104_v11 = vld [vmem:[#allocation5 + $0x68] sm:$0xff] }
  0xcb   :  { %v343_v15 = vsub.f32 1.0, %v342_v12  ;;  %v433_v0 = vadd.f32 1.0, %v3988_v61  ;;  %v101_v12 = vld [vmem:[#allocation5 + $0x50] sm:$0xff] }
  0xcc   :  { %v314_v16 = vmul.f32 %v3982_v9, %v313_v13  ;;  %3989 = vlog2.f32 %v434_v59  ;;  %v4403_v61 = vld [vmem:[%s5613_s3] ss:$0 sm:$0xff]  ;;  %s4221_s3 = smov 2  }
  0xcd   :  { %v344_v23 = vmul.f32 %v3984_v10, %v343_v15  ;;  %3991 = vlog2.f32 %v433_v0  ;;  %v98_v15 = vld [vmem:[#allocation5 + $0x38] sm:$0xff] }
  0xce   :  { %v315_v27 = vadd.f32 %v3982_v9, %v314_v16  ;;  %v95_v16 = vld [vmem:[#allocation5 + $0x20] sm:$0xff] }
  0xcf   :  { %v345_v28 = vadd.f32 %v3984_v10, %v344_v23 }
  0xd0   :  { %v319_v34 = vsel %vm318_vm9, %v3982_v9, %v315_v27  ;;  %v110_v9 = vld [vmem:[#allocation5 + $0x98] sm:$0xff] }
  0xd1   :  { %v349_v32 = vsel %vm348_vm13, %v3984_v10, %v345_v28  ;;  %v324_v38 = vsel %vm321_vm7, %v323_v36, %v319_v34  ;;  %vm461_vm7 = vcmask 130048   ;;  %v107_v10 = vld [vmem:[#allocation5 + $0x80] sm:$0xff]  ;;  %154 = vmatpush.msra.mxu1 %v110_v9 }
  0xd2   :  { %v354_v33 = vsel %vm351_vm15, %v353_v30, %v349_v32  ;;  %v4367_v39 = vmul.f32 %v324_v38, %v291_v1  ;;  %v3990_v63 = vpop.eup %3989  ;;  %v424_v1 = vmax.f32 %v422_v44, 0.0 }
  0xd3   :  { %v4356_v35 = vmul.f32 %v354_v33, %v293_v2  ;;  %v438_v2 = vmul.f32 0.6931472, %v3990_v63  ;;  %v3992_v4 = vpop.eup %3991  ;;  %155 = vmatpush.msra.mxu1 %v107_v10 }
  0xd4   :  { %v4371_v40 = vmul.f32 %v4367_v39, %v4367_v39  ;;  %v436_v6 = vmul.f32 0.6931472, %v3992_v4 }
  0xd5   :  { %v4360_v37 = vmul.f32 %v4356_v35, %v4356_v35  ;;  %v440_v3 = vadd.f32 %v438_v2, %v424_v1  ;;  %156 = vmatpush.msra.mxu1 %v104_v11 }
  0xd6   :  { %v439_v7 = vadd.f32 %v436_v6, %v423_v5 }
  0xd7   :  { %676 = vrot.lane.b32.xlu2 %v4360_v37, %s4216_s4  ;;  %592 = vrot.lane.b32.xlu1 %v4360_v37, %s4217_s24 }
  0xd8   :  { %550 = vrot.lane.b32.xlu0 %v4360_v37, %s4218_s25  ;;  %157 = vmatpush.msra.mxu1 %v101_v12 }
  0xda   :  { %158 = vmatpush.msra.mxu1 %v98_v15 }
  0xdc   :  { %159 = vmatpush.msra.mxu1 %v95_v16 }
  0xde   :  { %160 = vmatpush.msra.mxu1 %v92_v18 }
  0xdf   :  { %548 = vrot.lane.b32.xlu2 %v4371_v40, %s4218_s25  ;;  %634 = vrot.lane.b32.xlu1 %v4360_v37, %s4219_s26 }
  0xe0   :  { %590 = vrot.lane.b32.xlu0 %v4371_v40, %s4217_s24  ;;  %3752 = vmatmul.msk.f32.vlgmr.msra.gmra.mxu1 %vm5633_vm0, %v4290_v14 }
  0xe8   :  { %632 = vrot.lane.b32.xlu0 %v4371_v40, %s4219_s26  ;;  %3753 = vmatmul.msk.f32.gmra.mxu1 %vm5633_vm0, %v4296_v17 }
 0x131   :  { %v677_v60 = vpop.permute.xlu2 %676 }
 0x132   :  { %v683_v62 = vsel %vm461_vm7, %v677_v60, 0.0 }
 0x139   :  { %v549_v23 = vpop.permute.xlu2 %548 }
 0x13a   :  { %v554_v27 = vsel %vm461_vm7, %v549_v23, 0.0 }
 0x149   :  { %v593_v50 = vpop.permute.xlu1 %592 }
 0x14a   :  { %v551_v51 = vpop.permute.xlu0 %550  ;;  %v599_v52 = vsel %vm461_vm7, %v593_v50, 0.0 }
 0x14b   :  { %600 = vadd.xlane.f32.xlu2 %v599_v52  ;;  %v557_v54 = vsel %vm461_vm7, %v551_v51, 0.0 }
 0x14c   :  { %558 = vadd.xlane.f32.xlu1 %v557_v54 }
 0x151   :  { %v635_v57 = vpop.permute.xlu1 %634 }
 0x152   :  { %v641_v58 = vsel %vm461_vm7, %v635_v57, 0.0  ;;  %v591_v13 = vpop.permute.xlu0 %590 }
 0x153   :  { %642 = vadd.xlane.f32.xlu0 %v641_v58  ;;  %v596_v29 = vsel %vm461_vm7, %v591_v13, 0.0 }
 0x15a   :  { %v633_v24 = vpop.permute.xlu0 %632 }
 0x15b   :  { %684 = vadd.xlane.f32.xlu0 %v683_v62  ;;  %v638_v28 = vsel %vm461_vm7, %v633_v24, 0.0 }
 0x163   :  { %674 = vrot.lane.b32.xlu2 %v4371_v40, %s4216_s4 }
 0x165   :  { %449 = vrot.lane.b32.xlu1 %v440_v3, %s4220_s27 }
 0x16f   :  { %447 = vrot.lane.b32.xlu0 %v439_v7, %s4220_s27 }
 0x18c   :  { %555 = vadd.xlane.f32.xlu2 %v554_v27 }
 0x18f   :  { %639 = vadd.xlane.f32.xlu1 %v638_v28 }
 0x199   :  { %597 = vadd.xlane.f32.xlu0 %v596_v29 }
 0x1be   :  { %v601_v30 = vpop.xlane.xlu2 %600 }
 0x1bf   :  { %3993 = vrsqrt.f32 %v601_v30  ;;  %v559_v31 = vpop.xlane.xlu1 %558  ;;  %vm621_vm11 = vcmp.eq.f32.partialorder %v601_v30, inf  ;;  %v624_v4 = vand.u32 2147483648, %v601_v30  ;;  %vm623_vm12 = vcmp.eq.f32.partialorder %v601_v30, 0.0 }
 0x1c0   :  { %3995 = vrsqrt.f32 %v559_v31  ;;  %vm579_vm9 = vcmp.eq.f32.partialorder %v559_v31, inf  ;;  %v582_v58 = vand.u32 2147483648, %v559_v31  ;;  %vm581_vm10 = vcmp.eq.f32.partialorder %v559_v31, 0.0 }
 0x1c5   :  { %v3994_v32 = vpop.eup %3993 }
 0x1c6   :  { %v3996_v33 = vpop.eup %3995  ;;  %v615_v14 = vmul.f32 %v3994_v32, %v601_v30  ;;  %v675_v34 = vpop.permute.xlu2 %674 }
 0x1c7   :  { %v643_v36 = vpop.xlane.xlu0 %642  ;;  %v573_v38 = vmul.f32 %v3996_v33, %v559_v31  ;;  %v680_v44 = vsel %vm461_vm7, %v675_v34, 0.0 }
 0x1c8   :  { %3997 = vrsqrt.f32 %v643_v36  ;;  %v616_v43 = vmul.f32 %v3994_v32, %v615_v14  ;;  %681 = vadd.xlane.f32.xlu0 %v680_v44  ;;  %vm663_vm13 = vcmp.eq.f32.partialorder %v643_v36, inf  ;;  %v666_v9 = vand.u32 2147483648, %v643_v36 }
 0x1c9   :  { %v574_v45 = vmul.f32 %v3996_v33, %v573_v38  ;;  %vm665_vm14 = vcmp.eq.f32.partialorder %v643_v36, 0.0 }
 0x1ca   :  { %v617_v17 = vmul.f32 0.5, %v616_v43 }
 0x1cb   :  { %v575_v46 = vmul.f32 0.5, %v574_v45 }
 0x1cc   :  { %v618_v47 = vsub.f32 1.5, %v617_v17 }
 0x1cd   :  { %v576_v49 = vsub.f32 1.5, %v575_v46 }
 0x1ce   :  { %v3998_v48 = vpop.eup %3997  ;;  %v619_v50 = vmul.f32 %v3994_v32, %v618_v47 }
 0x1cf   :  { %v657_v51 = vmul.f32 %v3998_v48, %v643_v36  ;;  %v685_v52 = vpop.xlane.xlu0 %684  ;;  %v577_v53 = vmul.f32 %v3996_v33, %v576_v49 }
 0x1d0   :  { %3999 = vrsqrt.f32 %v685_v52  ;;  %v620_v56 = vmul.f32 %v619_v50, %v601_v30  ;;  %vm705_vm15 = vcmp.eq.f32.partialorder %v685_v52, inf }
 0x1d1   :  { %v658_v54 = vmul.f32 %v3998_v48, %v657_v51  ;;  %v578_v55 = vmul.f32 %v577_v53, %v559_v31  ;;  %v4421_v53 = vpop.f32.mrf.mxu1 }
 0x1d2   :  { %v622_v3 = vsel %vm621_vm11, %v601_v30, %v620_v56  ;;  %v708_v30 = vand.u32 2147483648, %v685_v52 }
 0x1d3   :  { %v659_v57 = vmul.f32 0.5, %v658_v54  ;;  %v580_v59 = vsel %vm579_vm9, %v559_v31, %v578_v55  ;;  %v625_v10 = vsel %vm623_vm12, %v624_v4, %v622_v3  ;;  %vm707_vm9 = vcmp.eq.f32.partialorder %v685_v52, 0.0 }
 0x1d4   :  { %v583_v62 = vsel %vm581_vm10, %v582_v58, %v580_v59  ;;  %v627_v23 = vadd.f32 1e-06, %v625_v10  ;;  %v4222_v59 = vmov 1   ;;  %v238_v10 = vrot.slane %v4421_v53, 6 }
 0x1d5   :  { %v660_v60 = vsub.f32 1.5, %v659_v57  ;;  %v585_v0 = vadd.f32 1e-06, %v583_v62  ;;  %3962 = vset.pattern.permute.xlu1 %v4222_v59 }
 0x1d6   :  { %v4000_v63 = vpop.eup %3999 }
 0x1d7   :  { %v661_v1 = vmul.f32 %v3998_v48, %v660_v60  ;;  %v699_v2 = vmul.f32 %v4000_v63, %v685_v52  ;;  %v450_v5 = vpop.permute.xlu1 %449  ;;  %4001 = vrcp.f32 %v585_v0  ;;  %v4223_v60 = vmov 0  }
 0x1d8   :  { %v454_v8 = vmul.f32 %v4403_v61, %v450_v5  ;;  %3961 = vset.pattern.permute.xlu2 %v4223_v60 }
 0x1d9   :  { %v662_v6 = vmul.f32 %v661_v1, %v643_v36  ;;  %v700_v7 = vmul.f32 %v4000_v63, %v699_v2  ;;  %v209_v2 = vrot.slane %v4421_v53, 7  ;;  %v4431_v4 = vpop.f32.mrf.mxu1 }
 0x1da   :  { %v457_v12 = vmul.f32 1.442695, %v454_v8  ;;  %5638 = vst [vmem:[#allocation15_spill] sm:$0xff] %v4431_v4  ;;  %v224_v8 = vperm.slane %v4308_v21, 6 }
 0x1db   :  { %v701_v11 = vmul.f32 0.5, %v700_v7  ;;  %v664_v13 = vsel %vm663_vm13, %v643_v36, %v662_v6  ;;  %v211_v6 = vrot.slane %v4431_v4, 7  ;;  %v199_v7 = vperm.slane %v4308_v21, 7 }
 0x1dc   :  { %v667_v15 = vsel %vm665_vm14, %v666_v9, %v664_v13  ;;  %4003 = vpow2.f32 %v457_v12 }
 0x1dd   :  { %v702_v16 = vsub.f32 1.5, %v701_v11  ;;  %v669_v18 = vadd.f32 1e-06, %v667_v15  ;;  %v4002_v24 = vpop.eup %4001  ;;  %v240_v11 = vrot.slane %v4431_v4, 6  ;;  %v203_v12 = vperm.slane %v199_v7, 3 }
 0x1de   :  { %v589_v28 = vmul.f32 %v4002_v24, %v4356_v35  ;;  %v216_v13 = vsel %vm212_vm1, %v211_v6, %v209_v2  ;;  %v228_v15 = vperm.slane %v224_v8, 2 }
 0x1df   :  { %v703_v27 = vmul.f32 %v4000_v63, %v702_v16  ;;  %4005 = vrcp.f32 %v669_v18  ;;  %v3760_v16 = vmul.f32 -1.442695, %v4380_v41  ;;  %v220_v18 = vsel %vm217_vm3, %v216_v13, 0.0 }
 0x1e0   :  { %720 = vrot.lane.b32.xlu1 %v589_v28, %s4218_s25  ;;  %4007 = vrcp.f32 %v627_v23  ;;  %v253_v23 = vperm.slane %v4308_v21, 5  ;;  %v230_v28 = vmul.f32 %v228_v15, %v220_v18  ;;  %v243_v25 = vsel %vm241_vm2, %v238_v10, %v240_v11 }
 0x1e1   :  { %v704_v29 = vmul.f32 %v703_v27, %v685_v52  ;;  %v4414_v17 = vpop.permute.xlu0 %447  ;;  %v205_v27 = vmul.f32 %v203_v12, %v4421_v53 }
 0x1e2   :  { %v4004_v31 = vpop.eup %4003 }
 0x1e3   :  { %v706_v32 = vsel %vm705_vm15, %v685_v52, %v704_v29  ;;  %762 = vrot.lane.b32.xlu2 %v4004_v31, %s4221_s3  ;;  %v245_v29 = vsel %vm241_vm2, %v240_v11, %v238_v10  ;;  %v267_v31 = vrot.slane %v4421_v53, 5  ;;  %vm5640_vm2 = vcmp.ge.s32.totalorder %v4318_v26, 3 }
 0x1e4   :  { %v709_v33 = vsel %vm707_vm9, %v708_v30, %v706_v32  ;;  %v257_v30 = vperm.slane %v253_v23, 1  ;;  %v269_v32 = vrot.slane %v4431_v4, 5 }
 0x1e5   :  { %v4006_v14 = vpop.eup %4005  ;;  %v711_v34 = vadd.f32 1e-06, %v709_v33  ;;  %v4224_v33 = vmov 2  }
 0x1e6   :  { %v673_v36 = vmul.f32 %v4006_v14, %v4356_v35  ;;  %v4008_v38 = vpop.eup %4007  ;;  %3967 = vset.pattern.permute.xlu0 %v4224_v33 }
 0x1e7   :  { %4009 = vrcp.f32 %v711_v34  ;;  %v631_v43 = vmul.f32 %v4008_v38, %v4356_v35  ;;  %v234_v34 = vadd.f32 %v230_v28, %v205_v27  ;;  %v282_v38 = vperm.slane %v4308_v21, 4 }
 0x1e8   :  { %736 = vrot.lane.b32.xlu1 %v673_v36, %s4218_s25  ;;  %v249_v36 = vsel %vm246_vm6, %v245_v29, 0.0  ;;  %v214_v21 = vsel %vm212_vm1, %v209_v2, %v211_v6  ;;  %vm5639_vm1 = vcmp.ge.s32.totalorder %v4318_v26, 2 }
 0x1e9   :  { %v251_v6 = vsel %vm5639_vm1, %v243_v25, 0.0 }
 0x1ea   :  { %v261_v11 = vmul.f32 %v257_v30, %v251_v6 }
 0x1eb   :  { %728 = vrot.lane.b32.xlu2 %v631_v43, %s4218_s25 }
 0x1ed   :  { %v4010_v44 = vpop.eup %4009 }
 0x1ee   :  { %v715_v45 = vmul.f32 %v4010_v44, %v4356_v35  ;;  %v259_v44 = vmul.f32 %v257_v30, %v249_v36 }
 0x1f0   :  { %744 = vrot.lane.b32.xlu0 %v715_v45, %s4218_s25  ;;  %v274_v45 = vsel %vm270_vm5, %v269_v32, %v267_v31 }
 0x1ff   :  { %v4416_v48 = vpop.xlane.xlu2 %555 }
 0x200   :  { %vm567_vm3 = vcmp.eq.f32.partialorder %v4416_v48, inf  ;;  %vm569_vm6 = vcmp.eq.f32.partialorder %v4416_v48, 0.0 }
 0x202   :  { %v4419_v51 = vpop.xlane.xlu1 %639 }
 0x203   :  { %v654_v29 = vand.u32 2147483648, %v4419_v51 }
 0x20c   :  { %v598_v46 = vpop.xlane.xlu0 %597 }
 0x20d   :  { %4011 = vrsqrt.f32 %v598_v46  ;;  %vm609_vm10 = vcmp.eq.f32.partialorder %v598_v46, inf  ;;  %v612_v58 = vand.u32 2147483648, %v598_v46  ;;  %vm611_vm11 = vcmp.eq.f32.partialorder %v598_v46, 0.0 }
 0x20e   :  { %4013 = vrsqrt.f32 %v4416_v48 }
 0x20f   :  { %4015 = vrsqrt.f32 %v4419_v51 }
 0x213   :  { %v4012_v47 = vpop.eup %4011 }
 0x214   :  { %v603_v49 = vmul.f32 %v4012_v47, %v598_v46  ;;  %v4424_v56 = vpop.eup %4013 }
 0x215   :  { %v4016_v62 = vpop.eup %4015  ;;  %v561_v63 = vmul.f32 %v4424_v56, %v4416_v48 }
 0x216   :  { %v604_v50 = vmul.f32 %v4012_v47, %v603_v49  ;;  %v645_v5 = vmul.f32 %v4016_v62, %v4419_v51  ;;  %v278_v49 = vsel %vm275_vm8, %v274_v45, 0.0  ;;  %vm653_vm8 = vcmp.eq.f32.partialorder %v4419_v51, 0.0 }
 0x217   :  { %v562_v9 = vmul.f32 %v4424_v56, %v561_v63 }
 0x218   :  { %v605_v52 = vmul.f32 0.5, %v604_v50  ;;  %v646_v24 = vmul.f32 %v4016_v62, %v645_v5  ;;  %v286_v50 = vperm.slane %v282_v38, 0 }
 0x219   :  { %v563_v14 = vmul.f32 0.5, %v562_v9 }
 0x21a   :  { %v606_v54 = vsub.f32 1.5, %v605_v52  ;;  %v263_v52 = vadd.f32 %v259_v44, %v234_v34 }
 0x21c   :  { %v607_v55 = vmul.f32 %v4012_v47, %v606_v54  ;;  %v564_v54 = vsub.f32 1.5, %v563_v14 }
 0x21e   :  { %v608_v57 = vmul.f32 %v607_v55, %v598_v46  ;;  %v288_v55 = vmul.f32 %v286_v50, %v278_v49  ;;  %v565_v7 = vmul.f32 %v4424_v56, %v564_v54 }
 0x220   :  { %v610_v0 = vsel %vm609_vm10, %v598_v46, %v608_v57  ;;  %v647_v46 = vmul.f32 0.5, %v646_v24  ;;  %v222_v57 = vsel %vm218_vm4, %v214_v21, 0.0  ;;  %v566_v13 = vmul.f32 %v565_v7, %v4416_v48 }
 0x221   :  { %v613_v1 = vsel %vm611_vm11, %v612_v58, %v610_v0  ;;  %v453_v58 = vmul.f32 %v4403_v61, %v4414_v17  ;;  %v4467_v0 = vadd.f32 %v288_v55, %v263_v52  ;;  %v232_v5 = vmul.f32 %v228_v15, %v222_v57 }
 0x222   :  { %v626_v3 = vadd.f32 1e-06, %v613_v1  ;;  %v648_v63 = vsub.f32 1.5, %v647_v46  ;;  %v272_v61 = vsel %vm270_vm5, %v267_v31, %v269_v32  ;;  %v568_v23 = vsel %vm567_vm3, %v4416_v48, %v566_v13 }
 0x223   :  { %v3757_v2 = vmul.f32 -1.442695, %v4467_v0  ;;  %v455_v17 = vmul.f32 1.442695, %v453_v58  ;;  %v280_v56 = vsel %vm5640_vm2, %v272_v61, 0.0  ;;  %v570_v24 = vand.u32 2147483648, %v4416_v48 }
 0x224   :  { %4017 = vrcp.f32 %v626_v3  ;;  %v207_v3 = vmul.f32 %v203_v12, %v4431_v4  ;;  %v649_v8 = vmul.f32 %v4016_v62, %v648_v63  ;;  %v3761_v12 = vmul.f32 -1.442695, %v4382_v42 }
 0x225   :  { %4019 = vpow2.f32 %v3760_v16  ;;  %v290_v16 = vmul.f32 %v286_v50, %v280_v56  ;;  %vm651_vm4 = vcmp.eq.f32.partialorder %v4419_v51, inf  ;;  %vm765_vm5 = vcmask 15360  }
 0x226   :  { %4021 = vpow2.f32 %v3757_v2  ;;  %v236_v10 = vadd.f32 %v232_v5, %v207_v3  ;;  %v650_v15 = vmul.f32 %v649_v8, %v4419_v51  ;;  %v571_v30 = vsel %vm569_vm6, %v570_v24, %v568_v23 }
 0x227   :  { %4023 = vpow2.f32 %v455_v17  ;;  %v5627_v21 = vmov 3  }
 0x228   :  { %v265_v62 = vadd.f32 %v261_v11, %v236_v10  ;;  %v652_v26 = vsel %vm651_vm4, %v4419_v51, %v650_v15 }
 0x229   :  { %v655_v48 = vsel %vm653_vm8, %v654_v29, %v652_v26 }
 0x22a   :  { %v4018_v43 = vpop.eup %4017  ;;  %v4498_v31 = vadd.f32 %v290_v16, %v265_v62  ;;  %v668_v45 = vadd.f32 1e-06, %v655_v48 }
 0x22b   :  { %v630_v47 = vmul.f32 %v4018_v43, %v4367_v39  ;;  %v4020_v1 = vpop.eup %4019  ;;  %v584_v43 = vadd.f32 1e-06, %v571_v30 }
 0x22c   :  { %v4478_v9 = vadd.f32 1.0, %v4020_v1  ;;  %v4022_v18 = vpop.eup %4021  ;;  %v3759_v44 = vmul.f32 -1.442695, %v4498_v31 }
 0x22d   :  { %726 = vrot.lane.b32.xlu0 %v630_v47, %s4218_s25  ;;  %v4490_v27 = vadd.f32 1.0, %v4022_v18  ;;  %v4024_v32 = vpop.eup %4023 }
 0x22e   :  { %4025 = vrcp.f32 %v4478_v9  ;;  %vm388_vm12 = vweird.f32 %v4478_v9  ;;  %v394_v7 = vand.u32 2147483648, %v4478_v9  ;;  %v392_v17 = vand.u32 2147483647, %v4478_v9 }
 0x22f   :  { %4027 = vpow2.f32 %v3761_v12  ;;  %vm331_vm10 = vweird.f32 %v4490_v27  ;;  %v337_v24 = vand.u32 2147483648, %v4490_v27  ;;  %v335_v29 = vand.u32 2147483647, %v4490_v27 }
 0x230   :  { %4029 = vrcp.f32 %v4490_v27  ;;  %v395_v62 = vor.u32 1.1754944e-38, %v394_v7  ;;  %vm393_vm1 = vcmp.eq.f32.partialorder %v392_v17, 8.507059e+37 }
 0x231   :  { %vm336_vm3 = vcmp.eq.f32.partialorder %v335_v29, 8.507059e+37 }
 0x234   :  { %v4502_v34 = vpop.eup %4025 }
 0x235   :  { %v4028_v38 = vpop.eup %4027  ;;  %v384_v46 = vmul.f32 %v4502_v34, %v4478_v9  ;;  %vm389_vm13 = vweird.f32 %v4502_v34 }
 0x236   :  { %v4508_v47 = vpop.eup %4029  ;;  %v4510_v49 = vadd.f32 1.0, %v4028_v38  ;;  %vm4531_vm14 = vmor %vm388_vm12, %vm389_vm13  ;;  %vm5620_vm12 = vcmask 261120  }
 0x237   :  { %v385_v52 = vsub.f32 1.0, %v384_v46  ;;  %v327_v55 = vmul.f32 %v4508_v47, %v4490_v27  ;;  %vm332_vm11 = vweird.f32 %v4508_v47 }
 0x238   :  { %vm333_vm2 = vmor %vm331_vm10, %vm332_vm11  ;;  %vm403_vm4 = vweird.f32 %v4510_v49 }
 0x239   :  { %v386_v63 = vmul.f32 %v4502_v34, %v385_v52  ;;  %v328_v3 = vsub.f32 1.0, %v327_v55 }
 0x23b   :  { %v4494_v28 = vpop.xlane.xlu0 %681  ;;  %v387_v61 = vadd.f32 %v4502_v34, %v386_v63  ;;  %v329_v56 = vmul.f32 %v4508_v47, %v328_v3 }
 0x23c   :  { %4031 = vrsqrt.f32 %v4494_v28  ;;  %vm693_vm15 = vcmp.eq.f32.partialorder %v4494_v28, inf  ;;  %v696_v15 = vand.u32 2147483648, %v4494_v28  ;;  %vm695_vm9 = vcmp.eq.f32.partialorder %v4494_v28, 0.0 }
 0x23d   :  { %v763_v14 = vpop.permute.xlu2 %762  ;;  %4033 = vrcp.f32 %v584_v43  ;;  %v391_v18 = vsel %vm4531_vm14, %v4502_v34, %v387_v61  ;;  %v338_v34 = vor.u32 1.1754944e-38, %v337_v24  ;;  %vm753_vm14 = vcmask 392192  }
 0x23e   :  { %v766_v36 = vsel %vm765_vm5, %v4024_v32, %v763_v14  ;;  %4035 = vpow2.f32 %v3759_v44  ;;  %v4555_v14 = vsel %vm393_vm1, %v395_v62, %v391_v18  ;;  %v4607_v62 = vand.u32 127, %v192_v19 }
 0x23f   :  { %782 = vperm.xlu1 %3962, %v766_v36   ;;  %774 = vperm.xlu2 %3961, %v766_v36   ;;  %4037 = vrcp.f32 %v668_v45  ;;  %v409_v45 = vand.u32 2147483648, %v4510_v49 }
 0x240   :  { %4039 = vrcp.f32 %v4510_v49  ;;  %vm778_vm1 = vcmp.ge.s32.totalorder %v4607_v62, 32 }
 0x241   :  { %v410_v55 = vor.u32 1.1754944e-38, %v409_v45 }
 0x242   :  { %v4032_v51 = vpop.eup %4031 }
 0x243   :  { %v687_v50 = vmul.f32 %v4032_v51, %v4494_v28  ;;  %v4034_v58 = vpop.eup %4033 }
 0x244   :  { %v4036_v25 = vpop.eup %4035  ;;  %v588_v12 = vmul.f32 %v4034_v58, %v4367_v39 }
 0x245   :  { %v688_v54 = vmul.f32 %v4032_v51, %v687_v50  ;;  %v4038_v5 = vpop.eup %4037  ;;  %v4526_v8 = vadd.f32 1.0, %v4036_v25  ;;  %v407_v50 = vand.u32 2147483647, %v4510_v49  ;;  %v729_v25 = vpop.permute.xlu2 %728 }
 0x246   :  { %v4522_v2 = vpop.eup %4039  ;;  %v672_v11 = vmul.f32 %v4038_v5, %v4367_v39 }
 0x247   :  { %3964 = vset.pattern.permute.xlu1 %v5627_v21  ;;  %3963 = vset.pattern.permute.xlu2 %v4224_v33  ;;  %v689_v57 = vmul.f32 0.5, %v688_v54  ;;  %v399_v9 = vmul.f32 %v4522_v2, %v4510_v49  ;;  %4041 = vrcp.f32 %v4526_v8  ;;  %vm404_vm6 = vweird.f32 %v4522_v2 }
 0x248   :  { %798 = vperm.xlu1 %3964, %v766_v36   ;;  %790 = vperm.xlu2 %3963, %v766_v36   ;;  %v4558_v36 = vmul.f32 2.0, %v4555_v14  ;;  %vm4571_vm8 = vmor %vm403_vm4, %vm404_vm6  ;;  %vm408_vm13 = vcmp.eq.f32.partialorder %v407_v50, 8.507059e+37  ;;  %v365_v17 = vand.u32 2147483647, %v4526_v8  ;;  %vm786_vm6 = vcmp.ge.s32.totalorder %v4607_v62, 64 }
 0x249   :  { %v690_v1 = vsub.f32 1.5, %v689_v57  ;;  %v400_v30 = vsub.f32 1.0, %v399_v9 }
 0x24a   :  { %vm366_vm11 = vcmp.eq.f32.partialorder %v365_v17, 8.507059e+37 }
 0x24b   :  { %v691_v6 = vmul.f32 %v4032_v51, %v690_v1  ;;  %v401_v43 = vmul.f32 %v4522_v2, %v400_v30 }
 0x24d   :  { %v692_v10 = vmul.f32 %v691_v6, %v4494_v28  ;;  %v4042_v38 = vpop.eup %4041  ;;  %v367_v6 = vand.u32 2147483648, %v4526_v8 }
 0x24e   :  { %v357_v46 = vmul.f32 %v4042_v38, %v4526_v8 }
 0x24f   :  { %v694_v16 = vsel %vm693_vm15, %v4494_v28, %v692_v10  ;;  %v330_v28 = vadd.f32 %v4508_v47, %v329_v56  ;;  %vm361_vm15 = vweird.f32 %v4526_v8  ;;  %v368_v10 = vor.u32 1.1754944e-38, %v367_v6 }
 0x250   :  { %734 = vrot.lane.b32.xlu1 %v672_v11, %s4218_s25  ;;  %718 = vrot.lane.b32.xlu2 %v588_v12, %s4218_s25  ;;  %v697_v23 = vsel %vm695_vm9, %v696_v15, %v694_v16  ;;  %v358_v57 = vsub.f32 1.0, %v357_v46  ;;  %vm362_vm9 = vweird.f32 %v4042_v38 }
 0x251   :  { %3965 = vset.pattern.permute.xlu1 %v4223_v60  ;;  %3966 = vset.pattern.permute.xlu2 %v4222_v59  ;;  %v710_v26 = vadd.f32 1e-06, %v697_v23  ;;  %v334_v48 = vsel %vm333_vm2, %v4508_v47, %v330_v28  ;;  %v402_v47 = vadd.f32 %v4522_v2, %v401_v43  ;;  %vm363_vm10 = vmor %vm361_vm15, %vm362_vm9  ;;  %vm779_vm2 = vcmp.lt.s32.totalorder %v4607_v62, 64 }
 0x252   :  { %v721_v32 = vpop.permute.xlu1 %720  ;;  %v339_v27 = vsel %vm336_vm3, %v338_v34, %v334_v48  ;;  %v359_v5 = vmul.f32 %v4042_v38, %v358_v57  ;;  %vm770_vm3 = vcmp.lt.s32.totalorder %v4607_v62, 32  ;;  %vm4612_vm4 = vmand %vm778_vm1, %vm779_vm2  ;;  %vm5629_vm15 = vcmp.ge.s32.totalorder %v4607_v62, 96 }
 0x253   :  { %4043 = vrcp.f32 %v710_v26  ;;  %v4576_v54 = vmul.f32 %v339_v27, %v4467_v0  ;;  %v406_v63 = vsel %vm4571_vm8, %v4522_v2, %v402_v47  ;;  %v749_v0 = vsel %vm461_vm7, %v721_v32, %v729_v25 }
 0x254   :  { %v4586_v3 = vsel %vm408_vm13, %v410_v55, %v406_v63  ;;  %v360_v61 = vadd.f32 %v4042_v38, %v359_v5  ;;  %vm787_vm8 = vcmp.lt.s32.totalorder %v4607_v62, 96  ;;  %vm5628_vm9 = vcmask 1040384  }
 0x255   :  { %v4592_v2 = vmul.f32 2.0, %v4586_v3  ;;  %vm4622_vm13 = vmand %vm786_vm6, %vm787_vm8 }
 0x256   :  { %v364_v11 = vsel %vm363_vm10, %v4042_v38, %v360_v61 }
 0x257   :  { %v369_v12 = vsel %vm366_vm11, %v368_v10, %v364_v11 }
 0x258   :  { %838 = vrot.lane.b32.xlu1 %v4558_v36, %s4218_s25  ;;  %v374_v13 = vmul.f32 %v369_v12, %v4498_v31 }
 0x259   :  { %v4044_v44 = vpop.eup %4043 }
 0x25a   :  { %v714_v51 = vmul.f32 %v4044_v44, %v4367_v39  ;;  %v737_v58 = vpop.permute.xlu1 %736 }
 0x25b   :  { %v752_v49 = vsel %vm5620_vm12, %v749_v0, %v737_v58 }
 0x25c   :  { %742 = vrot.lane.b32.xlu2 %v714_v51, %s4218_s25 }
 0x260   :  { %816 = vrot.lane.b32.xlu1 %v4576_v54, %s4226_s30 }
 0x262   :  { %v745_v1 = vpop.permute.xlu0 %744 }
 0x263   :  { %v4589_v7 = vsel %vm753_vm14, %v752_v49, %v745_v1 }
 0x264   :  { %803 = vrot.lane.b32.xlu0 %v4589_v7, %s4226_s30  ;;  %842 = vrot.lane.b32.xlu2 %v4592_v2, %s4227_s8 }
 0x26c   :  { %814 = vrot.lane.b32.xlu0 %v4367_v39, %s4226_s30  ;;  %822 = vrot.lane.b32.xlu2 %v4356_v35, %s4218_s25 }
 0x274   :  { %824 = vrot.lane.b32.xlu0 %v374_v13, %s4218_s25 }
 0x299   :  { %v775_v56 = vpop.permute.xlu2 %774 }
 0x29a   :  { %v777_v31 = vsel %vm770_vm3, %v775_v56, 0.0 }
 0x29f   :  { %v727_v43 = vpop.permute.xlu0 %726 }
 0x2a2   :  { %v791_v15 = vpop.permute.xlu2 %790 }
 0x2aa   :  { %v719_v18 = vpop.permute.xlu2 %718 }
 0x2ab   :  { %v748_v27 = vsel %vm461_vm7, %v719_v18, %v727_v43 }
 0x2b1   :  { %v783_v8 = vpop.permute.xlu1 %782 }
 0x2b2   :  { %v785_v19 = vsel %vm4612_vm4, %v783_v8, %v777_v31 }
 0x2b3   :  { %v793_v24 = vsel %vm4622_vm13, %v791_v15, %v785_v19  ;;  %v465_v15 = vsel %vm461_vm7, %v4360_v37, 0.0 }
 0x2b6   :  { %v743_v30 = vpop.permute.xlu2 %742 }
 0x2ba   :  { %v799_v23 = vpop.permute.xlu1 %798 }
 0x2bb   :  { %v4631_v26 = vsel %vm5629_vm15, %v799_v23, %v793_v24 }
 0x2bc   :  { %v918_v28 = vperm.slane %v4631_v26, 0 }
 0x2be   :  { %v4634_v29 = vmul.f32 0.0, %v918_v28  ;;  %v843_v34 = vpop.permute.xlu2 %842 }
 0x2c0   :  { %931 = vmatpush.msra.mxu3 %v4634_v29 }
 0x2c2   :  { %v735_v32 = vpop.permute.xlu1 %734  ;;  %932 = vmatpush.msra.mxu3 %v4634_v29 }
 0x2c3   :  { %v751_v44 = vsel %vm5620_vm12, %v748_v27, %v735_v32 }
 0x2c4   :  { %933 = vmatpush.msra.mxu3 %v4634_v29  ;;  %v754_v45 = vsel %vm753_vm14, %v751_v44, %v743_v30  ;;  %vm826_vm14 = vcmask 785408  }
 0x2c6   :  { %934 = vmatpush.msra.mxu3 %v4634_v29  ;;  %v823_v57 = vpop.permute.xlu2 %822 }
 0x2c8   :  { %935 = vmatpush.msra.mxu3 %v4634_v29 }
 0x2ca   :  { %v839_v48 = vpop.permute.xlu1 %838  ;;  %936 = vmatpush.msra.mxu3 %v4634_v29 }
 0x2cb   :  { %v845_v38 = vsel %vm765_vm5, %v839_v48, %v843_v34 }
 0x2cc   :  { %937 = vmatpush.msra.mxu3 %v4634_v29  ;;  %853 = vperm.xlu2 %3966, %v845_v38  }
 0x2cd   :  { %848 = vperm.xlu1 %3965, %v845_v38   ;;  %858 = vperm.xlu0 %3967, %v845_v38  }
 0x2ce   :  { %938 = vmatpush.msra.mxu3 %v4634_v29 }
 0x2d5   :  { %3968 = vset.pattern.permute.xlu1 %v5627_v21  ;;  %867 = vrot.lane.b32.xlu0 %v4558_v36, %s4228_s9 }
 0x2d6   :  { %863 = vperm.xlu1 %3968, %v845_v38   ;;  %v804_v46 = vpop.permute.xlu0 %803  ;;  %3969 = vset.pattern.permute.xlu0 %v4223_v60  ;;  %v817_v60 = vpop.permute.xlu1 %816 }
 0x2d7   :  { %v4652_v51 = vsel %vm5620_vm12, %v754_v45, %v804_v46 }
 0x2d8   :  { %3762 = vmatmul.msk.f32.vlgmr.msra.gmra.mxu3 %vm5633_vm0, %v4652_v51  ;;  %v5626_v18 = vrot.slane %v4652_v51, 2  ;;  %v1236_v9 = vrot.slane %v4652_v51, 1 }
 0x2de   :  { %808 = vrot.lane.b32.xlu1 %v754_v45, %s4218_s25  ;;  %v815_v36 = vpop.permute.xlu0 %814 }
 0x2df   :  { %3971 = vset.pattern.permute.xlu1 %v4224_v33  ;;  %v818_v5 = vsel %vm5620_vm12, %v815_v36, %v817_v60 }
 0x2e6   :  { %870 = vrot.lane.b32.xlu1 %v4592_v2, %s4218_s25  ;;  %v825_v50 = vpop.permute.xlu0 %824 }
 0x2ee   :  { %830 = vrot.lane.b32.xlu1 %v4576_v54, %s4218_s25  ;;  %v827_v54 = vsel %vm826_vm14, %v823_v57, %v825_v50  ;;  %v5622_v50 = vrot.slane %v4652_v51, 4  ;;  %v900_v57 = vadd.s32 56, %v4306_v20 }
 0x2ef   :  { %v4672_v2 = vsel %vm5633_vm0, %v818_v5, %v827_v54 }
 0x2f2   :  { %945 = vxpose.xlu2.b32.start.end [1/1] (short) (narrow) %v4652_v51, 64 }
 0x2f6   :  { %833 = vrot.lane.b32.xlu1 %v374_v13, %s4226_s30 }
 0x326   :  { %v854_v63 = vpop.permute.xlu2 %853 }
 0x33f   :  { %v849_v47 = vpop.permute.xlu1 %848  ;;  %v859_v55 = vpop.permute.xlu0 %858 }
 0x340   :  { %v851_v33 = vsel %vm770_vm3, %v849_v47, 0.0 }
 0x341   :  { %v856_v49 = vsel %vm4612_vm4, %v854_v63, %v851_v33  ;;  %v897_v63 = vadd.s32 32, %v4306_v20 }
 0x342   :  { %v861_v61 = vsel %vm4622_vm13, %v859_v55, %v856_v49  ;;  %v899_v55 = vadd.s32 48, %v4306_v20  ;;  %v909_v49 = vshra.s32 %v4607_v62, 5 }
 0x344   :  { %v907_v54 = vshra.s32 %v899_v55, 4 }
 0x346   :  { %vm4739_vm10 = vcmp.eq.s32.totalorder %v907_v54, %v909_v49 }
 0x347   :  { %v868_v25 = vpop.permute.xlu0 %867 }
 0x348   :  { %v864_v52 = vpop.permute.xlu1 %863 }
 0x349   :  { %v4679_v10 = vsel %vm5629_vm15, %v864_v52, %v861_v61  ;;  %v905_v61 = vshra.s32 %v897_v63, 4 }
 0x34b   :  { %vm4755_vm2 = vcmp.eq.s32.totalorder %v905_v61, %v909_v49 }
 0x350   :  { %v809_v58 = vpop.permute.xlu1 %808 }
 0x351   :  { %v4689_v13 = vsel %vm5620_vm12, %v809_v58, %v4589_v7  ;;  %v462_v7 = vsel %vm461_vm7, %v4371_v40, 0.0  ;;  %v898_v58 = vadd.s32 40, %v4306_v20 }
 0x352   :  { %v5624_v38 = vrot.slane %v4689_v13, 2 }
 0x353   :  { %v906_v5 = vshra.s32 %v898_v58, 4  ;;  %v5663_v58 = vmov 0 }
 0x354   :  { %3972 = vset.pattern.permute.xlu2 %v5627_v21 }
 0x355   :  { %vm4747_vm1 = vcmp.eq.s32.totalorder %v906_v5, %v909_v49 }
 0x358   :  { %v871_v0 = vpop.permute.xlu1 %870 }
 0x359   :  { %v873_v1 = vsel %vm765_vm5, %v868_v25, %v871_v0  ;;  %vm5625_vm5 = vcmask 7168   ;;  %v908_v25 = vshra.s32 %v900_v57, 4  ;;  %v5661_v57 = vmov 0 }
 0x35a   :  { %886 = vperm.xlu1 %3971, %v873_v1   ;;  %876 = vperm.xlu0 %3969, %v873_v1  }
 0x35b   :  { %v940_v6 = vpop.f32.mrf.mxu3  ;;  %vm4743_vm11 = vcmp.eq.s32.totalorder %v908_v25, %v909_v49 }
 0x35c   :  { %v943_v17 = vsub.f32 %v4672_v2, %v940_v6  ;;  %v895_v6 = vadd.s32 16, %v4306_v20 }
 0x35e   :  { %v944_v11 = vmul.f32 %v943_v17, %v4679_v10 }
 0x360   :  { %3763 = vmatpush.msk.msrb.mxu3 %vm5628_vm9, %v944_v11  ;;  %v4723_v36 = vpop.permute.xlu1 %830 }
 0x362   :  { %3970 = vset.pattern.permute.xlu0 %v4222_v59 }
 0x363   :  { %881 = vperm.xlu0 %3970, %v873_v1  }
 0x368   :  { %v4728_v52 = vpop.permute.xlu1 %833 }
 0x36b   :  { %504 = vrot.lane.b32.xlu0 %v4360_v37, %s4229_s10 }
 0x373   :  { %502 = vrot.lane.b32.xlu0 %v4371_v40, %s4229_s10 }
 0x38b   :  { %v961_v12 = vpop.trf.xlu2 }
 0x38c   :  { %3764 = vmatmul.msk.f32.vlgmr.msrb.gmra.mxu3 %vm5625_vm5, %v961_v12 }
 0x38f   :  { %1088 = vxpose.xlu1.b32.start.end [1/1] (short) (narrow) %v4689_v13, 64 }
 0x393   :  { %v962_v56 = vpop.trf.xlu2  ;;  %891 = vperm.xlu2 %3972, %v873_v1   ;;  %v896_v1 = vadd.s32 24, %v4306_v20 }
 0x394   :  { %3765 = vmatmul.msk.f32.gmra.mxu3 %vm5625_vm5, %v962_v56 }
 0x395   :  { %v904_v12 = vshra.s32 %v896_v1, 4 }
 0x39b   :  { %v963_v59 = vpop.trf.xlu2 }
 0x39c   :  { %3766 = vmatmul.msk.f32.gmra.mxu3 %vm5625_vm5, %v963_v59 }
 0x39d   :  { %466 = vadd.xlane.f32.xlu0 %v465_v15 }
 0x3a3   :  { %v964_v8 = vpop.trf.xlu2 }
 0x3a4   :  { %3767 = vmatmul.msk.f32.gmra.mxu3 %vm5625_vm5, %v964_v8 }
 0x3a5   :  { %463 = vadd.xlane.f32.xlu0 %v462_v7  ;;  %v903_v7 = vshra.s32 %v895_v6, 4  ;;  %v5621_v6 = vrot.slane %v4689_v13, 5 }
 0x3a7   :  { %vm4778_vm6 = vcmp.eq.s32.totalorder %v903_v7, %v909_v49 }
 0x3ab   :  { %v965_v31 = vpop.trf.xlu2 }
 0x3ac   :  { %3768 = vmatmul.msk.f32.gmra.mxu3 %vm5625_vm5, %v965_v31 }
 0x3b3   :  { %v966_v19 = vpop.trf.xlu2 }
 0x3b4   :  { %3769 = vmatmul.msk.f32.gmra.mxu3 %vm5625_vm5, %v966_v19 }
 0x3b9   :  { %1589 = vxpose.xlu2.b32.start.end [1/1] (short) (narrow) %v5626_v18, 64 }
 0x3bb   :  { %v967_v37 = vpop.trf.xlu2 }
 0x3bc   :  { %3770 = vmatmul.msk.f32.gmra.mxu3 %vm5625_vm5, %v967_v37 }
 0x3c3   :  { %v968_v23 = vpop.trf.xlu2 }
 0x3c4   :  { %3771 = vmatmul.msk.f32.gmra.mxu3 %vm5625_vm5, %v968_v23 }
 0x3cc   :  { %v877_v24 = vpop.permute.xlu0 %876  ;;  %v4734_v0 = vpop.permute.xlu1 %886 }
 0x3cd   :  { %v4708_v40 = vsel %vm770_vm3, %v877_v24, 0.0  ;;  %v902_v24 = vshra.s32 %v4311_v22, 4  ;;  %vm4767_vm3 = vcmp.eq.s32.totalorder %v904_v12, %v909_v49 }
 0x3cf   :  { %vm4788_vm8 = vcmp.eq.s32.totalorder %v902_v24, %v909_v49 }
 0x3d0   :  { %v5662_v57 = vsel %vm4788_vm8, 4294967295, %v5661_v57 }
 0x3d5   :  { %v4710_v28 = vpop.permute.xlu0 %881 }
 0x3dd   :  { %v505_v32 = vpop.permute.xlu0 %504 }
 0x3de   :  { %v511_v45 = vsel %vm461_vm7, %v505_v32, 0.0 }
 0x3e5   :  { %v503_v34 = vpop.permute.xlu0 %502 }
 0x3e6   :  { %v508_v48 = vsel %vm461_vm7, %v503_v34, 0.0 }
 0x3e7   :  { %509 = vadd.xlane.f32.xlu0 %v508_v48 }
 0x3f9   :  { %1735 = vxpose.xlu2.b32.start.end [1/1] (short) (narrow) %v5624_v38, 64 }
 0x40f   :  { %v4720_v43 = vpop.f32.mrf.mxu3 }
 0x410   :  { %v467_v61 = vpop.xlane.xlu0 %466 }
 0x411   :  { %4045 = vrsqrt.f32 %v467_v61  ;;  %vm487_vm12 = vcmp.eq.f32.partialorder %v467_v61, inf  ;;  %vm489_vm5 = vcmp.eq.f32.partialorder %v467_v61, 0.0 }
 0x417   :  { %v1026_v27 = vpop.f32.mrf.mxu3 }
 0x41f   :  { %v1029_v44 = vpop.f32.mrf.mxu3 }
 0x427   :  { %512 = vadd.xlane.f32.xlu1 %v511_v45  ;;  %v1032_v46 = vpop.f32.mrf.mxu3  ;;  %v901_v45 = vshra.s32 %v4306_v20, 4 }
 0x428   :  { %v1050_v55 = vsel %vm4767_vm3, %v1032_v46, 0.0 }
 0x429   :  { %vm4798_vm14 = vcmp.eq.s32.totalorder %v901_v45, %v909_v49  ;;  %v4804_v46 = vadd.f32 %v1050_v55, %v4634_v29  ;;  %v5630_v55 = vrot.slane %v4652_v51, 5 }
 0x42a   :  { %v5664_v58 = vsel %vm4798_vm14, 4294967295, %v5663_v58 }
 0x42f   :  { %v1035_v60 = vpop.f32.mrf.mxu3 }
 0x430   :  { %v1051_v48 = vsel %vm4755_vm2, %v1035_v60, 0.0  ;;  %v1049_v60 = vsel %vm4778_vm6, %v1029_v44, 0.0  ;;  %v1047_v44 = vsel %vm4798_vm14, %v4720_v43, 0.0  ;;  %v5623_v43 = vrot.slane %v4689_v13, 3 }
 0x431   :  { %v4794_v20 = vadd.f32 %v1051_v48, %v4634_v29  ;;  %v4810_v63 = vadd.f32 %v1049_v60, %v4634_v29 }
 0x433   :  { %v4764_v23 = vpop.trf.xlu1 }
 0x437   :  { %v1038_v47 = vpop.f32.mrf.mxu3 }
 0x438   :  { %v1052_v37 = vsel %vm4747_vm1, %v1038_v47, 0.0  ;;  %v3930_v47 = vmul.f32 -1.442695, %v4421_v53 }
 0x439   :  { %2237 = vxpose.xlu2.b32.start.end [1/1] (short) (narrow) %v5622_v50, 64  ;;  %v4784_v22 = vadd.f32 %v1052_v37, %v4634_v29 }
 0x43b   :  { %v4815_v54 = vpop.trf.xlu1 }
 0x43f   :  { %v1041_v33 = vpop.f32.mrf.mxu3 }
 0x440   :  { %v1053_v15 = vsel %vm4739_vm10, %v1041_v33, 0.0  ;;  %v1048_v33 = vsel %vm4788_vm8, %v1026_v27, 0.0  ;;  %v4823_v27 = vadd.f32 %v1047_v44, %v4634_v29 }
 0x441   :  { %v4773_v34 = vadd.f32 %v1053_v15, %v4634_v29  ;;  %v4819_v25 = vadd.f32 %v1048_v33, %v4634_v29 }
 0x443   :  { %v4828_v49 = vpop.trf.xlu1 }
 0x447   :  { %v1044_v59 = vpop.f32.mrf.mxu3 }
 0x448   :  { %v1054_v8 = vsel %vm4743_vm11, %v1044_v59, 0.0  ;;  %v4046_v59 = vpop.eup %4045 }
 0x449   :  { %v4760_v19 = vadd.f32 %v1054_v8, %v4634_v29  ;;  %v481_v15 = vmul.f32 %v4046_v59, %v467_v61 }
 0x44b   :  { %1074 = vmatpush.msrb.mxu0 %v4760_v19  ;;  %v4833_v1 = vpop.trf.xlu1  ;;  %v482_v8 = vmul.f32 %v4046_v59, %v481_v15 }
 0x44d   :  { %1075 = vmatpush.msrb.mxu0 %v4773_v34  ;;  %v483_v37 = vmul.f32 0.5, %v482_v8 }
 0x44f   :  { %1076 = vmatpush.msrb.mxu0 %v4784_v22  ;;  %v484_v24 = vsub.f32 1.5, %v483_v37 }
 0x451   :  { %1077 = vmatpush.msrb.mxu0 %v4794_v20  ;;  %v485_v45 = vmul.f32 %v4046_v59, %v484_v24 }
 0x453   :  { %1078 = vmatpush.msrb.mxu0 %v4804_v46  ;;  %v4835_v5 = vpop.trf.xlu1  ;;  %v486_v60 = vmul.f32 %v485_v45, %v467_v61 }
 0x455   :  { %1079 = vmatpush.msrb.mxu0 %v4810_v63  ;;  %v488_v50 = vsel %vm487_vm12, %v467_v61, %v486_v60  ;;  %vm5666_vm12 = vcmp.ge.s32.totalorder %v4607_v62, 96  ;;  %v1382_v62 = vrot.slane %v4689_v13, 1 }
 0x457   :  { %1080 = vmatpush.msrb.mxu0 %v4819_v25 }
 0x459   :  { %1081 = vmatpush.msrb.mxu0 %v4823_v27 }
 0x45a   :  { %3772 = vmatmul.msk.f32.vlgmr.msrb.gmra.mxu0 %vm5633_vm0, %v4689_v13 }
 0x45b   :  { %v4840_v29 = vpop.trf.xlu1 }
 0x461   :  { %2059 = vxpose.xlu1.b32.start.end [1/1] (short) (narrow) %v5623_v43, 64  ;;  %v490_v43 = vand.u32 2147483648, %v467_v61 }
 0x463   :  { %v1110_v12 = vpop.trf.xlu1  ;;  %v491_v15 = vsel %vm489_vm5, %v490_v43, %v488_v50 }
 0x464   :  { %v493_v18 = vadd.f32 1e-06, %v491_v15 }
 0x46b   :  { %v1111_v7 = vpop.trf.xlu1 }
 0x479   :  { %2707 = vxpose.xlu2.b32.start.end [1/1] (short) (narrow) %v5621_v6, 64 }
 0x49a   :  { %v513_v48 = vpop.xlane.xlu1 %512 }
 0x49b   :  { %4047 = vrsqrt.f32 %v513_v48  ;;  %vm533_vm9 = vcmp.eq.f32.partialorder %v513_v48, inf  ;;  %v536_v59 = vand.u32 2147483648, %v513_v48  ;;  %vm535_vm15 = vcmp.eq.f32.partialorder %v513_v48, 0.0 }
 0x49c   :  { %4049 = vrcp.f32 %v493_v18 }
 0x4a1   :  { %v4048_v33 = vpop.eup %4047  ;;  %2561 = vxpose.xlu1.b32.start.end [1/1] (short) (narrow) %v5630_v55, 64 }
 0x4a2   :  { %v527_v44 = vmul.f32 %v4048_v33, %v513_v48  ;;  %v4050_v55 = vpop.eup %4049 }
 0x4a3   :  { %v497_v60 = vmul.f32 0.25, %v4050_v55 }
 0x4a4   :  { %v528_v6 = vmul.f32 %v4048_v33, %v527_v44  ;;  %v3180_v44 = vrot.slane %v4652_v51, 7 }
 0x4a5   :  { %v499_v50 = vmul.f32 %v497_v60, %v4356_v35 }
 0x4a6   :  { %v529_v38 = vmul.f32 0.5, %v528_v6 }
 0x4a8   :  { %v530_v8 = vsub.f32 1.5, %v529_v38 }
 0x4aa   :  { %v531_v37 = vmul.f32 %v4048_v33, %v530_v8 }
 0x4ac   :  { %v532_v21 = vmul.f32 %v531_v37, %v513_v48 }
 0x4ae   :  { %v534_v24 = vsel %vm533_vm9, %v513_v48, %v532_v21  ;;  %v892_v21 = vpop.permute.xlu2 %891  ;;  %vm5668_vm9 = vcmask 7168  }
 0x4af   :  { %v537_v45 = vsel %vm535_vm15, %v536_v59, %v534_v24  ;;  %vm5667_vm15 = vcmask 1040384  }
 0x4b0   :  { %v539_v30 = vadd.f32 1e-06, %v537_v45 }
 0x4b2   :  { %4051 = vrcp.f32 %v539_v30  ;;  %v4855_v30 = vsel %vm5633_vm0, %v4723_v36, %v4728_v52  ;;  %v1884_v36 = vrot.slane %v4652_v51, 3 }
 0x4b8   :  { %v4052_v4 = vpop.eup %4051 }
 0x4b9   :  { %3209 = vxpose.xlu2.b32.start.end [1/1] (short) (narrow) %v3180_v44, 64  ;;  %v543_v38 = vmul.f32 0.25, %v4052_v4  ;;  %v5665_v4 = vsel %vm4612_vm4, %v4710_v28, %v4708_v40  ;;  %v3002_v40 = vrot.slane %v4689_v13, 6  ;;  %vm5669_vm4 = vmmov %vm5668_vm9  ;;  %v464_v28 = vpop.xlane.xlu0 %463 }
 0x4ba   :  { %vm5671_vm5 = vmmov %vm5669_vm4 }
 0x4bb   :  { %v545_v43 = vmul.f32 %v543_v38, %v4356_v35  ;;  %v889_v35 = vsel %vm4622_vm13, %v4734_v0, %v5665_v4  ;;  %vm5670_vm13 = vmmov %vm5669_vm4  ;;  %v478_v4 = vand.u32 2147483648, %v464_v28 }
 0x4bc   :  { %v4868_v48 = vsel %vm5666_vm12, %v892_v21, %v889_v35  ;;  %vm5672_vm12 = vmmov %vm5669_vm4 }
 0x4bd   :  { %v547_v18 = vsel %vm461_vm7, %v499_v50, %v545_v43  ;;  %vm5675_vm0 = vmmov %vm5669_vm4 }
 0x4be   :  { %757 = vrot.lane.b32.xlu0 %v547_v18, %s4226_s30 }
 0x4c1   :  { %v510_v0 = vpop.xlane.xlu0 %509 }
 0x4c2   :  { %4053 = vrsqrt.f32 %v510_v0  ;;  %v524_v18 = vand.u32 2147483648, %v510_v0 }
 0x4c3   :  { %4055 = vrsqrt.f32 %v464_v28 }
 0x4d7   :  { %v1083_v6 = vpop.f32.mrf.mxu0 }
 0x4d8   :  { %v1086_v61 = vsub.f32 %v4855_v30, %v1083_v6 }
 0x4da   :  { %v1087_v55 = vmul.f32 %v1086_v61, %v4868_v48 }
 0x4dc   :  { %3773 = vmatpush.msk.msrb.mxu1 %vm5667_vm15, %v1087_v55  ;;  %vm5673_vm15 = vmmov %vm5669_vm4 }
 0x4dd   :  { %3774 = vmatmul.msk.f32.vlgmr.msrb.gmra.mxu1 %vm5668_vm9, %v4764_v23  ;;  %vm5674_vm9 = vmmov %vm5669_vm4 }
 0x4e0   :  { %1265 = vxpose.xlu0.b32.start.end [1/1] (short) (narrow) %v1236_v9, 64 }
 0x4e1   :  { %3031 = vxpose.xlu1.b32.start.end [1/1] (short) (narrow) %v3002_v40, 64 }
 0x4e5   :  { %3775 = vmatmul.msk.f32.gmra.mxu1 %vm5669_vm4, %v4815_v54  ;;  %v4054_v54 = vpop.eup %4053  ;;  %vm475_vm4 = vcmp.eq.f32.partialorder %v464_v28, inf }
 0x4ed   :  { %3776 = vmatmul.msk.f32.gmra.mxu1 %vm5670_vm13, %v4828_v49  ;;  %v4056_v49 = vpop.eup %4055  ;;  %vm523_vm13 = vcmp.eq.f32.partialorder %v510_v0, 0.0 }
 0x4f5   :  { %3777 = vmatmul.msk.f32.gmra.mxu1 %vm5671_vm5, %v4833_v1  ;;  %v515_v1 = vmul.f32 %v4054_v54, %v510_v0  ;;  %vm477_vm5 = vcmp.eq.f32.partialorder %v464_v28, 0.0 }
 0x4fd   :  { %3778 = vmatmul.msk.f32.gmra.mxu1 %vm5672_vm12, %v4835_v5  ;;  %v469_v5 = vmul.f32 %v4056_v49, %v464_v28  ;;  %vm5676_vm12 = vcmask 261120  }
 0x505   :  { %3779 = vmatmul.msk.f32.gmra.mxu1 %vm5673_vm15, %v4840_v29  ;;  %vm5677_vm15 = vcmask 523264  }
 0x50d   :  { %3780 = vmatmul.msk.f32.gmra.mxu1 %vm5674_vm9, %v1110_v12  ;;  %v516_v12 = vmul.f32 %v4054_v54, %v515_v1  ;;  %vm5678_vm9 = vmmov %vm5677_vm15 }
 0x50f   :  { %v517_v33 = vmul.f32 0.5, %v516_v12 }
 0x511   :  { %v518_v37 = vsub.f32 1.5, %v517_v33 }
 0x513   :  { %v519_v24 = vmul.f32 %v4054_v54, %v518_v37 }
 0x515   :  { %3781 = vmatmul.msk.f32.gmra.mxu1 %vm5675_vm0, %v1111_v7  ;;  %v470_v7 = vmul.f32 %v4056_v49, %v469_v5  ;;  %v520_v38 = vmul.f32 %v519_v24, %v510_v0  ;;  %vm521_vm0 = vcmp.eq.f32.partialorder %v510_v0, inf }
 0x517   :  { %v471_v15 = vmul.f32 0.5, %v470_v7  ;;  %v522_v43 = vsel %vm521_vm0, %v510_v0, %v520_v38  ;;  %v1227_v0 = vperm.slane %v4631_v26, 1  ;;  %vm5680_vm0 = vcmask 7168  }
 0x518   :  { %v525_v35 = vsel %vm523_vm13, %v524_v18, %v522_v43  ;;  %vm5682_vm13 = vmmov %vm5680_vm0 }
 0x519   :  { %v472_v59 = vsub.f32 1.5, %v471_v15  ;;  %v538_v55 = vadd.f32 1e-06, %v525_v35 }
 0x51b   :  { %v473_v45 = vmul.f32 %v4056_v49, %v472_v59  ;;  %4057 = vrcp.f32 %v538_v55 }
 0x51d   :  { %v474_v50 = vmul.f32 %v473_v45, %v464_v28 }
 0x51f   :  { %v476_v21 = vsel %vm475_vm4, %v464_v28, %v474_v50  ;;  %vm5681_vm4 = vmmov %vm5680_vm0 }
 0x520   :  { %1411 = vxpose.xlu0.b32.start.end [1/1] (short) (narrow) %v1382_v62, 64  ;;  %v479_v61 = vsel %vm477_vm5, %v478_v4, %v476_v21  ;;  %vm5683_vm5 = vmmov %vm5680_vm0 }
 0x521   :  { %v492_v1 = vadd.f32 1e-06, %v479_v61  ;;  %v4058_v59 = vpop.eup %4057 }
 0x523   :  { %4059 = vrcp.f32 %v492_v1 }
 0x524   :  { %4061 = vpow2.f32 %v3930_v47 }
 0x55a   :  { %v4895_v16 = vpop.f32.mrf.mxu1 }
 0x55b   :  { %v1188_v43 = vsel %vm4798_vm14, %v4895_v16, 0.0 }
 0x55c   :  { %v1196_v16 = vadd.f32 %v1188_v43, %v4823_v27  ;;  %v3326_v27 = vrot.slane %v4689_v13, 7 }
 0x55e   :  { %v1228_v55 = vmul.f32 %v1227_v0, %v1196_v16 }
 0x560   :  { %1913 = vxpose.xlu0.b32.start.end [1/1] (short) (narrow) %v1884_v36, 64 }
 0x562   :  { %v4900_v52 = vpop.f32.mrf.mxu1 }
 0x563   :  { %v1189_v38 = vsel %vm4788_vm8, %v4900_v52, 0.0 }
 0x564   :  { %v1197_v21 = vadd.f32 %v1189_v38, %v4819_v25 }
 0x566   :  { %v4955_v61 = vmul.f32 %v1227_v0, %v1197_v21 }
 0x56a   :  { %v4902_v23 = vpop.f32.mrf.mxu1 }
 0x572   :  { %v1173_v29 = vpop.f32.mrf.mxu1 }
 0x573   :  { %v1191_v24 = vsel %vm4767_vm3, %v1173_v29, 0.0 }
 0x574   :  { %v1199_v29 = vadd.f32 %v1191_v24, %v4804_v46  ;;  %v2354_v46 = vrot.slane %v4689_v13, 4 }
 0x576   :  { %v4944_v52 = vmul.f32 %v1227_v0, %v1199_v29 }
 0x57a   :  { %v1176_v8 = vpop.f32.mrf.mxu1 }
 0x57b   :  { %v1192_v33 = vsel %vm4755_vm2, %v1176_v8, 0.0  ;;  %v1190_v8 = vsel %vm4778_vm6, %v4902_v23, 0.0 }
 0x57c   :  { %v1198_v23 = vadd.f32 %v1190_v8, %v4810_v63 }
 0x57e   :  { %v4950_v4 = vmul.f32 %v1227_v0, %v1198_v23 }
 0x582   :  { %v1179_v60 = vpop.f32.mrf.mxu1 }
 0x583   :  { %v1193_v5 = vsel %vm4747_vm1, %v1179_v60, 0.0 }
 0x584   :  { %v1201_v37 = vadd.f32 %v1193_v5, %v4784_v22  ;;  %v542_v22 = vmul.f32 0.25, %v4058_v59 }
 0x586   :  { %v4927_v60 = vmul.f32 %v1227_v0, %v1201_v37  ;;  %v544_v18 = vmul.f32 %v542_v22, %v4367_v39 }
 0x58a   :  { %v1182_v6 = vpop.f32.mrf.mxu1 }
 0x58b   :  { %v1194_v54 = vsel %vm4739_vm10, %v1182_v6, 0.0  ;;  %v758_v6 = vpop.permute.xlu0 %757 }
 0x58c   :  { %v1202_v28 = vadd.f32 %v1194_v54, %v4773_v34  ;;  %v4060_v34 = vpop.eup %4059 }
 0x58e   :  { %v4920_v45 = vmul.f32 %v1227_v0, %v1202_v28 }
 0x592   :  { %v1185_v49 = vpop.f32.mrf.mxu1 }
 0x593   :  { %v1195_v12 = vsel %vm4743_vm11, %v1185_v49, 0.0  ;;  %v1281_v1 = vpop.trf.xlu0 }
 0x594   :  { %v1203_v7 = vadd.f32 %v1195_v12, %v4760_v19  ;;  %v1200_v19 = vadd.f32 %v1192_v33, %v4794_v20  ;;  %v496_v20 = vmul.f32 0.25, %v4060_v34 }
 0x596   :  { %1215 = vmatpush.msrb.mxu2 %v1203_v7  ;;  %v4915_v15 = vmul.f32 %v1227_v0, %v1203_v7  ;;  %v4934_v50 = vmul.f32 %v1227_v0, %v1200_v19  ;;  %v498_v63 = vmul.f32 %v496_v20, %v4367_v39  ;;  %v2856_v39 = vrot.slane %v4652_v51, 6 }
 0x598   :  { %1216 = vmatpush.msrb.mxu2 %v1202_v28  ;;  %1247 = vmatpush.msra.mxu0 %v4915_v15  ;;  %v546_v35 = vsel %vm461_vm7, %v498_v63, %v544_v18  ;;  %vm5679_vm7 = vcmask 1040384  }
 0x599   :  { %v4959_v25 = vsel %vm5676_vm12, %v546_v35, %v758_v6  ;;  %vm5684_vm12 = vmmov %vm5680_vm0 }
 0x59a   :  { %1217 = vmatpush.msrb.mxu2 %v1201_v37  ;;  %1248 = vmatpush.msra.mxu0 %v4920_v45  ;;  %v3472_v32 = vrot.slane %v4959_v25, 7 }
 0x59b   :  { %v1282_v12 = vpop.trf.xlu0 }
 0x59c   :  { %1218 = vmatpush.msrb.mxu2 %v1200_v19  ;;  %1249 = vmatpush.msra.mxu0 %v4927_v60  ;;  %v5688_v19 = vmov 3  }
 0x59e   :  { %1219 = vmatpush.msrb.mxu2 %v1199_v29  ;;  %1250 = vmatpush.msra.mxu0 %v4934_v50 }
 0x5a0   :  { %2383 = vxpose.xlu0.b32.start.end [1/1] (short) (narrow) %v2354_v46, 64  ;;  %1220 = vmatpush.msrb.mxu2 %v1198_v23 }
 0x5a1   :  { %1251 = vmatpush.msra.mxu0 %v4944_v52 }
 0x5a2   :  { %1221 = vmatpush.msrb.mxu2 %v1197_v21 }
 0x5a3   :  { %1252 = vmatpush.msra.mxu0 %v4950_v4 }
 0x5a4   :  { %1222 = vmatpush.msrb.mxu2 %v1196_v16 }
 0x5a5   :  { %1253 = vmatpush.msra.mxu0 %v4955_v61  ;;  %3782 = vmatmul.msk.f32.vlgmr.msrb.gmra.mxu2 %vm5677_vm15, %v4959_v25  ;;  %vm5685_vm15 = vmmov %vm5680_vm0 }
 0x5a7   :  { %1254 = vmatpush.msra.mxu0 %v1228_v55 }
 0x5a8   :  { %3783 = vmatmul.msk.f32.vlgmr.msra.gmra.mxu0 %vm5678_vm9, %v1236_v9  ;;  %v1283_v9 = vpop.trf.xlu0  ;;  %vm5686_vm9 = vmmov %vm5680_vm0 }
 0x5b0   :  { %v1284_v28 = vpop.trf.xlu0 }
 0x5b8   :  { %v1285_v33 = vpop.trf.xlu0 }
 0x5c0   :  { %v1286_v37 = vpop.trf.xlu0 }
 0x5c8   :  { %v1287_v59 = vpop.trf.xlu0 }
 0x5d0   :  { %v1288_v24 = vpop.trf.xlu0 }
 0x5e0   :  { %2885 = vxpose.xlu0.b32.start.end [1/1] (short) (narrow) %v2856_v39, 64 }
 0x620   :  { %3355 = vxpose.xlu0.b32.start.end [1/1] (short) (narrow) %v3326_v27, 64 }
 0x625   :  { %v1256_v54 = vpop.f32.mrf.mxu0 }
 0x626   :  { %v1260_v49 = vrot.slane %v1256_v54, 7 }
 0x628   :  { %v1262_v5 = vsub.f32 %v4672_v2, %v1260_v49  ;;  %v4985_v34 = vpop.f32.mrf.mxu2 }
 0x62a   :  { %v1263_v0 = vmul.f32 %v1262_v5, %v4679_v10 }
 0x62c   :  { %v1298_v7 = vrot.slane %v1263_v0, 1 }
 0x62e   :  { %3784 = vmatpush.msk.msra.mxu2 %vm5679_vm7, %v1298_v7  ;;  %vm5687_vm7 = vmmov %vm5680_vm0 }
 0x62f   :  { %3785 = vmatmul.msk.f32.vlgmr.msra.gmra.mxu2 %vm5680_vm0, %v1281_v1  ;;  %vm5689_vm0 = vcmask 523264  }
 0x637   :  { %3786 = vmatmul.msk.f32.gmra.mxu2 %vm5681_vm4, %v1282_v12  ;;  %vm5690_vm4 = vcmask 1040384  }
 0x63f   :  { %3787 = vmatmul.msk.f32.gmra.mxu2 %vm5682_vm13, %v1283_v9  ;;  %vm5691_vm13 = vmmov %vm5690_vm4 }
 0x647   :  { %3788 = vmatmul.msk.f32.gmra.mxu2 %vm5683_vm5, %v1284_v28 }
 0x64f   :  { %3789 = vmatmul.msk.f32.gmra.mxu2 %vm5684_vm12, %v1285_v33  ;;  %vm5692_vm12 = vmmov %vm5683_vm5 }
 0x657   :  { %3790 = vmatmul.msk.f32.gmra.mxu2 %vm5685_vm15, %v1286_v37  ;;  %vm5693_vm15 = vmmov %vm5683_vm5 }
 0x65f   :  { %3791 = vmatmul.msk.f32.gmra.mxu2 %vm5686_vm9, %v1287_v59  ;;  %vm5694_vm9 = vmmov %vm5683_vm5 }
 0x667   :  { %3792 = vmatmul.msk.f32.gmra.mxu2 %vm5687_vm7, %v1288_v24  ;;  %vm5695_vm7 = vmmov %vm5683_vm5 }
 0x687   :  { %3973 = vset.pattern.permute.xlu0 %v5688_v19 }
 0x6b2   :  { %v1342_v8 = vpop.f32.mrf.mxu2 }
 0x6b3   :  { %v1366_v0 = vsel %vm4798_vm14, %v1342_v8, 0.0 }
 0x6b4   :  { %v5015_v7 = vadd.f32 %v1366_v0, %v1228_v55 }
 0x6ba   :  { %v1345_v22 = vpop.f32.mrf.mxu2 }
 0x6c2   :  { %v1348_v29 = vpop.f32.mrf.mxu2 }
 0x6ca   :  { %v1351_v38 = vpop.f32.mrf.mxu2 }
 0x6cb   :  { %v1369_v49 = vsel %vm4767_vm3, %v1351_v38, 0.0 }
 0x6cc   :  { %v1377_v12 = vadd.f32 %v1369_v49, %v4944_v52  ;;  %v1427_v52 = vpop.trf.xlu0 }
 0x6d2   :  { %v1354_v20 = vpop.f32.mrf.mxu2 }
 0x6d3   :  { %v1370_v1 = vsel %vm4755_vm2, %v1354_v20, 0.0 }
 0x6d4   :  { %v5001_v5 = vadd.f32 %v1370_v1, %v4934_v50 }
 0x6da   :  { %v1357_v23 = vpop.f32.mrf.mxu2 }
 0x6db   :  { %v1371_v16 = vsel %vm4747_vm1, %v1357_v23, 0.0 }
 0x6dc   :  { %v1379_v54 = vadd.f32 %v1371_v16, %v4927_v60  ;;  %v1551_v16 = vperm.slane %v4631_v26, 2 }
 0x6e2   :  { %v1360_v43 = vpop.f32.mrf.mxu2 }
 0x6e3   :  { %v1372_v21 = vsel %vm4739_vm10, %v1360_v43, 0.0 }
 0x6e4   :  { %v1380_v35 = vadd.f32 %v1372_v21, %v4920_v45  ;;  %v1367_v45 = vsel %vm4788_vm8, %v1345_v22, 0.0 }
 0x6e5   :  { %v5013_v50 = vadd.f32 %v1367_v45, %v4955_v61 }
 0x6ea   :  { %v1363_v18 = vpop.f32.mrf.mxu2 }
 0x6eb   :  { %v1373_v63 = vsel %vm4743_vm11, %v1363_v18, 0.0 }
 0x6ec   :  { %v1381_v6 = vadd.f32 %v1373_v63, %v4915_v15  ;;  %v1368_v15 = vsel %vm4778_vm6, %v1348_v29, 0.0 }
 0x6ed   :  { %v1376_v60 = vadd.f32 %v1368_v15, %v4950_v4  ;;  %v1428_v4 = vpop.trf.xlu0 }
 0x6ee   :  { %1393 = vmatpush.msrb.mxu0 %v1381_v6 }
 0x6f0   :  { %1394 = vmatpush.msrb.mxu0 %v1380_v35 }
 0x6f2   :  { %1395 = vmatpush.msrb.mxu0 %v1379_v54 }
 0x6f4   :  { %1396 = vmatpush.msrb.mxu0 %v5001_v5 }
 0x6f5   :  { %v1429_v9 = vpop.trf.xlu0 }
 0x6f6   :  { %1397 = vmatpush.msrb.mxu0 %v1377_v12 }
 0x6f8   :  { %1398 = vmatpush.msrb.mxu0 %v1376_v60 }
 0x6fa   :  { %1399 = vmatpush.msrb.mxu0 %v5013_v50 }
 0x6fc   :  { %1400 = vmatpush.msrb.mxu0 %v5015_v7 }
 0x6fd   :  { %3793 = vmatmul.msk.f32.vlgmr.msrb.gmra.mxu0 %vm5689_vm0, %v1382_v62  ;;  %v1430_v28 = vpop.trf.xlu0  ;;  %vm5696_vm0 = vmmov %vm5683_vm5 }
 0x6fe   :  { %vm5697_vm14 = vmmov %vm5696_vm0 }
 0x6ff   :  { %vm5698_vm8 = vmmov %vm5696_vm0 }
 0x705   :  { %v1431_v33 = vpop.trf.xlu0 }
 0x70d   :  { %v1432_v24 = vpop.trf.xlu0 }
 0x715   :  { %v1433_v62 = vpop.trf.xlu0 }
 0x71d   :  { %v1434_v8 = vpop.trf.xlu0 }
 0x77a   :  { %v1402_v37 = vpop.f32.mrf.mxu0 }
 0x77b   :  { %v1406_v59 = vrot.slane %v1402_v37, 7 }
 0x77d   :  { %v1408_v61 = vsub.f32 %v4855_v30, %v1406_v59 }
 0x77f   :  { %v1409_v55 = vmul.f32 %v1408_v61, %v4868_v48 }
 0x781   :  { %v1444_v19 = vrot.slane %v1409_v55, 1 }
 0x783   :  { %3794 = vmatpush.msk.msra.mxu0 %vm5690_vm4, %v1444_v19  ;;  %3934 = vmatpush.msk.msra.mxu3 %vm5691_vm13, %v1444_v19  ;;  %vm5701_vm4 = vcmask 523264  }
 0x784   :  { %3795 = vmatmul.msk.f32.vlgmr.msra.gmra.mxu0 %vm5683_vm5, %v1427_v52  ;;  %3800 = vmatmul.msk.f32.vlgmr.msra.gmra.mxu3 %vm5692_vm12, %v1432_v24  ;;  %vm5703_vm13 = vmmov %vm5701_vm4  ;;  %vm5704_vm5 = vcmask 1040384  }
 0x785   :  { %vm5705_vm12 = vmmov %vm5696_vm0 }
 0x78c   :  { %3796 = vmatmul.msk.f32.gmra.mxu0 %vm5693_vm15, %v1428_v4  ;;  %3801 = vmatmul.msk.f32.gmra.mxu3 %vm5694_vm9, %v1433_v62  ;;  %vm5706_vm15 = vmmov %vm5696_vm0 }
 0x78d   :  { %vm5707_vm9 = vmmov %vm5696_vm0 }
 0x794   :  { %3797 = vmatmul.msk.f32.gmra.mxu0 %vm5695_vm7, %v1429_v9  ;;  %3802 = vmatmul.msk.f32.gmra.mxu3 %vm5696_vm0, %v1434_v8  ;;  %vm5708_vm7 = vmmov %vm5696_vm0 }
 0x79c   :  { %3798 = vmatmul.msk.f32.gmra.mxu0 %vm5697_vm14, %v1430_v28  ;;  %vm5700_vm14 = vnez %v5664_v58 }
 0x7a4   :  { %3799 = vmatmul.msk.f32.gmra.mxu0 %vm5698_vm8, %v1431_v33  ;;  %vm5699_vm8 = vnez %v5662_v57 }
 0x801   :  { %v1488_v22 = vpop.f32.mrf.mxu0 }
 0x802   :  { %v1512_v24 = vsel %vm5700_vm14, %v1488_v22, 0.0  ;;  %v1605_v22 = vpop.trf.xlu2 }
 0x803   :  { %v1520_v62 = vadd.f32 %v1512_v24, %v5015_v7 }
 0x805   :  { %v1552_v8 = vmul.f32 %v1551_v16, %v1520_v62 }
 0x807   :  { %v1503_v29 = vpop.f32.mrf.mxu3 }
 0x808   :  { %v1517_v21 = vsel %vm4747_vm1, %v1503_v29, 0.0 }
 0x809   :  { %v1491_v38 = vpop.f32.mrf.mxu0  ;;  %v1525_v45 = vadd.f32 %v1517_v21, %v1379_v54 }
 0x80a   :  { %v1513_v37 = vsel %vm5699_vm8, %v1491_v38, 0.0 }
 0x80b   :  { %v5047_v4 = vmul.f32 %v1551_v16, %v1525_v45  ;;  %v1521_v55 = vadd.f32 %v1513_v37, %v5013_v50  ;;  %v5702_v50 = vrot.slane %v4652_v51, 2 }
 0x80f   :  { %v1506_v20 = vpop.f32.mrf.mxu3 }
 0x810   :  { %v1518_v43 = vsel %vm4739_vm10, %v1506_v20, 0.0  ;;  %v1606_v20 = vpop.trf.xlu2 }
 0x811   :  { %v1494_v23 = vpop.f32.mrf.mxu0  ;;  %v1526_v1 = vadd.f32 %v1518_v43, %v1380_v35 }
 0x813   :  { %v5044_v52 = vmul.f32 %v1551_v16, %v1526_v1 }
 0x817   :  { %v1509_v18 = vpop.f32.mrf.mxu3 }
 0x818   :  { %v1519_v63 = vsel %vm4743_vm11, %v1509_v18, 0.0  ;;  %v1607_v18 = vpop.trf.xlu2 }
 0x819   :  { %v1527_v49 = vadd.f32 %v1519_v63, %v1381_v6  ;;  %v1497_v15 = vpop.f32.mrf.mxu0  ;;  %v1514_v6 = vsel %vm4778_vm6, %v1494_v23, 0.0 }
 0x81a   :  { %v1515_v9 = vsel %vm4767_vm3, %v1497_v15, 0.0  ;;  %v1522_v59 = vadd.f32 %v1514_v6, %v1376_v60  ;;  %v1528_v60 = vrot.slane %v4959_v25, 1 }
 0x81b   :  { %v5041_v0 = vmul.f32 %v1551_v16, %v1527_v49  ;;  %1539 = vmatpush.msrb.mxu3 %v1527_v49  ;;  %v1523_v28 = vadd.f32 %v1515_v9, %v1377_v12 }
 0x81c   :  { %v1554_v12 = vmul.f32 %v1551_v16, %v1522_v59 }
 0x81d   :  { %1540 = vmatpush.msrb.mxu3 %v1526_v1  ;;  %1571 = vmatpush.msra.mxu1 %v5041_v0  ;;  %v1555_v19 = vmul.f32 %v1551_v16, %v1523_v28 }
 0x81f   :  { %1541 = vmatpush.msrb.mxu3 %v1525_v45  ;;  %1572 = vmatpush.msra.mxu1 %v5044_v52 }
 0x820   :  { %v1608_v21 = vpop.trf.xlu2 }
 0x821   :  { %v1500_v35 = vpop.f32.mrf.mxu0  ;;  %1573 = vmatpush.msra.mxu1 %v5047_v4 }
 0x822   :  { %v1516_v54 = vsel %vm4755_vm2, %v1500_v35, 0.0 }
 0x823   :  { %v1524_v33 = vadd.f32 %v1516_v54, %v5001_v5  ;;  %v1553_v5 = vmul.f32 %v1551_v16, %v1521_v55 }
 0x825   :  { %1542 = vmatpush.msrb.mxu3 %v1524_v33  ;;  %v1556_v61 = vmul.f32 %v1551_v16, %v1524_v33 }
 0x827   :  { %1543 = vmatpush.msrb.mxu3 %v1523_v28  ;;  %1574 = vmatpush.msra.mxu1 %v1556_v61 }
 0x828   :  { %v1609_v63 = vpop.trf.xlu2 }
 0x829   :  { %1544 = vmatpush.msrb.mxu3 %v1522_v59  ;;  %1575 = vmatpush.msra.mxu1 %v1555_v19 }
 0x82b   :  { %1545 = vmatpush.msrb.mxu3 %v1521_v55  ;;  %1576 = vmatpush.msra.mxu1 %v1554_v12 }
 0x82d   :  { %1546 = vmatpush.msrb.mxu3 %v1520_v62  ;;  %1577 = vmatpush.msra.mxu1 %v1553_v5 }
 0x82e   :  { %3803 = vmatmul.msk.f32.vlgmr.msrb.gmra.mxu3 %vm5701_vm4, %v1528_v60  ;;  %vm5709_vm4 = vmmov %vm5696_vm0 }
 0x82f   :  { %1578 = vmatpush.msra.mxu1 %v1552_v8 }
 0x830   :  { %3804 = vmatmul.msk.f32.vlgmr.msra.gmra.mxu1 %vm5703_vm13, %v5702_v50  ;;  %v1610_v16 = vpop.trf.xlu2  ;;  %vm5710_vm13 = vmmov %vm5696_vm0 }
 0x838   :  { %v1611_v1 = vpop.trf.xlu2 }
 0x840   :  { %v1612_v49 = vpop.trf.xlu2 }
 0x8ad   :  { %v1580_v7 = vpop.f32.mrf.mxu1 }
 0x8ae   :  { %v1584_v29 = vrot.slane %v1580_v7, 6 }
 0x8b0   :  { %v1586_v38 = vsub.f32 %v4672_v2, %v1584_v29 }
 0x8b1   :  { %v5079_v15 = vpop.f32.mrf.mxu3 }
 0x8b2   :  { %v1587_v23 = vmul.f32 %v1586_v38, %v4679_v10 }
 0x8b4   :  { %v1622_v43 = vrot.slane %v1587_v23, 2 }
 0x8b6   :  { %3805 = vmatpush.msk.msra.mxu3 %vm5704_vm5, %v1622_v43  ;;  %vm5711_vm5 = vmmov %vm5696_vm0 }
 0x8b7   :  { %3806 = vmatmul.msk.f32.vlgmr.msra.gmra.mxu3 %vm5705_vm12, %v1605_v22  ;;  %vm5713_vm12 = vcmask 523264  }
 0x8bf   :  { %3807 = vmatmul.msk.f32.gmra.mxu3 %vm5706_vm15, %v1606_v20  ;;  %vm5714_vm15 = vcmask 1040384  }
 0x8c7   :  { %3808 = vmatmul.msk.f32.gmra.mxu3 %vm5707_vm9, %v1607_v18  ;;  %vm5715_vm9 = vmmov %vm5696_vm0 }
 0x8cf   :  { %3809 = vmatmul.msk.f32.gmra.mxu3 %vm5708_vm7, %v1608_v21  ;;  %vm5716_vm7 = vmmov %vm5696_vm0 }
 0x8d7   :  { %3810 = vmatmul.msk.f32.gmra.mxu3 %vm5696_vm0, %v1609_v63 }
 0x8df   :  { %3811 = vmatmul.msk.f32.gmra.mxu3 %vm5709_vm4, %v1610_v16  ;;  %vm5717_vm4 = vmmov %vm5696_vm0 }
 0x8e7   :  { %3812 = vmatmul.msk.f32.gmra.mxu3 %vm5710_vm13, %v1611_v1  ;;  %vm5718_vm13 = vmmov %vm5696_vm0 }
 0x8ef   :  { %3813 = vmatmul.msk.f32.gmra.mxu3 %vm5711_vm5, %v1612_v49  ;;  %vm5719_vm5 = vmmov %vm5696_vm0 }
 0x93a   :  { %v1666_v45 = vpop.f32.mrf.mxu3 }
 0x93b   :  { %v1690_v23 = vsel %vm5700_vm14, %v1666_v45, 0.0 }
 0x93c   :  { %v5100_v43 = vadd.f32 %v1690_v23, %v1552_v8 }
 0x942   :  { %v1669_v9 = vpop.f32.mrf.mxu3 }
 0x94a   :  { %v1672_v35 = vpop.f32.mrf.mxu3 }
 0x952   :  { %v1675_v6 = vpop.f32.mrf.mxu3 }
 0x953   :  { %v1693_v7 = vsel %vm4767_vm3, %v1675_v6, 0.0 }
 0x954   :  { %v1701_v38 = vadd.f32 %v1693_v7, %v1555_v19  ;;  %v1751_v19 = vpop.trf.xlu2 }
 0x95a   :  { %v1678_v54 = vpop.f32.mrf.mxu3 }
 0x95b   :  { %v1694_v50 = vsel %vm4755_vm2, %v1678_v54, 0.0 }
 0x95c   :  { %v1702_v29 = vadd.f32 %v1694_v50, %v1556_v61  ;;  %v5712_v61 = vrot.slane %v4689_v13, 2  ;;  %v1752_v63 = vpop.trf.xlu2 }
 0x962   :  { %v1681_v28 = vpop.f32.mrf.mxu3 }
 0x963   :  { %v1695_v62 = vsel %vm4747_vm1, %v1681_v28, 0.0 }
 0x964   :  { %v1703_v22 = vadd.f32 %v1695_v62, %v5047_v4 }
 0x96a   :  { %v1684_v33 = vpop.f32.mrf.mxu3 }
 0x96b   :  { %v1696_v59 = vsel %vm4739_vm10, %v1684_v33, 0.0 }
 0x96c   :  { %v1704_v60 = vadd.f32 %v1696_v59, %v5044_v52  ;;  %v1691_v52 = vsel %vm5699_vm8, %v1669_v9, 0.0 }
 0x96d   :  { %v1699_v4 = vadd.f32 %v1691_v52, %v1553_v5  ;;  %v1753_v5 = vpop.trf.xlu2  ;;  %v1875_v52 = vperm.slane %v4631_v26, 3 }
 0x972   :  { %v1687_v37 = vpop.f32.mrf.mxu3 }
 0x973   :  { %v1697_v24 = vsel %vm4743_vm11, %v1687_v37, 0.0 }
 0x974   :  { %v1705_v55 = vadd.f32 %v1697_v24, %v5041_v0  ;;  %v1692_v0 = vsel %vm4778_vm6, %v1672_v35, 0.0 }
 0x975   :  { %v1700_v20 = vadd.f32 %v1692_v0, %v1554_v12  ;;  %v1754_v8 = vpop.trf.xlu2 }
 0x976   :  { %1717 = vmatpush.msrb.mxu2 %v1705_v55 }
 0x978   :  { %1718 = vmatpush.msrb.mxu2 %v1704_v60 }
 0x97a   :  { %1719 = vmatpush.msrb.mxu2 %v1703_v22 }
 0x97c   :  { %1720 = vmatpush.msrb.mxu2 %v1702_v29 }
 0x97d   :  { %v1755_v49 = vpop.trf.xlu2 }
 0x97e   :  { %1721 = vmatpush.msrb.mxu2 %v1701_v38 }
 0x980   :  { %1722 = vmatpush.msrb.mxu2 %v1700_v20 }
 0x982   :  { %1723 = vmatpush.msrb.mxu2 %v1699_v4 }
 0x984   :  { %1724 = vmatpush.msrb.mxu2 %v5100_v43 }
 0x985   :  { %3814 = vmatmul.msk.f32.vlgmr.msrb.gmra.mxu2 %vm5713_vm12, %v5712_v61  ;;  %v1756_v45 = vpop.trf.xlu2  ;;  %vm5720_vm12 = vmmov %vm5696_vm0 }
 0x98d   :  { %v1757_v9 = vpop.trf.xlu2 }
 0x995   :  { %v1758_v35 = vpop.trf.xlu2 }
 0xa08   :  { %v1726_v18 = vpop.f32.mrf.mxu2 }
 0xa09   :  { %v1730_v21 = vrot.slane %v1726_v18, 6 }
 0xa0b   :  { %v1732_v12 = vsub.f32 %v4855_v30, %v1730_v21 }
 0xa0d   :  { %v1733_v16 = vmul.f32 %v1732_v12, %v4868_v48 }
 0xa0f   :  { %v1768_v1 = vrot.slane %v1733_v16, 2 }
 0xa11   :  { %3815 = vmatpush.msk.msrb.mxu1 %vm5714_vm15, %v1768_v1  ;;  %vm5721_vm15 = vmmov %vm5696_vm0 }
 0xa12   :  { %3816 = vmatmul.msk.f32.vlgmr.msrb.gmra.mxu1 %vm5715_vm9, %v1751_v19  ;;  %vm5722_vm9 = vcmask 523264  }
 0xa1a   :  { %3817 = vmatmul.msk.f32.gmra.mxu1 %vm5716_vm7, %v1752_v63  ;;  %vm5723_vm7 = vmmov %vm5722_vm9 }
 0xa22   :  { %3818 = vmatmul.msk.f32.gmra.mxu1 %vm5696_vm0, %v1753_v5  ;;  %vm5724_vm0 = vcmask 1040384  }
 0xa2a   :  { %3819 = vmatmul.msk.f32.gmra.mxu1 %vm5717_vm4, %v1754_v8 }
 0xa32   :  { %3820 = vmatmul.msk.f32.gmra.mxu1 %vm5718_vm13, %v1755_v49  ;;  %vm5725_vm13 = vmmov %vm5717_vm4 }
 0xa3a   :  { %3821 = vmatmul.msk.f32.gmra.mxu1 %vm5719_vm5, %v1756_v45  ;;  %vm5726_vm5 = vmmov %vm5717_vm4 }
 0xa42   :  { %3822 = vmatmul.msk.f32.gmra.mxu1 %vm5720_vm12, %v1757_v9  ;;  %vm5727_vm12 = vmmov %vm5717_vm4 }
 0xa4a   :  { %3823 = vmatmul.msk.f32.gmra.mxu1 %vm5721_vm15, %v1758_v35  ;;  %vm5728_vm15 = vmmov %vm5717_vm4 }
 0xa8f   :  { %v1812_v6 = vpop.f32.mrf.mxu1 }
 0xa90   :  { %v1836_v8 = vsel %vm5700_vm14, %v1812_v6, 0.0 }
 0xa91   :  { %v1844_v45 = vadd.f32 %v1836_v8, %v5100_v43 }
 0xa97   :  { %v1815_v54 = vpop.f32.mrf.mxu1 }
 0xa9f   :  { %v1818_v28 = vpop.f32.mrf.mxu1 }
 0xaa7   :  { %v1821_v33 = vpop.f32.mrf.mxu1 }
 0xaa8   :  { %v1839_v12 = vsel %vm4767_vm3, %v1821_v33, 0.0 }
 0xaaf   :  { %v1824_v37 = vpop.f32.mrf.mxu1 }
 0xab0   :  { %v1840_v19 = vsel %vm4755_vm2, %v1824_v37, 0.0 }
 0xab1   :  { %v1848_v63 = vadd.f32 %v1840_v19, %v1702_v29 }
 0xab3   :  { %v1880_v29 = vmul.f32 %v1875_v52, %v1848_v63 }
 0xab7   :  { %v1827_v59 = vpop.f32.mrf.mxu1 }
 0xab8   :  { %v1841_v7 = vsel %vm4747_vm1, %v1827_v59, 0.0 }
 0xab9   :  { %v1849_v18 = vadd.f32 %v1841_v7, %v1703_v22  ;;  %v1837_v22 = vsel %vm5699_vm8, %v1815_v54, 0.0  ;;  %v1876_v54 = vmul.f32 %v1875_v52, %v1844_v45 }
 0xaba   :  { %v1845_v49 = vadd.f32 %v1837_v22, %v1699_v4  ;;  %v1929_v4 = vpop.trf.xlu0 }
 0xabb   :  { %v5135_v1 = vmul.f32 %v1875_v52, %v1849_v18 }
 0xabc   :  { %v1877_v35 = vmul.f32 %v1875_v52, %v1845_v49 }
 0xabf   :  { %v1830_v24 = vpop.f32.mrf.mxu1 }
 0xac0   :  { %v1842_v62 = vsel %vm4739_vm10, %v1830_v24, 0.0 }
 0xac1   :  { %v1850_v23 = vadd.f32 %v1842_v62, %v1704_v60  ;;  %v1838_v60 = vsel %vm4778_vm6, %v1818_v28, 0.0 }
 0xac2   :  { %v1846_v5 = vadd.f32 %v1838_v60, %v1700_v20  ;;  %v1852_v20 = vrot.slane %v4959_v25, 2  ;;  %v1930_v33 = vpop.trf.xlu0 }
 0xac3   :  { %v5130_v16 = vmul.f32 %v1875_v52, %v1850_v23 }
 0xac4   :  { %v1878_v9 = vmul.f32 %v1875_v52, %v1846_v5 }
 0xac7   :  { %v1833_v50 = vpop.f32.mrf.mxu1 }
 0xac8   :  { %v1843_v0 = vsel %vm4743_vm11, %v1833_v50, 0.0 }
 0xac9   :  { %v1851_v61 = vadd.f32 %v1843_v0, %v1705_v55  ;;  %v1847_v55 = vadd.f32 %v1839_v12, %v1701_v38 }
 0xaca   :  { %v1931_v24 = vpop.trf.xlu0 }
 0xacb   :  { %v5126_v21 = vmul.f32 %v1875_v52, %v1851_v61  ;;  %1863 = vmatpush.msra.mxu2 %v1851_v61  ;;  %v1879_v38 = vmul.f32 %v1875_v52, %v1847_v55 }
 0xacd   :  { %1864 = vmatpush.msra.mxu2 %v1850_v23  ;;  %1895 = vmatpush.msrb.mxu0 %v5126_v21 }
 0xacf   :  { %1865 = vmatpush.msra.mxu2 %v1849_v18  ;;  %1896 = vmatpush.msrb.mxu0 %v5130_v16 }
 0xad1   :  { %1866 = vmatpush.msra.mxu2 %v1848_v63  ;;  %1897 = vmatpush.msrb.mxu0 %v5135_v1 }
 0xad2   :  { %v1932_v62 = vpop.trf.xlu0 }
 0xad3   :  { %1867 = vmatpush.msra.mxu2 %v1847_v55  ;;  %1898 = vmatpush.msrb.mxu0 %v1880_v29 }
 0xad5   :  { %1868 = vmatpush.msra.mxu2 %v1846_v5  ;;  %1899 = vmatpush.msrb.mxu0 %v1879_v38 }
 0xad7   :  { %1869 = vmatpush.msra.mxu2 %v1845_v49  ;;  %1900 = vmatpush.msrb.mxu0 %v1878_v9 }
 0xad9   :  { %1870 = vmatpush.msra.mxu2 %v1844_v45  ;;  %1901 = vmatpush.msrb.mxu0 %v1877_v35 }
 0xada   :  { %3824 = vmatmul.msk.f32.vlgmr.msra.gmra.mxu2 %vm5722_vm9, %v1852_v20  ;;  %vm5729_vm9 = vmmov %vm5717_vm4 }
 0xadb   :  { %1902 = vmatpush.msrb.mxu0 %v1876_v54 }
 0xadc   :  { %3825 = vmatmul.msk.f32.vlgmr.msrb.gmra.mxu0 %vm5723_vm7, %v1884_v36  ;;  %v1933_v36 = vpop.trf.xlu0  ;;  %vm5730_vm7 = vmmov %vm5717_vm4 }
 0xae4   :  { %v1934_v50 = vpop.trf.xlu0 }
 0xaec   :  { %v1935_v7 = vpop.trf.xlu0 }
 0xaf4   :  { %v1936_v0 = vpop.trf.xlu0 }
 0xb59   :  { %v1904_v43 = vpop.f32.mrf.mxu0 }
 0xb5a   :  { %v1908_v6 = vrot.slane %v1904_v43, 5 }
 0xb5c   :  { %v1910_v28 = vsub.f32 %v4672_v2, %v1908_v6 }
 0xb5d   :  { %v5160_v52 = vpop.f32.mrf.mxu2 }
 0xb5e   :  { %v1911_v37 = vmul.f32 %v1910_v28, %v4679_v10 }
 0xb60   :  { %v1946_v59 = vrot.slane %v1911_v37, 3 }
 0xb62   :  { %3826 = vmatpush.msk.msrb.mxu2 %vm5724_vm0, %v1946_v59  ;;  %vm5731_vm0 = vmmov %vm5717_vm4 }
 0xb63   :  { %3827 = vmatmul.msk.f32.vlgmr.msrb.gmra.mxu2 %vm5717_vm4, %v1929_v4  ;;  %vm5733_vm4 = vcmask 523264  }
 0xb6b   :  { %3828 = vmatmul.msk.f32.gmra.mxu2 %vm5725_vm13, %v1930_v33  ;;  %vm5734_vm13 = vcmask 1040384  }
 0xb73   :  { %3829 = vmatmul.msk.f32.gmra.mxu2 %vm5726_vm5, %v1931_v24  ;;  %vm5735_vm5 = vmmov %vm5731_vm0 }
 0xb7b   :  { %3830 = vmatmul.msk.f32.gmra.mxu2 %vm5727_vm12, %v1932_v62  ;;  %vm5736_vm12 = vmmov %vm5731_vm0 }
 0xb83   :  { %3831 = vmatmul.msk.f32.gmra.mxu2 %vm5728_vm15, %v1933_v36  ;;  %vm5737_vm15 = vmmov %vm5731_vm0 }
 0xb8b   :  { %3832 = vmatmul.msk.f32.gmra.mxu2 %vm5729_vm9, %v1934_v50  ;;  %vm5738_vm9 = vmmov %vm5731_vm0 }
 0xb93   :  { %3833 = vmatmul.msk.f32.gmra.mxu2 %vm5730_vm7, %v1935_v7  ;;  %vm5739_vm7 = vmmov %vm5731_vm0 }
 0xb9b   :  { %3834 = vmatmul.msk.f32.gmra.mxu2 %vm5731_vm0, %v1936_v0 }
 0xbe6   :  { %v1990_v23 = vpop.f32.mrf.mxu2 }
 0xbe7   :  { %v2014_v37 = vsel %vm5700_vm14, %v1990_v23, 0.0 }
 0xbe8   :  { %v5181_v59 = vadd.f32 %v2014_v37, %v1876_v54 }
 0xbee   :  { %v1993_v61 = vpop.f32.mrf.mxu2 }
 0xbf6   :  { %v1996_v19 = vpop.f32.mrf.mxu2 }
 0xbfe   :  { %v1999_v18 = vpop.f32.mrf.mxu2 }
 0xbff   :  { %v2017_v43 = vsel %vm4767_vm3, %v1999_v18, 0.0 }
 0xc00   :  { %v2025_v28 = vadd.f32 %v2017_v43, %v1879_v38  ;;  %v2075_v38 = vpop.trf.xlu1 }
 0xc06   :  { %v2002_v12 = vpop.f32.mrf.mxu2 }
 0xc07   :  { %v2018_v20 = vsel %vm4755_vm2, %v2002_v12, 0.0 }
 0xc08   :  { %v2026_v6 = vadd.f32 %v2018_v20, %v1880_v29  ;;  %v5732_v29 = vrot.slane %v4689_v13, 3  ;;  %v2076_v36 = vpop.trf.xlu1 }
 0xc0e   :  { %v2005_v63 = vpop.f32.mrf.mxu2 }
 0xc0f   :  { %v2019_v49 = vsel %vm4747_vm1, %v2005_v63, 0.0 }
 0xc10   :  { %v2027_v4 = vadd.f32 %v2019_v49, %v5135_v1 }
 0xc16   :  { %v2008_v60 = vpop.f32.mrf.mxu2 }
 0xc17   :  { %v2020_v22 = vsel %vm4739_vm10, %v2008_v60, 0.0 }
 0xc18   :  { %v2028_v45 = vadd.f32 %v2020_v22, %v5130_v16  ;;  %v2015_v16 = vsel %vm5699_vm8, %v1993_v61, 0.0 }
 0xc19   :  { %v2023_v1 = vadd.f32 %v2015_v16, %v1877_v35  ;;  %v2077_v35 = vpop.trf.xlu1  ;;  %v2199_v16 = vperm.slane %v4631_v26, 4 }
 0xc1e   :  { %v2011_v55 = vpop.f32.mrf.mxu2 }
 0xc1f   :  { %v2021_v5 = vsel %vm4743_vm11, %v2011_v55, 0.0 }
 0xc20   :  { %v2029_v8 = vadd.f32 %v2021_v5, %v5126_v21  ;;  %v2016_v21 = vsel %vm4778_vm6, %v1996_v19, 0.0 }
 0xc21   :  { %v2024_v33 = vadd.f32 %v2016_v21, %v1878_v9  ;;  %v2078_v54 = vpop.trf.xlu1 }
 0xc22   :  { %2041 = vmatpush.msra.mxu0 %v2029_v8 }
 0xc24   :  { %2042 = vmatpush.msra.mxu0 %v2028_v45 }
 0xc26   :  { %2043 = vmatpush.msra.mxu0 %v2027_v4 }
 0xc28   :  { %2044 = vmatpush.msra.mxu0 %v2026_v6 }
 0xc29   :  { %v2079_v0 = vpop.trf.xlu1 }
 0xc2a   :  { %2045 = vmatpush.msra.mxu0 %v2025_v28 }
 0xc2c   :  { %2046 = vmatpush.msra.mxu0 %v2024_v33 }
 0xc2e   :  { %2047 = vmatpush.msra.mxu0 %v2023_v1 }
 0xc30   :  { %2048 = vmatpush.msra.mxu0 %v5181_v59 }
 0xc31   :  { %3835 = vmatmul.msk.f32.vlgmr.msra.gmra.mxu0 %vm5733_vm4, %v5732_v29  ;;  %v2080_v23 = vpop.trf.xlu1  ;;  %vm5740_vm4 = vmmov %vm5731_vm0 }
 0xc39   :  { %v2081_v61 = vpop.trf.xlu1 }
 0xc41   :  { %v2082_v19 = vpop.trf.xlu1 }
 0xcae   :  { %v2050_v24 = vpop.f32.mrf.mxu0 }
 0xcaf   :  { %v2054_v62 = vrot.slane %v2050_v24, 5 }
 0xcb1   :  { %v2056_v9 = vsub.f32 %v4855_v30, %v2054_v62 }
 0xcb3   :  { %v2057_v50 = vmul.f32 %v2056_v9, %v4868_v48 }
 0xcb5   :  { %v2092_v7 = vrot.slane %v2057_v50, 3 }
 0xcb7   :  { %3836 = vmatpush.msk.msrb.mxu0 %vm5734_vm13, %v2092_v7  ;;  %vm5741_vm13 = vmmov %vm5731_vm0 }
 0xcb8   :  { %3837 = vmatmul.msk.f32.vlgmr.msrb.gmra.mxu0 %vm5735_vm5, %v2075_v38  ;;  %vm5742_vm5 = vcmask 523264  }
 0xcc0   :  { %3838 = vmatmul.msk.f32.gmra.mxu0 %vm5736_vm12, %v2076_v36  ;;  %vm5744_vm12 = vmmov %vm5742_vm5 }
 0xcc8   :  { %3839 = vmatmul.msk.f32.gmra.mxu0 %vm5737_vm15, %v2077_v35  ;;  %vm5745_vm15 = vcmask 1040384  }
 0xcd0   :  { %3840 = vmatmul.msk.f32.gmra.mxu0 %vm5738_vm9, %v2078_v54  ;;  %vm5746_vm9 = vmmov %vm5731_vm0 }
 0xcd8   :  { %3841 = vmatmul.msk.f32.gmra.mxu0 %vm5739_vm7, %v2079_v0  ;;  %vm5747_vm7 = vmmov %vm5731_vm0 }
 0xce0   :  { %3842 = vmatmul.msk.f32.gmra.mxu0 %vm5731_vm0, %v2080_v23 }
 0xce8   :  { %3843 = vmatmul.msk.f32.gmra.mxu0 %vm5740_vm4, %v2081_v61  ;;  %vm5748_vm4 = vmmov %vm5731_vm0 }
 0xcf0   :  { %3844 = vmatmul.msk.f32.gmra.mxu0 %vm5741_vm13, %v2082_v19  ;;  %v2176_v19 = vrot.slane %v4959_v25, 3  ;;  %vm5749_vm13 = vmmov %vm5731_vm0 }
 0xd35   :  { %v2136_v18 = vpop.f32.mrf.mxu0 }
 0xd3d   :  { %v2139_v12 = vpop.f32.mrf.mxu0 }
 0xd45   :  { %v2142_v63 = vpop.f32.mrf.mxu0 }
 0xd4d   :  { %v2145_v60 = vpop.f32.mrf.mxu0 }
 0xd4e   :  { %v2163_v9 = vsel %vm4767_vm3, %v2145_v60, 0.0 }
 0xd55   :  { %v2148_v55 = vpop.f32.mrf.mxu0 }
 0xd56   :  { %v2164_v38 = vsel %vm4755_vm2, %v2148_v55, 0.0 }
 0xd57   :  { %v2172_v36 = vadd.f32 %v2164_v38, %v2026_v6  ;;  %v2160_v6 = vsel %vm5700_vm14, %v2136_v18, 0.0  ;;  %v2253_v18 = vpop.trf.xlu2 }
 0xd59   :  { %v5221_v54 = vmul.f32 %v2199_v16, %v2172_v36 }
 0xd5d   :  { %v2151_v22 = vpop.f32.mrf.mxu0 }
 0xd5e   :  { %v2165_v43 = vsel %vm4747_vm1, %v2151_v22, 0.0 }
 0xd5f   :  { %v2173_v24 = vadd.f32 %v2165_v43, %v2027_v4  ;;  %v2161_v4 = vsel %vm5699_vm8, %v2139_v12, 0.0  ;;  %v2254_v55 = vpop.trf.xlu2 }
 0xd60   :  { %v2169_v0 = vadd.f32 %v2161_v4, %v2023_v1  ;;  %v5743_v1 = vrot.slane %v4652_v51, 4 }
 0xd61   :  { %v5216_v7 = vmul.f32 %v2199_v16, %v2173_v24 }
 0xd65   :  { %v2154_v5 = vpop.f32.mrf.mxu0 }
 0xd66   :  { %v2166_v49 = vsel %vm4739_vm10, %v2154_v5, 0.0 }
 0xd67   :  { %v2174_v37 = vadd.f32 %v2166_v49, %v2028_v45  ;;  %v2162_v45 = vsel %vm4778_vm6, %v2142_v63, 0.0  ;;  %v2255_v49 = vpop.trf.xlu2 }
 0xd68   :  { %v2170_v35 = vadd.f32 %v2162_v45, %v2024_v33  ;;  %v2201_v33 = vmul.f32 %v2199_v16, %v2169_v0 }
 0xd69   :  { %v5211_v50 = vmul.f32 %v2199_v16, %v2174_v37 }
 0xd6a   :  { %v2202_v61 = vmul.f32 %v2199_v16, %v2170_v35 }
 0xd6d   :  { %v2157_v20 = vpop.f32.mrf.mxu0 }
 0xd6e   :  { %v2167_v21 = vsel %vm4743_vm11, %v2157_v20, 0.0 }
 0xd6f   :  { %v2175_v29 = vadd.f32 %v2167_v21, %v2029_v8  ;;  %v2171_v8 = vadd.f32 %v2163_v9, %v2025_v28  ;;  %v2168_v28 = vadd.f32 %v2160_v6, %v5181_v59  ;;  %v2256_v20 = vpop.trf.xlu2 }
 0xd71   :  { %v5207_v62 = vmul.f32 %v2199_v16, %v2175_v29  ;;  %2187 = vmatpush.msrb.mxu3 %v2175_v29  ;;  %v2203_v23 = vmul.f32 %v2199_v16, %v2171_v8  ;;  %v2200_v12 = vmul.f32 %v2199_v16, %v2168_v28 }
 0xd73   :  { %2188 = vmatpush.msrb.mxu3 %v2174_v37  ;;  %2219 = vmatpush.msra.mxu1 %v5207_v62 }
 0xd75   :  { %2189 = vmatpush.msrb.mxu3 %v2173_v24  ;;  %2220 = vmatpush.msra.mxu1 %v5211_v50 }
 0xd77   :  { %2190 = vmatpush.msrb.mxu3 %v2172_v36  ;;  %2221 = vmatpush.msra.mxu1 %v5216_v7  ;;  %v2257_v43 = vpop.trf.xlu2 }
 0xd79   :  { %2191 = vmatpush.msrb.mxu3 %v2171_v8  ;;  %2222 = vmatpush.msra.mxu1 %v5221_v54 }
 0xd7b   :  { %2192 = vmatpush.msrb.mxu3 %v2170_v35  ;;  %2223 = vmatpush.msra.mxu1 %v2203_v23 }
 0xd7d   :  { %2193 = vmatpush.msrb.mxu3 %v2169_v0  ;;  %2224 = vmatpush.msra.mxu1 %v2202_v61 }
 0xd7f   :  { %2194 = vmatpush.msrb.mxu3 %v2168_v28  ;;  %2225 = vmatpush.msra.mxu1 %v2201_v33  ;;  %v2258_v21 = vpop.trf.xlu2 }
 0xd80   :  { %3845 = vmatmul.msk.f32.vlgmr.msrb.gmra.mxu3 %vm5742_vm5, %v2176_v19  ;;  %vm5750_vm5 = vmmov %vm5731_vm0 }
 0xd81   :  { %2226 = vmatpush.msra.mxu1 %v2200_v12 }
 0xd82   :  { %3846 = vmatmul.msk.f32.vlgmr.msra.gmra.mxu1 %vm5744_vm12, %v5743_v1  ;;  %vm5751_vm12 = vmmov %vm5731_vm0 }
 0xd87   :  { %v2259_v16 = vpop.trf.xlu2 }
 0xd8f   :  { %v2260_v37 = vpop.trf.xlu2 }
 0xdff   :  { %v2228_v59 = vpop.f32.mrf.mxu1 }
 0xe00   :  { %v2232_v63 = vrot.slane %v2228_v59, 4 }
 0xe02   :  { %v2234_v60 = vsub.f32 %v4672_v2, %v2232_v63 }
 0xe03   :  { %v5244_v29 = vpop.f32.mrf.mxu3 }
 0xe04   :  { %v2235_v22 = vmul.f32 %v2234_v60, %v4679_v10 }
 0xe06   :  { %v2270_v5 = vrot.slane %v2235_v22, 4 }
 0xe08   :  { %3847 = vmatpush.msk.msra.mxu3 %vm5745_vm15, %v2270_v5  ;;  %vm5752_vm15 = vmmov %vm5731_vm0 }
 0xe09   :  { %3848 = vmatmul.msk.f32.vlgmr.msra.gmra.mxu3 %vm5746_vm9, %v2253_v18  ;;  %vm5753_vm9 = vcmask 523264  }
 0xe11   :  { %3849 = vmatmul.msk.f32.gmra.mxu3 %vm5747_vm7, %v2254_v55  ;;  %vm5754_vm7 = vcmask 1040384  }
 0xe19   :  { %3850 = vmatmul.msk.f32.gmra.mxu3 %vm5731_vm0, %v2255_v49 }
 0xe21   :  { %3851 = vmatmul.msk.f32.gmra.mxu3 %vm5748_vm4, %v2256_v20  ;;  %vm5755_vm4 = vmmov %vm5731_vm0 }
 0xe29   :  { %3852 = vmatmul.msk.f32.gmra.mxu3 %vm5749_vm13, %v2257_v43  ;;  %vm5756_vm13 = vmmov %vm5731_vm0 }
 0xe31   :  { %3853 = vmatmul.msk.f32.gmra.mxu3 %vm5750_vm5, %v2258_v21  ;;  %vm5757_vm5 = vmmov %vm5731_vm0 }
 0xe39   :  { %3854 = vmatmul.msk.f32.gmra.mxu3 %vm5751_vm12, %v2259_v16  ;;  %vm5758_vm12 = vmmov %vm5731_vm0 }
 0xe41   :  { %3855 = vmatmul.msk.f32.gmra.mxu3 %vm5752_vm15, %v2260_v37  ;;  %vm5759_vm15 = vmmov %vm5731_vm0 }
 0xe8c   :  { %v2314_v38 = vpop.f32.mrf.mxu3 }
 0xe94   :  { %v2317_v24 = vpop.f32.mrf.mxu3 }
 0xe9c   :  { %v2320_v9 = vpop.f32.mrf.mxu3 }
 0xea4   :  { %v2323_v36 = vpop.f32.mrf.mxu3 }
 0xea5   :  { %v2341_v63 = vsel %vm4767_vm3, %v2323_v36, 0.0 }
 0xea6   :  { %v2349_v55 = vadd.f32 %v2341_v63, %v2203_v23 }
 0xeac   :  { %v2326_v45 = vpop.f32.mrf.mxu3 }
 0xead   :  { %v2342_v18 = vsel %vm4755_vm2, %v2326_v45, 0.0  ;;  %v2523_v45 = vperm.slane %v4631_v26, 5 }
 0xeae   :  { %v2350_v60 = vadd.f32 %v2342_v18, %v5221_v54  ;;  %v2399_v54 = vpop.trf.xlu0 }
 0xeb4   :  { %v2329_v8 = vpop.f32.mrf.mxu3 }
 0xeb5   :  { %v2343_v19 = vsel %vm4747_vm1, %v2329_v8, 0.0 }
 0xeb6   :  { %v2351_v59 = vadd.f32 %v2343_v19, %v5216_v7  ;;  %v2338_v7 = vsel %vm5700_vm14, %v2314_v38, 0.0  ;;  %v2400_v21 = vpop.trf.xlu0 }
 0xeb7   :  { %v2346_v49 = vadd.f32 %v2338_v7, %v2200_v12 }
 0xebc   :  { %v2332_v4 = vpop.f32.mrf.mxu3 }
 0xebd   :  { %v2344_v6 = vsel %vm4739_vm10, %v2332_v4, 0.0 }
 0xebe   :  { %v2352_v1 = vadd.f32 %v2344_v6, %v5211_v50  ;;  %v2339_v50 = vsel %vm5699_vm8, %v2317_v24, 0.0 }
 0xebf   :  { %v2347_v5 = vadd.f32 %v2339_v50, %v2201_v33  ;;  %v2401_v33 = vpop.trf.xlu0 }
 0xec4   :  { %v2335_v35 = vpop.f32.mrf.mxu3 }
 0xec5   :  { %v2345_v0 = vsel %vm4743_vm11, %v2335_v35, 0.0 }
 0xec6   :  { %v2353_v28 = vadd.f32 %v2345_v0, %v5207_v62  ;;  %v2340_v62 = vsel %vm4778_vm6, %v2320_v9, 0.0 }
 0xec7   :  { %v2348_v22 = vadd.f32 %v2340_v62, %v2202_v61  ;;  %v2402_v12 = vpop.trf.xlu0 }
 0xec8   :  { %2365 = vmatpush.msrb.mxu1 %v2353_v28 }
 0xeca   :  { %2366 = vmatpush.msrb.mxu1 %v2352_v1 }
 0xecc   :  { %2367 = vmatpush.msrb.mxu1 %v2351_v59 }
 0xece   :  { %2368 = vmatpush.msrb.mxu1 %v2350_v60 }
 0xed0   :  { %2369 = vmatpush.msrb.mxu1 %v2349_v55 }
 0xed2   :  { %2370 = vmatpush.msrb.mxu1 %v2348_v22 }
 0xed4   :  { %2371 = vmatpush.msrb.mxu1 %v2347_v5 }
 0xed6   :  { %2372 = vmatpush.msrb.mxu1 %v2346_v49 }
 0xed7   :  { %3856 = vmatmul.msk.f32.vlgmr.msrb.gmra.mxu1 %vm5753_vm9, %v2354_v46  ;;  %v2403_v46 = vpop.trf.xlu0  ;;  %vm5760_vm9 = vmmov %vm5731_vm0 }
 0xedf   :  { %v2404_v37 = vpop.trf.xlu0 }
 0xee7   :  { %v2405_v38 = vpop.trf.xlu0 }
 0xeef   :  { %v2406_v24 = vpop.trf.xlu0 }
 0xf54   :  { %v2374_v23 = vpop.f32.mrf.mxu1 }
 0xf55   :  { %v2378_v20 = vrot.slane %v2374_v23, 4 }
 0xf57   :  { %v2380_v43 = vsub.f32 %v4855_v30, %v2378_v20 }
 0xf59   :  { %v2381_v61 = vmul.f32 %v2380_v43, %v4868_v48 }
 0xf5b   :  { %v2416_v16 = vrot.slane %v2381_v61, 4 }
 0xf5d   :  { %3857 = vmatpush.msk.msra.mxu1 %vm5754_vm7, %v2416_v16  ;;  %vm5761_vm7 = vmmov %vm5731_vm0 }
 0xf5e   :  { %3858 = vmatmul.msk.f32.vlgmr.msra.gmra.mxu1 %vm5731_vm0, %v2399_v54  ;;  %vm5762_vm0 = vcmask 523264  }
 0xf66   :  { %3859 = vmatmul.msk.f32.gmra.mxu1 %vm5755_vm4, %v2400_v21  ;;  %vm5764_vm4 = vmmov %vm5762_vm0 }
 0xf6e   :  { %3860 = vmatmul.msk.f32.gmra.mxu1 %vm5756_vm13, %v2401_v33  ;;  %vm5765_vm13 = vcmask 1040384  }
 0xf76   :  { %3861 = vmatmul.msk.f32.gmra.mxu1 %vm5757_vm5, %v2402_v12 }
 0xf7e   :  { %3862 = vmatmul.msk.f32.gmra.mxu1 %vm5758_vm12, %v2403_v46  ;;  %vm5766_vm12 = vmmov %vm5757_vm5 }
 0xf86   :  { %3863 = vmatmul.msk.f32.gmra.mxu1 %vm5759_vm15, %v2404_v37  ;;  %vm5767_vm15 = vmmov %vm5757_vm5 }
 0xf8e   :  { %3864 = vmatmul.msk.f32.gmra.mxu1 %vm5760_vm9, %v2405_v38  ;;  %vm5768_vm9 = vmmov %vm5757_vm5 }
 0xf96   :  { %3865 = vmatmul.msk.f32.gmra.mxu1 %vm5761_vm7, %v2406_v24  ;;  %vm5769_vm7 = vmmov %vm5757_vm5 }
 0xfdb   :  { %v2460_v9 = vpop.f32.mrf.mxu1 }
 0xfdc   :  { %v2484_v36 = vsel %vm5700_vm14, %v2460_v9, 0.0 }
 0xfdd   :  { %v2492_v8 = vadd.f32 %v2484_v36, %v2346_v49  ;;  %v2577_v36 = vpop.trf.xlu1 }
 0xfdf   :  { %v5283_v4 = vmul.f32 %v2523_v45, %v2492_v8 }
 0xfe3   :  { %v2463_v35 = vpop.f32.mrf.mxu1 }
 0xfeb   :  { %v2466_v6 = vpop.f32.mrf.mxu1 }
 0xfec   :  { %v2486_v16 = vsel %vm4778_vm6, %v2466_v6, 0.0 }
 0xff3   :  { %v2469_v0 = vpop.f32.mrf.mxu1 }
 0xff4   :  { %v2487_v21 = vsel %vm4767_vm3, %v2469_v0, 0.0  ;;  %v2578_v0 = vpop.trf.xlu1 }
 0xff5   :  { %v2495_v33 = vadd.f32 %v2487_v21, %v2349_v55 }
 0xff7   :  { %v2527_v38 = vmul.f32 %v2523_v45, %v2495_v33 }
 0xffb   :  { %v2472_v19 = vpop.f32.mrf.mxu1 }
 0xffc   :  { %v2488_v20 = vsel %vm4755_vm2, %v2472_v19, 0.0 }
 0xffd   :  { %v2496_v61 = vadd.f32 %v2488_v20, %v2350_v60 }
 0xfff   :  { %v2528_v55 = vmul.f32 %v2523_v45, %v2496_v61 }
0x1003   :  { %v2475_v18 = vpop.f32.mrf.mxu1 }
0x1004   :  { %v2489_v23 = vsel %vm4747_vm1, %v2475_v18, 0.0 }
0x1005   :  { %v2497_v43 = vadd.f32 %v2489_v23, %v2351_v59  ;;  %v2500_v59 = vrot.slane %v4959_v25, 4 }
0x1007   :  { %v2529_v37 = vmul.f32 %v2523_v45, %v2497_v43 }
0x100b   :  { %v2478_v63 = vpop.f32.mrf.mxu1 }
0x100c   :  { %v2490_v50 = vsel %vm4739_vm10, %v2478_v63, 0.0 }
0x100d   :  { %v2498_v49 = vadd.f32 %v2490_v50, %v2352_v1  ;;  %v2494_v1 = vadd.f32 %v2486_v16, %v2348_v22 }
0x100f   :  { %v2530_v60 = vmul.f32 %v2523_v45, %v2498_v49  ;;  %v2526_v24 = vmul.f32 %v2523_v45, %v2494_v1 }
0x1013   :  { %v2481_v62 = vpop.f32.mrf.mxu1 }
0x1014   :  { %v2491_v7 = vsel %vm4743_vm11, %v2481_v62, 0.0 }
0x1015   :  { %v2499_v54 = vadd.f32 %v2491_v7, %v2353_v28  ;;  %v2485_v28 = vsel %vm5699_vm8, %v2463_v35, 0.0 }
0x1016   :  { %v2493_v12 = vadd.f32 %v2485_v28, %v2347_v5  ;;  %v5763_v5 = vrot.slane %v4652_v51, 5 }
0x1017   :  { %2511 = vmatpush.msra.mxu2 %v2499_v54  ;;  %v2531_v46 = vmul.f32 %v2523_v45, %v2499_v54 }
0x1018   :  { %v2525_v22 = vmul.f32 %v2523_v45, %v2493_v12  ;;  %v2579_v45 = vpop.trf.xlu1 }
0x1019   :  { %2512 = vmatpush.msra.mxu2 %v2498_v49 }
0x101b   :  { %2513 = vmatpush.msra.mxu2 %v2497_v43 }
0x101d   :  { %2514 = vmatpush.msra.mxu2 %v2496_v61 }
0x101f   :  { %2515 = vmatpush.msra.mxu2 %v2495_v33 }
0x1020   :  { %v2580_v63 = vpop.trf.xlu1 }
0x1021   :  { %2516 = vmatpush.msra.mxu2 %v2494_v1 }
0x1023   :  { %2517 = vmatpush.msra.mxu2 %v2493_v12 }
0x1025   :  { %2518 = vmatpush.msra.mxu2 %v2492_v8 }
0x1026   :  { %3866 = vmatmul.msk.f32.vlgmr.msra.gmra.mxu2 %vm5762_vm0, %v2500_v59  ;;  %vm5770_vm0 = vmmov %vm5757_vm5 }
0x1027   :  { %2543 = vmatpush.msrb.mxu2 %v2531_v46 }
0x1028   :  { %v2581_v62 = vpop.trf.xlu1 }
0x1029   :  { %2544 = vmatpush.msrb.mxu2 %v2530_v60 }
0x102b   :  { %2545 = vmatpush.msrb.mxu2 %v2529_v37 }
0x102d   :  { %2546 = vmatpush.msrb.mxu2 %v2528_v55 }
0x102f   :  { %2547 = vmatpush.msrb.mxu2 %v2527_v38 }
0x1030   :  { %v2582_v50 = vpop.trf.xlu1 }
0x1031   :  { %2548 = vmatpush.msrb.mxu2 %v2526_v24 }
0x1033   :  { %2549 = vmatpush.msrb.mxu2 %v2525_v22 }
0x1035   :  { %2550 = vmatpush.msrb.mxu2 %v5283_v4 }
0x1036   :  { %3867 = vmatmul.msk.f32.vlgmr.msrb.gmra.mxu2 %vm5764_vm4, %v5763_v5  ;;  %vm5771_vm4 = vmmov %vm5770_vm0 }
0x1038   :  { %v2583_v7 = vpop.trf.xlu1 }
0x1040   :  { %v2584_v54 = vpop.trf.xlu1 }
0x10a9   :  { %v5305_v9 = vpop.f32.mrf.mxu2 }
0x10b9   :  { %v2552_v8 = vpop.f32.mrf.mxu2 }
0x10ba   :  { %v2556_v35 = vrot.slane %v2552_v8, 3 }
0x10bc   :  { %v2558_v6 = vsub.f32 %v4672_v2, %v2556_v35 }
0x10be   :  { %v2559_v19 = vmul.f32 %v2558_v6, %v4679_v10 }
0x10c0   :  { %v2594_v18 = vrot.slane %v2559_v19, 5 }
0x10c2   :  { %3868 = vmatpush.msk.msra.mxu2 %vm5765_vm13, %v2594_v18  ;;  %vm5772_vm13 = vmmov %vm5770_vm0 }
0x10c3   :  { %3869 = vmatmul.msk.f32.vlgmr.msra.gmra.mxu2 %vm5757_vm5, %v2577_v36  ;;  %vm5774_vm5 = vcmask 523264  }
0x10cb   :  { %3870 = vmatmul.msk.f32.gmra.mxu2 %vm5766_vm12, %v2578_v0  ;;  %vm5775_vm12 = vcmask 1040384  }
0x10d3   :  { %3871 = vmatmul.msk.f32.gmra.mxu2 %vm5767_vm15, %v2579_v45  ;;  %vm5776_vm15 = vmmov %vm5770_vm0 }
0x10db   :  { %3872 = vmatmul.msk.f32.gmra.mxu2 %vm5768_vm9, %v2580_v63  ;;  %vm5777_vm9 = vmmov %vm5770_vm0 }
0x10e3   :  { %3873 = vmatmul.msk.f32.gmra.mxu2 %vm5769_vm7, %v2581_v62  ;;  %vm5778_vm7 = vmmov %vm5770_vm0 }
0x10eb   :  { %3874 = vmatmul.msk.f32.gmra.mxu2 %vm5770_vm0, %v2582_v50 }
0x10f3   :  { %3875 = vmatmul.msk.f32.gmra.mxu2 %vm5771_vm4, %v2583_v7  ;;  %vm5779_vm4 = vmmov %vm5770_vm0 }
0x10fb   :  { %3876 = vmatmul.msk.f32.gmra.mxu2 %vm5772_vm13, %v2584_v54  ;;  %vm5780_vm13 = vmmov %vm5770_vm0 }
0x1146   :  { %v2638_v23 = vpop.f32.mrf.mxu2 }
0x1147   :  { %v2662_v18 = vsel %vm5700_vm14, %v2638_v23, 0.0 }
0x1148   :  { %v2670_v45 = vadd.f32 %v2662_v18, %v5283_v4 }
0x114e   :  { %v2641_v49 = vpop.f32.mrf.mxu2 }
0x1156   :  { %v2644_v20 = vpop.f32.mrf.mxu2 }
0x1157   :  { %v2664_v0 = vsel %vm4778_vm6, %v2644_v20, 0.0 }
0x115e   :  { %v2647_v43 = vpop.f32.mrf.mxu2 }
0x115f   :  { %v2665_v35 = vsel %vm4767_vm3, %v2647_v43, 0.0 }
0x1160   :  { %v2673_v19 = vadd.f32 %v2665_v35, %v2527_v38  ;;  %v2723_v38 = vpop.trf.xlu2 }
0x1166   :  { %v2650_v21 = vpop.f32.mrf.mxu2 }
0x1167   :  { %v2666_v36 = vsel %vm4755_vm2, %v2650_v21, 0.0 }
0x1168   :  { %v2674_v6 = vadd.f32 %v2666_v36, %v2528_v55  ;;  %v5773_v55 = vrot.slane %v4689_v13, 5 }
0x116e   :  { %v2653_v61 = vpop.f32.mrf.mxu2 }
0x116f   :  { %v2667_v59 = vsel %vm4747_vm1, %v2653_v61, 0.0 }
0x1170   :  { %v2675_v8 = vadd.f32 %v2667_v59, %v2529_v37 }
0x1176   :  { %v2656_v16 = vpop.f32.mrf.mxu2 }
0x1177   :  { %v2668_v28 = vsel %vm4739_vm10, %v2656_v16, 0.0  ;;  %v2847_v16 = vperm.slane %v4631_v26, 6 }
0x1178   :  { %v2676_v5 = vadd.f32 %v2668_v28, %v2530_v60  ;;  %v2672_v60 = vadd.f32 %v2664_v0, %v2526_v24  ;;  %v2724_v24 = vpop.trf.xlu2 }
0x117e   :  { %v2659_v33 = vpop.f32.mrf.mxu2 }
0x117f   :  { %v2669_v1 = vsel %vm4743_vm11, %v2659_v33, 0.0 }
0x1180   :  { %v2677_v12 = vadd.f32 %v2669_v1, %v2531_v46  ;;  %v2663_v46 = vsel %vm5699_vm8, %v2641_v49, 0.0  ;;  %v2725_v4 = vpop.trf.xlu2 }
0x1181   :  { %v2671_v37 = vadd.f32 %v2663_v46, %v2525_v22 }
0x1182   :  { %2689 = vmatpush.msra.mxu0 %v2677_v12 }
0x1184   :  { %2690 = vmatpush.msra.mxu0 %v2676_v5 }
0x1186   :  { %2691 = vmatpush.msra.mxu0 %v2675_v8 }
0x1188   :  { %2692 = vmatpush.msra.mxu0 %v2674_v6  ;;  %v2726_v22 = vpop.trf.xlu2 }
0x118a   :  { %2693 = vmatpush.msra.mxu0 %v2673_v19 }
0x118c   :  { %2694 = vmatpush.msra.mxu0 %v2672_v60 }
0x118e   :  { %2695 = vmatpush.msra.mxu0 %v2671_v37 }
0x1190   :  { %2696 = vmatpush.msra.mxu0 %v2670_v45  ;;  %v2727_v23 = vpop.trf.xlu2 }
0x1191   :  { %3877 = vmatmul.msk.f32.vlgmr.msra.gmra.mxu0 %vm5774_vm5, %v5773_v55  ;;  %vm5781_vm5 = vmmov %vm5770_vm0 }
0x1198   :  { %v2728_v49 = vpop.trf.xlu2 }
0x11a0   :  { %v2729_v20 = vpop.trf.xlu2 }
0x11a8   :  { %v2730_v43 = vpop.trf.xlu2 }
0x120e   :  { %v2698_v63 = vpop.f32.mrf.mxu0 }
0x120f   :  { %v2702_v62 = vrot.slane %v2698_v63, 3 }
0x1211   :  { %v2704_v50 = vsub.f32 %v4855_v30, %v2702_v62 }
0x1213   :  { %v2705_v7 = vmul.f32 %v2704_v50, %v4868_v48 }
0x1215   :  { %v2740_v54 = vrot.slane %v2705_v7, 5 }
0x1217   :  { %3878 = vmatpush.msk.msrb.mxu0 %vm5775_vm12, %v2740_v54  ;;  %vm5782_vm12 = vmmov %vm5770_vm0 }
0x1218   :  { %3879 = vmatmul.msk.f32.vlgmr.msrb.gmra.mxu0 %vm5776_vm15, %v2723_v38  ;;  %vm5783_vm15 = vcmask 523264  }
0x1220   :  { %3880 = vmatmul.msk.f32.gmra.mxu0 %vm5777_vm9, %v2724_v24  ;;  %vm5784_vm9 = vmmov %vm5783_vm15 }
0x1228   :  { %3881 = vmatmul.msk.f32.gmra.mxu0 %vm5778_vm7, %v2725_v4  ;;  %vm3517_vm7 = vcmask 1041408  }
0x1230   :  { %3882 = vmatmul.msk.f32.gmra.mxu0 %vm5770_vm0, %v2726_v22  ;;  %vm3519_vm0 = vcmask 1042432  }
0x1238   :  { %3883 = vmatmul.msk.f32.gmra.mxu0 %vm5779_vm4, %v2727_v23  ;;  %vm5785_vm4 = vcmask 1040384  }
0x1240   :  { %3884 = vmatmul.msk.f32.gmra.mxu0 %vm5780_vm13, %v2728_v49  ;;  %vm3521_vm13 = vcmask 1043456  }
0x1248   :  { %3885 = vmatmul.msk.f32.gmra.mxu0 %vm5781_vm5, %v2729_v20  ;;  %vm3523_vm5 = vcmask 1044480  }
0x1250   :  { %3886 = vmatmul.msk.f32.gmra.mxu0 %vm5782_vm12, %v2730_v43  ;;  %vm5786_vm12 = vmmov %vm5785_vm4 }
0x1295   :  { %v2784_v21 = vpop.f32.mrf.mxu0 }
0x1296   :  { %v2808_v61 = vsel %vm5700_vm14, %v2784_v21, 0.0  ;;  %v3496_v21 = vrot.slane %v5079_v15, 7  ;;  %v2901_v15 = vpop.trf.xlu0 }
0x1297   :  { %v2816_v33 = vadd.f32 %v2808_v61, %v2670_v45  ;;  %v3499_v61 = vrot.slane %v5160_v52, 6 }
0x1299   :  { %v5352_v28 = vmul.f32 %v2847_v16, %v2816_v33 }
0x129d   :  { %v2787_v1 = vpop.f32.mrf.mxu0 }
0x12a5   :  { %v2790_v59 = vpop.f32.mrf.mxu0 }
0x12a6   :  { %v2810_v4 = vsel %vm4778_vm6, %v2790_v59, 0.0 }
0x12ad   :  { %v2793_v36 = vpop.f32.mrf.mxu0 }
0x12ae   :  { %v2811_v7 = vsel %vm4767_vm3, %v2793_v36, 0.0 }
0x12af   :  { %v2819_v22 = vadd.f32 %v2811_v7, %v2673_v19 }
0x12b5   :  { %v2796_v35 = vpop.f32.mrf.mxu0 }
0x12b6   :  { %v2812_v50 = vsel %vm4755_vm2, %v2796_v35, 0.0 }
0x12b7   :  { %v2820_v54 = vadd.f32 %v2812_v50, %v2674_v6 }
0x12bd   :  { %v2799_v0 = vpop.f32.mrf.mxu0 }
0x12be   :  { %v2813_v62 = vsel %vm4747_vm1, %v2799_v0, 0.0 }
0x12bf   :  { %v2821_v24 = vadd.f32 %v2813_v62, %v2675_v8  ;;  %v2824_v8 = vrot.slane %v4959_v25, 5 }
0x12c1   :  { %v5375_v19 = vmul.f32 %v2847_v16, %v2821_v24 }
0x12c5   :  { %v2802_v46 = vpop.f32.mrf.mxu0 }
0x12c6   :  { %v2814_v55 = vsel %vm4739_vm10, %v2802_v46, 0.0 }
0x12c7   :  { %v2822_v45 = vadd.f32 %v2814_v55, %v2676_v5  ;;  %v2818_v5 = vadd.f32 %v2810_v4, %v2672_v60  ;;  %v5378_v60 = vmul.f32 %v2847_v16, %v2820_v54  ;;  %v2902_v55 = vpop.trf.xlu0 }
0x12c9   :  { %v5372_v6 = vmul.f32 %v2847_v16, %v2822_v45  ;;  %v5384_v20 = vmul.f32 %v2847_v16, %v2818_v5 }
0x12cd   :  { %v2805_v18 = vpop.f32.mrf.mxu0 }
0x12ce   :  { %v2815_v38 = vsel %vm4743_vm11, %v2805_v18, 0.0 }
0x12cf   :  { %v2823_v63 = vadd.f32 %v2815_v38, %v2677_v12  ;;  %v2809_v12 = vsel %vm5699_vm8, %v2787_v1, 0.0  ;;  %v3516_v1 = vsel %vm5785_vm4, %v4985_v34, %v3496_v21  ;;  %v2903_v34 = vpop.trf.xlu0 }
0x12d0   :  { %v2817_v23 = vadd.f32 %v2809_v12, %v2671_v37  ;;  %v5381_v37 = vmul.f32 %v2847_v16, %v2819_v22  ;;  %v3518_v59 = vsel %vm3517_vm7, %v3516_v1, %v3499_v61 }
0x12d1   :  { %2835 = vmatpush.msrb.mxu3 %v2823_v63  ;;  %v5369_v49 = vmul.f32 %v2847_v16, %v2823_v63 }
0x12d2   :  { %v5387_v43 = vmul.f32 %v2847_v16, %v2817_v23  ;;  %v3505_v16 = vrot.slane %v5305_v9, 4 }
0x12d3   :  { %2836 = vmatpush.msrb.mxu3 %v2822_v45 }
0x12d5   :  { %2837 = vmatpush.msrb.mxu3 %v2821_v24 }
0x12d7   :  { %2838 = vmatpush.msrb.mxu3 %v2820_v54  ;;  %v2904_v63 = vpop.trf.xlu0 }
0x12d9   :  { %2839 = vmatpush.msrb.mxu3 %v2819_v22 }
0x12db   :  { %2840 = vmatpush.msrb.mxu3 %v2818_v5 }
0x12dd   :  { %2841 = vmatpush.msrb.mxu3 %v2817_v23 }
0x12df   :  { %2842 = vmatpush.msrb.mxu3 %v2816_v33  ;;  %v3502_v33 = vrot.slane %v5244_v29, 5  ;;  %v2905_v62 = vpop.trf.xlu0 }
0x12e0   :  { %3887 = vmatmul.msk.f32.vlgmr.msrb.gmra.mxu3 %vm5783_vm15, %v2824_v8  ;;  %vm5787_vm15 = vcmask 7168  }
0x12e1   :  { %2867 = vmatpush.msra.mxu3 %v5369_v49  ;;  %v3520_v35 = vsel %vm3519_vm0, %v3518_v59, %v3502_v33 }
0x12e3   :  { %2868 = vmatpush.msra.mxu3 %v5372_v6 }
0x12e5   :  { %2869 = vmatpush.msra.mxu3 %v5375_v19 }
0x12e7   :  { %2870 = vmatpush.msra.mxu3 %v5378_v60  ;;  %v2906_v45 = vpop.trf.xlu0 }
0x12e9   :  { %2871 = vmatpush.msra.mxu3 %v5381_v37 }
0x12eb   :  { %2872 = vmatpush.msra.mxu3 %v5384_v20 }
0x12ed   :  { %2873 = vmatpush.msra.mxu3 %v5387_v43 }
0x12ef   :  { %2874 = vmatpush.msra.mxu3 %v5352_v28  ;;  %v2907_v50 = vpop.trf.xlu0 }
0x12f0   :  { %3888 = vmatmul.msk.f32.vlgmr.msra.gmra.mxu3 %vm5784_vm9, %v2856_v39  ;;  %v3522_v39 = vsel %vm3521_vm13, %v3520_v35, %v3505_v16  ;;  %vm5788_vm9 = vmmov %vm5787_vm15 }
0x12f1   :  { %vm5789_vm7 = vmmov %vm5788_vm9 }
0x12f2   :  { %vm5790_vm0 = vmmov %vm5789_vm7 }
0x12f3   :  { %vm5791_vm4 = vmmov %vm5790_vm0 }
0x12f4   :  { %vm5792_vm13 = vmmov %vm5790_vm0 }
0x12f7   :  { %v2908_v24 = vpop.trf.xlu0 }
0x1363   :  { %v2844_v36 = vpop.f32.mrf.mxu3 }
0x1364   :  { %v3508_v0 = vrot.slane %v2844_v36, 3 }
0x1366   :  { %v5401_v46 = vsel %vm3523_vm5, %v3522_v39, %v3508_v0  ;;  %vm5793_vm5 = vmmov %vm5790_vm0 }
0x1373   :  { %v2876_v52 = vpop.f32.mrf.mxu3 }
0x1374   :  { %v2880_v18 = vrot.slane %v2876_v52, 2 }
0x1376   :  { %v2882_v29 = vsub.f32 %v4672_v2, %v2880_v18 }
0x1378   :  { %v2883_v9 = vmul.f32 %v2882_v29, %v4679_v10 }
0x137a   :  { %v2918_v38 = vrot.slane %v2883_v9, 6 }
0x137c   :  { %3889 = vmatpush.msk.msrb.mxu1 %vm5786_vm12, %v2918_v38  ;;  %vm5794_vm12 = vmmov %vm5790_vm0 }
0x137d   :  { %3890 = vmatmul.msk.f32.vlgmr.msrb.gmra.mxu1 %vm5787_vm15, %v2901_v15  ;;  %vm5795_vm15 = vcmask 523264  }
0x1385   :  { %3891 = vmatmul.msk.f32.gmra.mxu1 %vm5788_vm9, %v2902_v55  ;;  %vm5796_vm9 = vcmask 1040384  }
0x138d   :  { %3892 = vmatmul.msk.f32.gmra.mxu1 %vm5789_vm7, %v2903_v34  ;;  %vm5797_vm7 = vmmov %vm5790_vm0 }
0x1395   :  { %3893 = vmatmul.msk.f32.gmra.mxu1 %vm5790_vm0, %v2904_v63 }
0x139d   :  { %3894 = vmatmul.msk.f32.gmra.mxu1 %vm5791_vm4, %v2905_v62  ;;  %vm5798_vm4 = vmmov %vm5790_vm0 }
0x13a5   :  { %3895 = vmatmul.msk.f32.gmra.mxu1 %vm5792_vm13, %v2906_v45  ;;  %vm5799_vm13 = vmmov %vm5790_vm0 }
0x13ad   :  { %3896 = vmatmul.msk.f32.gmra.mxu1 %vm5793_vm5, %v2907_v50  ;;  %vm5800_vm5 = vmmov %vm5790_vm0 }
0x13b5   :  { %3897 = vmatmul.msk.f32.gmra.mxu1 %vm5794_vm12, %v2908_v24  ;;  %vm5801_vm12 = vmmov %vm5790_vm0  ;;  %v3171_v24 = vperm.slane %v4631_v26, 7 }
0x13fa   :  { %v2962_v7 = vpop.f32.mrf.mxu1 }
0x1402   :  { %v2965_v54 = vpop.f32.mrf.mxu1 }
0x140a   :  { %v2968_v4 = vpop.f32.mrf.mxu1 }
0x1412   :  { %v2971_v22 = vpop.f32.mrf.mxu1 }
0x1413   :  { %v2989_v35 = vsel %vm4767_vm3, %v2971_v22, 0.0 }
0x1414   :  { %v2997_v39 = vadd.f32 %v2989_v35, %v5381_v37  ;;  %v3047_v37 = vpop.trf.xlu1 }
0x141a   :  { %v2974_v12 = vpop.f32.mrf.mxu1 }
0x141b   :  { %v2990_v59 = vsel %vm4755_vm2, %v2974_v12, 0.0 }
0x141c   :  { %v2998_v0 = vadd.f32 %v2990_v59, %v5378_v60  ;;  %v3048_v55 = vpop.trf.xlu1 }
0x1422   :  { %v2977_v5 = vpop.f32.mrf.mxu1 }
0x1423   :  { %v2991_v16 = vsel %vm4747_vm1, %v2977_v5, 0.0 }
0x1424   :  { %v2999_v36 = vadd.f32 %v2991_v16, %v5375_v19  ;;  %v2986_v19 = vsel %vm5700_vm14, %v2962_v7, 0.0 }
0x1425   :  { %v2994_v60 = vadd.f32 %v2986_v19, %v5352_v28  ;;  %v3049_v28 = vpop.trf.xlu1 }
0x142a   :  { %v2980_v23 = vpop.f32.mrf.mxu1 }
0x142b   :  { %v2992_v21 = vsel %vm4739_vm10, %v2980_v23, 0.0 }
0x142c   :  { %v3000_v1 = vadd.f32 %v2992_v21, %v5372_v6  ;;  %v2987_v6 = vsel %vm5699_vm8, %v2965_v54, 0.0 }
0x142d   :  { %v5439_v52 = vadd.f32 %v2987_v6, %v5387_v43  ;;  %v3050_v38 = vpop.trf.xlu1 }
0x1432   :  { %v2983_v8 = vpop.f32.mrf.mxu1 }
0x1433   :  { %v2993_v61 = vsel %vm4743_vm11, %v2983_v8, 0.0 }
0x1434   :  { %v3001_v33 = vadd.f32 %v2993_v61, %v5369_v49  ;;  %v2988_v49 = vsel %vm4778_vm6, %v2968_v4, 0.0 }
0x1435   :  { %v5434_v15 = vadd.f32 %v2988_v49, %v5384_v20 }
0x1436   :  { %3013 = vmatpush.msrb.mxu3 %v3001_v33 }
0x1438   :  { %3014 = vmatpush.msrb.mxu3 %v3000_v1 }
0x143a   :  { %3015 = vmatpush.msrb.mxu3 %v2999_v36 }
0x143c   :  { %3016 = vmatpush.msrb.mxu3 %v2998_v0 }
0x143e   :  { %3017 = vmatpush.msrb.mxu3 %v2997_v39 }
0x1440   :  { %3018 = vmatpush.msrb.mxu3 %v5434_v15 }
0x1442   :  { %3019 = vmatpush.msrb.mxu3 %v5439_v52 }
0x1444   :  { %3020 = vmatpush.msrb.mxu3 %v2994_v60 }
0x1445   :  { %3898 = vmatmul.msk.f32.vlgmr.msrb.gmra.mxu3 %vm5795_vm15, %v3002_v40  ;;  %v3051_v40 = vpop.trf.xlu1  ;;  %vm5802_vm15 = vmmov %vm5790_vm0 }
0x144d   :  { %v3052_v34 = vpop.trf.xlu1 }
0x1455   :  { %v3053_v63 = vpop.trf.xlu1 }
0x145d   :  { %v3054_v62 = vpop.trf.xlu1 }
0x14c8   :  { %v3022_v20 = vpop.f32.mrf.mxu3 }
0x14c9   :  { %v3026_v18 = vrot.slane %v3022_v20, 2 }
0x14cb   :  { %v3028_v29 = vsub.f32 %v4855_v30, %v3026_v18 }
0x14cd   :  { %v3029_v43 = vmul.f32 %v3028_v29, %v4868_v48 }
0x14cf   :  { %v3064_v9 = vrot.slane %v3029_v43, 6 }
0x14d1   :  { %3899 = vmatpush.msk.msra.mxu3 %vm5796_vm9, %v3064_v9  ;;  %vm5803_vm9 = vmmov %vm5790_vm0 }
0x14d2   :  { %3900 = vmatmul.msk.f32.vlgmr.msra.gmra.mxu3 %vm5797_vm7, %v3047_v37  ;;  %vm5804_vm7 = vcmask 523264  }
0x14da   :  { %3901 = vmatmul.msk.f32.gmra.mxu3 %vm5790_vm0, %v3048_v55  ;;  %vm5805_vm0 = vmmov %vm5804_vm7 }
0x14e2   :  { %3902 = vmatmul.msk.f32.gmra.mxu3 %vm5798_vm4, %v3049_v28  ;;  %v3148_v28 = vrot.slane %v4959_v25, 6  ;;  %vm5806_vm4 = vcmask 1040384  }
0x14ea   :  { %3903 = vmatmul.msk.f32.gmra.mxu3 %vm5799_vm13, %v3050_v38  ;;  %vm5807_vm13 = vmmov %vm5800_vm5 }
0x14f2   :  { %3904 = vmatmul.msk.f32.gmra.mxu3 %vm5800_vm5, %v3051_v40 }
0x14fa   :  { %3905 = vmatmul.msk.f32.gmra.mxu3 %vm5801_vm12, %v3052_v34  ;;  %vm5808_vm12 = vmmov %vm5800_vm5 }
0x1502   :  { %3906 = vmatmul.msk.f32.gmra.mxu3 %vm5802_vm15, %v3053_v63  ;;  %vm5809_vm15 = vmmov %vm5800_vm5 }
0x150a   :  { %3907 = vmatmul.msk.f32.gmra.mxu3 %vm5803_vm9, %v3054_v62  ;;  %vm5810_vm9 = vmmov %vm5800_vm5 }
0x1555   :  { %v3108_v45 = vpop.f32.mrf.mxu3 }
0x1556   :  { %v3132_v50 = vsel %vm5700_vm14, %v3108_v45, 0.0 }
0x1557   :  { %v3140_v7 = vadd.f32 %v3132_v50, %v2994_v60 }
0x1559   :  { %v5461_v54 = vmul.f32 %v3171_v24, %v3140_v7 }
0x155d   :  { %v3111_v4 = vpop.f32.mrf.mxu3 }
0x1565   :  { %v3114_v22 = vpop.f32.mrf.mxu3 }
0x156d   :  { %v3117_v12 = vpop.f32.mrf.mxu3 }
0x156e   :  { %v3135_v60 = vsel %vm4767_vm3, %v3117_v12, 0.0 }
0x1575   :  { %v3120_v5 = vpop.f32.mrf.mxu3 }
0x1576   :  { %v3136_v49 = vsel %vm4755_vm2, %v3120_v5, 0.0 }
0x1577   :  { %v3144_v37 = vadd.f32 %v3136_v49, %v2998_v0 }
0x1579   :  { %v3176_v55 = vmul.f32 %v3171_v24, %v3144_v37 }
0x157d   :  { %v3123_v23 = vpop.f32.mrf.mxu3 }
0x157e   :  { %v3137_v16 = vsel %vm4747_vm1, %v3123_v23, 0.0 }
0x157f   :  { %v3145_v6 = vadd.f32 %v3137_v16, %v2999_v36  ;;  %v3133_v36 = vsel %vm5699_vm8, %v3111_v4, 0.0 }
0x1580   :  { %v3141_v0 = vadd.f32 %v3133_v36, %v5439_v52 }
0x1581   :  { %v3177_v18 = vmul.f32 %v3171_v24, %v3145_v6 }
0x1585   :  { %v3126_v8 = vpop.f32.mrf.mxu3 }
0x1586   :  { %v3138_v21 = vsel %vm4739_vm10, %v3126_v8, 0.0 }
0x1587   :  { %v3146_v26 = vadd.f32 %v3138_v21, %v3000_v1  ;;  %v3134_v1 = vsel %vm4778_vm6, %v3114_v22, 0.0 }
0x1588   :  { %v3142_v29 = vadd.f32 %v3134_v1, %v5434_v15  ;;  %v3225_v15 = vpop.trf.xlu2 }
0x1589   :  { %v5475_v20 = vmul.f32 %v3171_v24, %v3146_v26 }
0x158a   :  { %v3174_v9 = vmul.f32 %v3171_v24, %v3142_v29 }
0x158d   :  { %v3129_v61 = vpop.f32.mrf.mxu3 }
0x158e   :  { %v3139_v59 = vsel %vm4743_vm11, %v3129_v61, 0.0 }
0x158f   :  { %v3147_v35 = vadd.f32 %v3139_v59, %v3001_v33  ;;  %v3143_v33 = vadd.f32 %v3135_v60, %v2997_v39  ;;  %v3173_v39 = vmul.f32 %v3171_v24, %v3141_v0 }
0x1590   :  { %v3226_v34 = vpop.trf.xlu2 }
0x1591   :  { %v5471_v19 = vmul.f32 %v3171_v24, %v3147_v35  ;;  %3159 = vmatpush.msrb.mxu2 %v3147_v35  ;;  %v3175_v43 = vmul.f32 %v3171_v24, %v3143_v33 }
0x1593   :  { %3160 = vmatpush.msrb.mxu2 %v3146_v26  ;;  %3191 = vmatpush.msra.mxu0 %v5471_v19 }
0x1595   :  { %3161 = vmatpush.msrb.mxu2 %v3145_v6  ;;  %3192 = vmatpush.msra.mxu0 %v5475_v20 }
0x1597   :  { %3162 = vmatpush.msrb.mxu2 %v3144_v37  ;;  %3193 = vmatpush.msra.mxu0 %v3177_v18 }
0x1598   :  { %v3227_v45 = vpop.trf.xlu2 }
0x1599   :  { %3163 = vmatpush.msrb.mxu2 %v3143_v33  ;;  %3194 = vmatpush.msra.mxu0 %v3176_v55 }
0x159b   :  { %3164 = vmatpush.msrb.mxu2 %v3142_v29  ;;  %3195 = vmatpush.msra.mxu0 %v3175_v43 }
0x159d   :  { %3165 = vmatpush.msrb.mxu2 %v3141_v0  ;;  %3196 = vmatpush.msra.mxu0 %v3174_v9 }
0x159f   :  { %3166 = vmatpush.msrb.mxu2 %v3140_v7  ;;  %3197 = vmatpush.msra.mxu0 %v3173_v39 }
0x15a0   :  { %3908 = vmatmul.msk.f32.vlgmr.msrb.gmra.mxu2 %vm5804_vm7, %v3148_v28  ;;  %v3228_v50 = vpop.trf.xlu2  ;;  %vm5811_vm7 = vmmov %vm5800_vm5 }
0x15a1   :  { %3198 = vmatpush.msra.mxu0 %v5461_v54 }
0x15a2   :  { %3909 = vmatmul.msk.f32.vlgmr.msra.gmra.mxu0 %vm5805_vm0, %v3180_v44  ;;  %vm5812_vm0 = vmmov %vm5800_vm5 }
0x15a8   :  { %v3229_v51 = vpop.trf.xlu2 }
0x161f   :  { %v3200_v52 = vpop.f32.mrf.mxu0 }
0x1620   :  { %v3204_v38 = vrot.slane %v3200_v52, 1 }
0x1622   :  { %v3206_v40 = vsub.f32 %v4672_v2, %v3204_v38  ;;  %v3230_v2 = vpop.trf.xlu2 }
0x1623   :  { %v5502_v24 = vpop.f32.mrf.mxu2 }
0x1624   :  { %v3207_v63 = vmul.f32 %v3206_v40, %v4679_v10  ;;  %v3511_v58 = vrot.slane %v5502_v24, 2 }
0x1626   :  { %v3242_v62 = vrot.slane %v3207_v63, 7 }
0x1628   :  { %3910 = vmatpush.msk.msra.mxu2 %vm5806_vm4, %v3242_v62  ;;  %vm5813_vm4 = vmmov %vm5812_vm0 }
0x1629   :  { %3911 = vmatmul.msk.f32.vlgmr.msra.gmra.mxu2 %vm5807_vm13, %v3225_v15  ;;  %vm5814_vm13 = vcmask 523264  }
0x162a   :  { %v3231_v10 = vpop.trf.xlu2 }
0x1631   :  { %3912 = vmatmul.msk.f32.gmra.mxu2 %vm5800_vm5, %v3226_v34  ;;  %vm5815_vm5 = vcmask 1040384  }
0x1632   :  { %v3232_v44 = vpop.trf.xlu2 }
0x1639   :  { %3913 = vmatmul.msk.f32.gmra.mxu2 %vm5808_vm12, %v3227_v45  ;;  %vm5816_vm12 = vmmov %vm5812_vm0 }
0x1641   :  { %3914 = vmatmul.msk.f32.gmra.mxu2 %vm5809_vm15, %v3228_v50  ;;  %vm5817_vm15 = vmmov %vm5812_vm0 }
0x1649   :  { %3915 = vmatmul.msk.f32.gmra.mxu2 %vm5810_vm9, %v3229_v51  ;;  %vm5818_vm9 = vmmov %vm5812_vm0 }
0x1651   :  { %3916 = vmatmul.msk.f32.gmra.mxu2 %vm5811_vm7, %v3230_v2  ;;  %vm5819_vm7 = vmmov %vm5812_vm0 }
0x1659   :  { %3917 = vmatmul.msk.f32.gmra.mxu2 %vm5812_vm0, %v3231_v10 }
0x1661   :  { %3918 = vmatmul.msk.f32.gmra.mxu2 %vm5813_vm4, %v3232_v44  ;;  %vm5820_vm4 = vmmov %vm5812_vm0 }
0x16ac   :  { %v3286_v7 = vpop.f32.mrf.mxu2 }
0x16ad   :  { %v3310_v36 = vsel %vm5700_vm14, %v3286_v7, 0.0 }
0x16ae   :  { %v3318_v29 = vadd.f32 %v3310_v36, %v5461_v54 }
0x16b4   :  { %v3289_v4 = vpop.f32.mrf.mxu2 }
0x16b5   :  { %v3311_v33 = vsel %vm5699_vm8, %v3289_v4, 0.0 }
0x16bc   :  { %v3292_v22 = vpop.f32.mrf.mxu2 }
0x16bd   :  { %v3312_v1 = vsel %vm4778_vm6, %v3292_v22, 0.0 }
0x16c4   :  { %v3295_v12 = vpop.f32.mrf.mxu2 }
0x16c5   :  { %v3313_v60 = vsel %vm4767_vm3, %v3295_v12, 0.0 }
0x16cc   :  { %v3298_v5 = vpop.f32.mrf.mxu2 }
0x16cd   :  { %v3314_v49 = vsel %vm4755_vm2, %v3298_v5, 0.0 }
0x16ce   :  { %v3322_v37 = vadd.f32 %v3314_v49, %v3176_v55  ;;  %v3371_v55 = vpop.trf.xlu0 }
0x16d4   :  { %v3301_v23 = vpop.f32.mrf.mxu2 }
0x16d5   :  { %v3315_v26 = vsel %vm4747_vm1, %v3301_v23, 0.0 }
0x16d6   :  { %v3323_v6 = vadd.f32 %v3315_v26, %v3177_v18  ;;  %v3319_v18 = vadd.f32 %v3311_v33, %v3173_v39 }
0x16dc   :  { %v3304_v8 = vpop.f32.mrf.mxu2 }
0x16dd   :  { %v3316_v61 = vsel %vm4739_vm10, %v3304_v8, 0.0 }
0x16de   :  { %v3324_v35 = vadd.f32 %v3316_v61, %v5475_v20  ;;  %v3320_v20 = vadd.f32 %v3312_v1, %v3174_v9  ;;  %v3372_v9 = vpop.trf.xlu0 }
0x16e4   :  { %v3307_v21 = vpop.f32.mrf.mxu2 }
0x16e5   :  { %v3317_v16 = vsel %vm4743_vm11, %v3307_v21, 0.0 }
0x16e6   :  { %v3325_v59 = vadd.f32 %v3317_v16, %v5471_v19  ;;  %v3321_v19 = vadd.f32 %v3313_v60, %v3175_v43  ;;  %v3373_v54 = vpop.trf.xlu0  ;;  %v4062_v16 = vpop.eup %4061 }
0x16e7   :  { %v3586_v57 = vadd.f32 1.0, %v4062_v16  ;;  %v3692_v16 = vld [vmem:[#allocation8 + $0x18] sm:$0xff] }
0x16e8   :  { %3337 = vmatpush.msrb.mxu0 %v3325_v59 }
0x16e9   :  { %4063 = vrcp.f32 %v3586_v57  ;;  %v3599_v60 = vand.u32 2147483648, %v3586_v57 }
0x16ea   :  { %3338 = vmatpush.msrb.mxu0 %v3324_v35 }
0x16ec   :  { %3339 = vmatpush.msrb.mxu0 %v3323_v6 }
0x16ee   :  { %3340 = vmatpush.msrb.mxu0 %v3322_v37  ;;  %v3374_v39 = vpop.trf.xlu0 }
0x16f0   :  { %3341 = vmatpush.msrb.mxu0 %v3321_v19 }
0x16f2   :  { %3342 = vmatpush.msrb.mxu0 %v3320_v20 }
0x16f4   :  { %3343 = vmatpush.msrb.mxu0 %v3319_v18 }
0x16f6   :  { %3344 = vmatpush.msrb.mxu0 %v3318_v29  ;;  %v3375_v13 = vpop.trf.xlu0 }
0x16f7   :  { %3919 = vmatmul.msk.f32.vlgmr.msrb.gmra.mxu0 %vm5814_vm13, %v3326_v27  ;;  %vm5821_vm13 = vmmov %vm5812_vm0 }
0x1774   :  { %v3346_v0 = vpop.f32.mrf.mxu0 }
0x1775   :  { %v3350_v43 = vrot.slane %v3346_v0, 1 }
0x1777   :  { %v3352_v28 = vsub.f32 %v4855_v30, %v3350_v43  ;;  %v3376_v30 = vpop.trf.xlu0  ;;  %v5825_v43 = vld [vmem:[#allocation15_spill] sm:$0xff] }
0x1779   :  { %v3353_v15 = vmul.f32 %v3352_v28, %v4868_v48  ;;  %v3931_v28 = vmul.f32 -1.442695, %v5825_v43 }
0x177b   :  { %v3388_v52 = vrot.slane %v3353_v15, 7  ;;  %4065 = vpow2.f32 %v3931_v28 }
0x177d   :  { %3920 = vmatpush.msk.msra.mxu0 %vm5815_vm5, %v3388_v52  ;;  %vm5822_vm5 = vmmov %vm5812_vm0 }
0x177e   :  { %3921 = vmatmul.msk.f32.vlgmr.msra.gmra.mxu0 %vm5816_vm12, %v3371_v55  ;;  %v3676_v55 = vmul.f32 %v4586_v3, %v4382_v42 }
0x177f   :  { %v3377_v48 = vpop.trf.xlu0 }
0x1786   :  { %3922 = vmatmul.msk.f32.gmra.mxu0 %vm5817_vm15, %v3372_v9 }
0x1787   :  { %v3378_v27 = vpop.trf.xlu0 }
0x178e   :  { %3923 = vmatmul.msk.f32.gmra.mxu0 %vm5818_vm9, %v3373_v54 }
0x1796   :  { %3924 = vmatmul.msk.f32.gmra.mxu0 %vm5819_vm7, %v3374_v39 }
0x179e   :  { %3925 = vmatmul.msk.f32.gmra.mxu0 %vm5812_vm0, %v3375_v13 }
0x17a6   :  { %3926 = vmatmul.msk.f32.gmra.mxu0 %vm5820_vm4, %v3376_v30 }
0x17ae   :  { %3927 = vmatmul.msk.f32.gmra.mxu0 %vm5821_vm13, %v3377_v48 }
0x17b6   :  { %3928 = vmatmul.msk.f32.gmra.mxu0 %vm5822_vm5, %v3378_v27 }
0x17fb   :  { %v3432_v38 = vpop.f32.mrf.mxu0 }
0x17fc   :  { %v3456_v31 = vsel %vm5700_vm14, %v3432_v38, 0.0  ;;  %vm5824_vm14 = vcmask 261120  }
0x17fd   :  { %v3464_v61 = vadd.f32 %v3456_v31, %v3318_v29  ;;  %vm5826_vm12 = vmmov %vm5824_vm14  ;;  %v3695_v31 = vld [vmem:[#allocation8 + $0x30] sm:$0xff] }
0x17fe   :  { %vm5827_vm0 = vmmov %vm5826_vm12 }
0x17ff   :  { %vm5828_vm13 = vmmov %vm5827_vm0 }
0x1803   :  { %v3435_v40 = vpop.f32.mrf.mxu0 }
0x1804   :  { %v3457_v56 = vsel %vm5699_vm8, %v3435_v40, 0.0 }
0x1805   :  { %v3465_v21 = vadd.f32 %v3457_v56, %v3319_v18 }
0x180b   :  { %v3438_v34 = vpop.f32.mrf.mxu0 }
0x180c   :  { %v3458_v17 = vsel %vm4778_vm6, %v3438_v34, 0.0 }
0x180d   :  { %v3466_v8 = vadd.f32 %v3458_v17, %v3320_v20  ;;  %v3600_v20 = vor.u32 1.1754944e-38, %v3599_v60 }
0x1813   :  { %v3441_v63 = vpop.f32.mrf.mxu0 }
0x1814   :  { %v3459_v5 = vsel %vm4767_vm3, %v3441_v63, 0.0 }
0x1815   :  { %v3467_v11 = vadd.f32 %v3459_v5, %v3321_v19  ;;  %v3597_v19 = vand.u32 2147483647, %v3586_v57 }
0x1817   :  { %vm3598_vm8 = vcmp.eq.f32.partialorder %v3597_v19, 8.507059e+37 }
0x181b   :  { %v3444_v62 = vpop.f32.mrf.mxu0 }
0x181c   :  { %v3460_v22 = vsel %vm4755_vm2, %v3444_v62, 0.0  ;;  %vm3593_vm2 = vweird.f32 %v3586_v57 }
0x181d   :  { %v3468_v23 = vadd.f32 %v3460_v22, %v3322_v37 }
0x1823   :  { %v3447_v45 = vpop.f32.mrf.mxu0 }
0x1824   :  { %v3461_v7 = vsel %vm4747_vm1, %v3447_v45, 0.0  ;;  %vm3527_vm1 = vcmask 1046528  }
0x1825   :  { %v3469_v12 = vadd.f32 %v3461_v7, %v3323_v6 }
0x182b   :  { %v3450_v50 = vpop.f32.mrf.mxu0 }
0x182c   :  { %v3462_v2 = vsel %vm4739_vm10, %v3450_v50, 0.0  ;;  %vm5823_vm10 = vcmask 523264   ;;  %v5588_v50 = vld [vmem:[%s5615_s5] ss:$0 sm:$0xff]  ;;  %s4231_s5 = smov [#allocation10]  }
0x182d   :  { %v3470_v4 = vadd.f32 %v3462_v2, %v3324_v35  ;;  %s3733_s1 = sshll.u32 %s4231_s5, 4  ;;  %s3734_s1 = int_to_ptr.vmem [resolvable:$true] %s3733_s1 }
0x1833   :  { %v3453_v51 = vpop.f32.mrf.mxu0 }
0x1834   :  { %v3463_v10 = vsel %vm4743_vm11, %v3453_v51, 0.0  ;;  %vm3525_vm11 = vcmask 1045504   ;;  %v4230_v51 = vmov 32.0  }
0x1835   :  { %v3471_v44 = vadd.f32 %v3463_v10, %v3325_v59  ;;  %v4064_v59 = vpop.eup %4063  ;;  %v3526_v37 = vsel %vm3525_vm11, %v5401_v46, %v3511_v58  ;;  %v3675_v46 = vmul.f32 %v4555_v14, %v4380_v41 }
0x1836   :  { %v3589_v26 = vmul.f32 %v4064_v59, %v3586_v57  ;;  %vm3594_vm3 = vweird.f32 %v4064_v59  ;;  %v4066_v9 = vpop.eup %4065 }
0x1837   :  { %3483 = vmatpush.msra.mxu1 %v3471_v44  ;;  %vm3595_vm6 = vmor %vm3593_vm2, %vm3594_vm3 }
0x1838   :  { %v3590_v35 = vsub.f32 1.0, %v3589_v26 }
0x1839   :  { %3484 = vmatpush.msra.mxu1 %v3470_v4 }
0x183a   :  { %v3591_v49 = vmul.f32 %v4064_v59, %v3590_v35  ;;  %v3690_v35 = vld [vmem:[#allocation8 + $0x8] sm:$0xff] }
0x183b   :  { %3485 = vmatpush.msra.mxu1 %v3469_v12 }
0x183c   :  { %v3592_v1 = vadd.f32 %v4064_v59, %v3591_v49 }
0x183d   :  { %3486 = vmatpush.msra.mxu1 %v3468_v23 }
0x183e   :  { %v3596_v36 = vsel %vm3595_vm6, %v4064_v59, %v3592_v1  ;;  %v3691_v59 = vld [vmem:[#allocation8 + $0x10] sm:$0xff] }
0x183f   :  { %3487 = vmatpush.msra.mxu1 %v3467_v11  ;;  %v3601_v18 = vsel %vm3598_vm8, %v3600_v20, %v3596_v36  ;;  %v3696_v11 = vld [vmem:[#allocation8 + $0x38] sm:$0xff] }
0x1840   :  { %v3618_v29 = vmul.f32 %v3601_v18, %v4421_v53  ;;  %v3587_v53 = vadd.f32 1.0, %v4066_v9 }
0x1841   :  { %3488 = vmatpush.msra.mxu1 %v3466_v8 }
0x1842   :  { %4067 = vrcp.f32 %v3587_v53  ;;  %vm3608_vm15 = vweird.f32 %v3587_v53  ;;  %v3614_v42 = vand.u32 2147483648, %v3587_v53  ;;  %v3612_v13 = vand.u32 2147483647, %v3587_v53 }
0x1843   :  { %3489 = vmatpush.msra.mxu1 %v3465_v21  ;;  %4069 = vrcp.f32 %v4230_v51 }
0x1844   :  { %v3615_v27 = vor.u32 1.1754944e-38, %v3614_v42  ;;  %vm3613_vm4 = vcmp.eq.f32.partialorder %v3612_v13, 8.507059e+37 }
0x1845   :  { %3490 = vmatpush.msra.mxu1 %v3464_v61  ;;  %v3694_v61 = vld [vmem:[#allocation8 + $0x28] sm:$0xff] }
0x1846   :  { %3929 = vmatmul.msk.f32.vlgmr.msra.gmra.mxu1 %vm5823_vm10, %v3472_v32  ;;  %v3693_v32 = vld [vmem:[#allocation8 + $0x20] sm:$0xff] }
0x1847   :  { %3711 = vmatpush.msrb.mxu1 %v3696_v11 }
0x1848   :  { %v4068_v41 = vpop.eup %4067 }
0x1849   :  { %v3604_v14 = vmul.f32 %v4068_v41, %v3587_v53  ;;  %vm3609_vm9 = vweird.f32 %v4068_v41  ;;  %v4070_v2 = vpop.eup %4069  ;;  %3712 = vmatpush.msrb.mxu1 %v3695_v31 }
0x184a   :  { %vm3610_vm7 = vmor %vm3608_vm15, %vm3609_vm9  ;;  %v3543_v10 = vmul.f32 32.0, %v4070_v2  ;;  %vm3547_vm5 = vweird.f32 %v4070_v2 }
0x184b   :  { %v3605_v54 = vsub.f32 1.0, %v3604_v14  ;;  %3713 = vmatpush.msrb.mxu1 %v3694_v61 }
0x184c   :  { %v3544_v44 = vsub.f32 1.0, %v3543_v10 }
0x184d   :  { %v3606_v39 = vmul.f32 %v4068_v41, %v3605_v54  ;;  %3714 = vmatpush.msrb.mxu1 %v3693_v32 }
0x184e   :  { %v3545_v7 = vmul.f32 %v4070_v2, %v3544_v44 }
0x184f   :  { %v3607_v3 = vadd.f32 %v4068_v41, %v3606_v39  ;;  %3715 = vmatpush.msrb.mxu1 %v3692_v16 }
0x1850   :  { %v3546_v22 = vadd.f32 %v4070_v2, %v3545_v7 }
0x1851   :  { %v3611_v40 = vsel %vm3610_vm7, %v4068_v41, %v3607_v3  ;;  %3716 = vmatpush.msrb.mxu1 %v3691_v59 }
0x1852   :  { %v3616_v34 = vsel %vm3613_vm4, %v3615_v27, %v3611_v40  ;;  %v3548_v12 = vsel %vm3547_vm5, %v4070_v2, %v3546_v22  ;;  %vm5829_vm4 = vcmask 523264  }
0x1853   :  { %v3619_v63 = vmul.f32 %v3616_v34, %v5825_v43  ;;  %3717 = vmatpush.msrb.mxu1 %v3690_v35  ;;  %vm5831_vm5 = vmmov %vm5829_vm4 }
0x18c3   :  { %v3492_v6 = vpop.f32.mrf.mxu1 }
0x18c4   :  { %v3514_v25 = vrot.slane %v3492_v6, 1  ;;  %v3689_v6 = vld [vmem:[#allocation8] sm:$0xff] }
0x18c5   :  { %3718 = vmatpush.msrb.mxu1 %v3689_v6 }
0x18c6   :  { %v5558_v33 = vsel %vm3527_vm1, %v3526_v37, %v3514_v25 }
0x18c7   :  { %3530 = vrot.lane.b32.xlu1 %v5558_v33, %s4219_s26  ;;  %v3534_v24 = vmul.f32 %v5558_v33, %v5558_v33 }
0x18c9   :  { %3632 = vrot.lane.b32.xlu2 %v3534_v24, %s4218_s25  ;;  %v3536_v0 = vsel %vm5824_vm14, %v3534_v24, 0.0 }
0x18d1   :  { %3622 = vrot.lane.b32.xlu2 %v3618_v29, %s4226_s30 }
0x18d9   :  { %3679 = vrot.lane.b32.xlu2 %v3675_v46, %s4226_s30 }
0x18e1   :  { %3681 = vrot.lane.b32.xlu2 %v3676_v55, %s4226_s30 }
0x18f1   :  { %3537 = vadd.xlane.f32.xlu1 %v3536_v0 }
0x1923   :  { %v3633_v15 = vpop.permute.xlu2 %3632 }
0x1924   :  { %v3638_v52 = vsel %vm5826_vm12, %v3633_v15, 0.0 }
0x1925   :  { %3639 = vadd.xlane.f32.xlu1 %v3638_v52 }
0x192b   :  { %v3623_v28 = vpop.permute.xlu2 %3622 }
0x1939   :  { %v5576_v30 = vpop.permute.xlu1 %3530 }
0x193a   :  { %v3535_v48 = vmul.f32 %v5576_v30, %v5576_v30 }
0x193c   :  { %3634 = vrot.lane.b32.xlu0 %v3535_v48, %s4218_s25  ;;  %v3539_v38 = vsel %vm5827_vm0, %v3535_v48, 0.0 }
0x193d   :  { %3540 = vadd.xlane.f32.xlu1 %v3539_v38  ;;  %v3680_v38 = vpop.permute.xlu2 %3679 }
0x1944   :  { %3624 = vrot.lane.b32.xlu0 %v3619_v63, %s4226_s30 }
0x1964   :  { %v3538_v4 = vpop.xlane.xlu1 %3537 }
0x1965   :  { %v3549_v23 = vmul.f32 %v3548_v12, %v3538_v4 }
0x1967   :  { %v3551_v56 = vadd.f32 1e-05, %v3549_v23 }
0x1969   :  { %4071 = vrsqrt.f32 %v3551_v56  ;;  %vm3559_vm11 = vweird.f32 %v3551_v56 }
0x196f   :  { %v4072_v26 = vpop.eup %4071 }
0x1970   :  { %v3554_v49 = vmul.f32 %v4072_v26, %v3551_v56  ;;  %vm3560_vm10 = vweird.f32 %v4072_v26 }
0x1971   :  { %vm3561_vm1 = vmor %vm3559_vm11, %vm3560_vm10 }
0x1972   :  { %v3555_v60 = vmul.f32 %v4072_v26, %v3554_v49  ;;  %vm5832_vm10 = vmmov %vm5829_vm4 }
0x1973   :  { %vm5833_vm11 = vmmov %vm5829_vm4 }
0x1974   :  { %v3556_v36 = vmul.f32 0.5, %v3555_v60 }
0x1976   :  { %v3557_v46 = vsub.f32 1.5, %v3556_v36 }
0x1978   :  { %v3558_v9 = vmul.f32 %v4072_v26, %v3557_v46 }
0x197a   :  { %v3562_v14 = vsel %vm3561_vm1, %v4072_v26, %v3558_v9 }
0x197b   :  { %v3573_v3 = vmul.f32 %v3562_v14, %v5558_v33 }
0x197d   :  { %v3578_v34 = vmul.f32 %v5588_v50, %v3573_v3 }
0x197f   :  { %v3628_v44 = vmul.f32 %v3623_v28, %v3578_v34 }
0x1998   :  { %v3640_v5 = vpop.xlane.xlu1 %3639 }
0x1999   :  { %v3644_v17 = vmul.f32 %v3640_v5, %v3548_v12  ;;  %v3682_v5 = vpop.permute.xlu2 %3681 }
0x199b   :  { %v3646_v21 = vadd.f32 1e-05, %v3644_v17 }
0x199d   :  { %4073 = vrsqrt.f32 %v3646_v21  ;;  %vm3654_vm3 = vweird.f32 %v3646_v21 }
0x19a3   :  { %v4074_v58 = vpop.eup %4073 }
0x19a4   :  { %v3649_v25 = vmul.f32 %v4074_v58, %v3646_v21  ;;  %vm3655_vm2 = vweird.f32 %v4074_v58 }
0x19a5   :  { %vm3656_vm6 = vmor %vm3654_vm3, %vm3655_vm2 }
0x19a6   :  { %v3650_v24 = vmul.f32 %v4074_v58, %v3649_v25 }
0x19a8   :  { %v3651_v29 = vmul.f32 0.5, %v3650_v24 }
0x19aa   :  { %v3652_v43 = vsub.f32 1.5, %v3651_v29 }
0x19ac   :  { %v3653_v41 = vmul.f32 %v4074_v58, %v3652_v43 }
0x19ae   :  { %v3635_v62 = vpop.permute.xlu0 %3634  ;;  %v3657_v13 = vsel %vm3656_vm6, %v4074_v58, %v3653_v41 }
0x19af   :  { %v3641_v45 = vsel %vm5828_vm13, %v3635_v62, 0.0  ;;  %v3668_v63 = vmul.f32 %v3657_v13, %v5558_v33  ;;  %vm5830_vm13 = vmmov %vm5827_vm0 }
0x19b0   :  { %3642 = vadd.xlane.f32.xlu1 %v3641_v45  ;;  %v3541_v8 = vpop.xlane.xlu1 %3540 }
0x19b1   :  { %v3550_v47 = vmul.f32 %v3548_v12, %v3541_v8 }
0x19b3   :  { %v3552_v57 = vadd.f32 1e-05, %v3550_v47 }
0x19b5   :  { %4075 = vrsqrt.f32 %v3552_v57  ;;  %vm3569_vm9 = vweird.f32 %v3552_v57 }
0x19b6   :  { %v3625_v17 = vpop.permute.xlu0 %3624 }
0x19bb   :  { %v4076_v1 = vpop.eup %4075 }
0x19bc   :  { %v3564_v18 = vmul.f32 %v4076_v1, %v3552_v57  ;;  %vm3570_vm14 = vweird.f32 %v4076_v1 }
0x19bd   :  { %vm3571_vm7 = vmor %vm3569_vm9, %vm3570_vm14 }
0x19be   :  { %v3565_v55 = vmul.f32 %v4076_v1, %v3564_v18 }
0x19c0   :  { %v3566_v53 = vmul.f32 0.5, %v3565_v55 }
0x19c2   :  { %v3567_v54 = vsub.f32 1.5, %v3566_v53 }
0x19c4   :  { %v3568_v48 = vmul.f32 %v4076_v1, %v3567_v54 }
0x19c6   :  { %v3572_v62 = vsel %vm3571_vm7, %v4076_v1, %v3568_v48 }
0x19c7   :  { %v3574_v10 = vmul.f32 %v3572_v62, %v5576_v30 }
0x19c9   :  { %3670 = vrot.lane.b32.xlu1 %v5588_v50, %s4226_s30 }
0x1a23   :  { %v3643_v37 = vpop.xlane.xlu1 %3642 }
0x1a24   :  { %v3645_v19 = vmul.f32 %v3643_v37, %v3548_v12  ;;  %v3579_v12 = vmul.f32 %v5588_v50, %v3574_v10 }
0x1a26   :  { %v3647_v20 = vadd.f32 1e-05, %v3645_v19  ;;  %v3629_v33 = vmul.f32 %v3625_v17, %v3579_v12 }
0x1a28   :  { %4077 = vrsqrt.f32 %v3647_v20  ;;  %vm3664_vm12 = vweird.f32 %v3647_v20 }
0x1a2e   :  { %v4078_v0 = vpop.eup %4077 }
0x1a2f   :  { %v3659_v15 = vmul.f32 %v4078_v0, %v3647_v20  ;;  %vm3665_vm8 = vweird.f32 %v4078_v0 }
0x1a30   :  { %vm3666_vm15 = vmor %vm3664_vm12, %vm3665_vm8 }
0x1a31   :  { %v3660_v52 = vmul.f32 %v4078_v0, %v3659_v15 }
0x1a33   :  { %v3661_v39 = vmul.f32 0.5, %v3660_v52 }
0x1a35   :  { %v3662_v42 = vsub.f32 1.5, %v3661_v39 }
0x1a37   :  { %v3663_v27 = vmul.f32 %v4078_v0, %v3662_v42 }
0x1a39   :  { %v3667_v40 = vsel %vm3666_vm15, %v4078_v0, %v3663_v27 }
0x1a3a   :  { %v3669_v51 = vmul.f32 %v3667_v40, %v5576_v30 }
0x1a3b   :  { %v3671_v45 = vpop.permute.xlu1 %3670 }
0x1a3c   :  { %v3673_v2 = vmul.f32 %v3671_v45, %v3668_v63  ;;  %v3674_v4 = vmul.f32 %v3671_v45, %v3669_v51 }
0x1a3e   :  { %v3685_v7 = vmul.f32 %v3680_v38, %v3673_v2  ;;  %v3686_v23 = vmul.f32 %v3682_v5, %v3674_v4 }
0x1a40   :  { %v3687_v22 = vsel %vm5827_vm0, %v3628_v44, %v3685_v7  ;;  %v3688_v11 = vsel %vm5830_vm13, %v3629_v33, %v3686_v23 }
0x1a41   :  { %3932 = vmatmul.msk.f32.vlgmr.msrb.gmra.mxu1 %vm5829_vm4, %v3687_v22 }
0x1a49   :  { %3933 = vmatmul.msk.f32.gmra.mxu1 %vm5831_vm5, %v3688_v11 }
0x1abe   :  { %v3720_v56 = vpop.f32.mrf.mxu1 }
0x1abf   :  { %3726 = vst.msk [vmem:[#allocation10] sm:$0xff] %vm5832_vm10, %v3720_v56 }
0x1ac6   :  { %v3723_v30 = vpop.f32.mrf.mxu1 }
0x1ac7   :  { %3728 = vst.msk [vmem:[#allocation10 + $0x8] sm:$0xff] %vm5833_vm11, %v3723_v30 }
0x1ac8   :  { %3741 = dma.vmem_to_hbm [thread:$0]  %s3734_s1, 256, %s3736_s17, [#allocation4], %s4211_s13, %s4211_s13, %s4212_s14  }
0x1ac9   :  { %4205 = dma.done.wait [#allocation4], 256  }
0x1aca   :  { %4206 = vsyncadd [#allocation4], 4294967040 }
0x1acb   :  { %3746 = vsyncpa [#allocation3], 1 }
0x1acc   :  { %3747 = vsyncpa [#allocation6], 1 }
0x1acd   :  { %3748 = vsyncpa [#allocation9], 1 }
0x1ace   :  { %3749 = vsyncpa [#allocation4], 1 }

</bundles_post_ra>
